<compile_context>
chip_gen: v5e
topology: v5e:2x2
jax: 0.10.0
libtpu: 0.0.40
codegen_flags: <defaults>
</compile_context>

<pallas_src>
import functools
import numpy as np
import jax
import jax.numpy as jnp
from jax.experimental import pallas as pl
from jax.experimental.pallas import tpu as pltpu


def _lepe_attn_kernel(mask_ref, taps_ref, bias_ref, q_ref, k_ref, v_ref, o_ref, *,
                      num_heads, head_dim, w_blk, offsets):
    """One grid step = w_blk attention windows, window-batched layout.

    mask_ref : (9, N, 1)        f32   per-window 3x3 boundary masks (one per tap)
    taps_ref : (9, 1, C)        f32   depthwise-conv tap weights
    bias_ref : (1, C)           f32   depthwise-conv bias
    q_ref    : (w_blk, N, C)    bf16  queries (qk scale already folded in)
    k_ref    : (w_blk, N, C)    bf16  keys
    v_ref    : (w_blk, N, C)    bf16  values
    o_ref    : (N, w_blk*C)           output tile (windows packed along lanes)
    """
    n_tok = q_ref.shape[1]
    chans = num_heads * head_dim
    m_rows = w_blk * n_tok

    v_bf = v_ref[...]                                       # (w_blk, N, C) bf16
    vf = v_bf.astype(jnp.float32)                           # f32 for LePE accumulation

    # ---- LePE: zero-padded 3x3 depthwise conv = 9 token-axis rolls (XLU) with a
    #      rank-1 (boundary-mask x tap) factor applied on the VPU. The roll is done
    #      on the flat (w_blk*N, C) view; any cross-window wrap-around is killed by
    #      the boundary mask (masked taps never leave their window). ----
    vflat = vf.reshape(m_rows, chans)
    lepe = jnp.zeros_like(vf)
    for t, off in enumerate(offsets):
        if off == 0:
            rolled = vf
        else:
            rolled = pltpu.roll(vflat, (-off) % m_rows, axis=0).reshape(
                w_blk, n_tok, chans)
        lepe = lepe + rolled * (mask_ref[t] * taps_ref[t])   # (N,1)*(1,C) rank-1 factor
    lepe = lepe + bias_ref[...]

    # ---- attention: window-batched, head-sliced — no window mask, no wasted FLOPs.
    #      bf16 MXU inputs, f32 accumulation, f32 softmax. ----
    q = q_ref[...]                                           # (w_blk, N, C) bf16
    k = k_ref[...]

    head_outs = []
    for hh in range(num_heads):
        lo = hh * head_dim
        hi = lo + head_dim
        s = jnp.einsum('bqd,bkd->bqk', q[:, :, lo:hi], k[:, :, lo:hi],
                       preferred_element_type=jnp.float32)    # (w_blk, N, N)
        s = s - jnp.max(s, axis=-1, keepdims=True)
        p = jnp.exp(s)
        p = p * pl.reciprocal(jnp.sum(p, axis=-1, keepdims=True), approx=True)
        head_outs.append(
            jnp.einsum('bqk,bkd->bqd', p.astype(jnp.bfloat16), v_bf[:, :, lo:hi],
                       preferred_element_type=jnp.float32))   # (w_blk, N, hd)

    out = jnp.concatenate(head_outs, axis=-1) + lepe          # (w_blk, N, C) f32

    # ---- single lane-dense store: pack this step's windows along the lane axis ----
    o_wide = jnp.concatenate([out[i] for i in range(w_blk)], axis=-1)  # (N, w_blk*C)
    o_ref[...] = o_wide.astype(o_ref.dtype)


def _pick_w_blk(num_windows, n_tok, chans, out_bytes):
    """Windows per grid step: fit a VMEM budget; prefer a lane-dense (>=128 lane)
    output block, and grid >= 2 (v7x megacore) when both are achievable."""
    def est(wb):                                   # rough per-step VMEM bytes
        in_blk = wb * n_tok * chans * 2            # bf16 q/k/v blocks
        out_blk = n_tok * wb * chans * out_bytes
        f32_tmp = wb * n_tok * chans * 4           # vf / lepe / merged-out temporaries
        score = wb * n_tok * n_tok * 4             # live f32 scores / probs per head
        return 2 * 3 * in_blk + 2 * out_blk + 4 * f32_tmp + 3 * score

    budget = 24 * 1024 * 1024                      # conservative vs v7x 64 MiB VMEM
    cands = [d for d in range(1, num_windows + 1)
             if num_windows % d == 0 and est(d) <= budget] or [1]
    lane_dense = [d for d in cands if d * chans >= 128]
    both = [d for d in lane_dense if num_windows // d >= 2]
    if both:
        return max(both)            # lane-dense, amortized, and >= 2 grid steps
    if lane_dense:
        return min(lane_dense)      # lane-dense; single step is fine on 1-TC chips
    multi = [d for d in cands if num_windows // d >= 2]
    return max(multi) if multi else max(cands)


def lepe_attention(qkv, conv_weight, conv_bias, *, dim, resolution, idx,
                   split_size, num_heads):
    q, k, v = qkv[0], qkv[1], qkv[2]
    b, l, c = q.shape
    h = w = resolution
    if idx == 0:
        H_sp, W_sp = resolution, split_size
    elif idx == 1:
        W_sp, H_sp = resolution, split_size
    else:
        raise ValueError("bad idx")
    head_dim = dim // num_heads
    scale = head_dim ** (-0.5)
    N = H_sp * W_sp

    def to_windows(x):  # (B, L, C) -> (num_windows, N, C), token n = i*W_sp + j
        xi = jnp.transpose(x, (0, 2, 1)).reshape(b, c, h, w)
        xi = xi.reshape(b, c, h // H_sp, H_sp, w // W_sp, W_sp)
        return jnp.transpose(xi, (0, 2, 4, 3, 5, 1)).reshape(-1, N, c)

    q_w, k_w, v_w = to_windows(q), to_windows(k), to_windows(v)
    num_windows = q_w.shape[0]

    w_blk = _pick_w_blk(num_windows, N, c, np.dtype(q.dtype).itemsize)
    grid = num_windows // w_blk

    # bf16 MXU / DMA inputs; qk scale folded into q on the host.
    q_in = (q_w * scale).astype(jnp.bfloat16)
    k_in = k_w.astype(jnp.bfloat16)
    v_in = v_w.astype(jnp.bfloat16)

    # Depthwise 3x3 conv as token-axis rolls: per-tap flat offset, per-window
    # boundary mask (9, N, 1) and tap table (9, 1, C); rank-1 product done in-kernel.
    offsets = []
    mask_np = np.zeros((9, N, 1), np.float32)
    for di in range(3):
        for dj in range(3):
            t = di * 3 + dj
            offsets.append((di - 1) * W_sp + (dj - 1))
            for i in range(H_sp):
                for j in range(W_sp):
                    if 0 <= i + di - 1 < H_sp and 0 <= j + dj - 1 < W_sp:
                        mask_np[t, i * W_sp + j, 0] = 1.0
    mask = jnp.asarray(mask_np)                                         # (9, N, 1)
    taps = jnp.transpose(conv_weight.reshape(dim, 9), (1, 0))           # (9, C)
    taps = taps.reshape(9, 1, dim).astype(jnp.float32)                  # (9, 1, C)
    bias2d = conv_bias.reshape(1, dim).astype(jnp.float32)

    kernel = functools.partial(_lepe_attn_kernel, num_heads=num_heads,
                               head_dim=head_dim, w_blk=w_blk,
                               offsets=tuple(offsets))

    out_packed = pl.pallas_call(
        kernel,
        out_shape=jax.ShapeDtypeStruct((grid * N, w_blk * c), q.dtype),
        grid=(grid,),
        in_specs=[
            pl.BlockSpec((9, N, 1), lambda i: (0, 0, 0)),
            pl.BlockSpec((9, 1, c), lambda i: (0, 0, 0)),
            pl.BlockSpec((1, c), lambda i: (0, 0)),
            pl.BlockSpec((w_blk, N, c), lambda i: (i, 0, 0)),
            pl.BlockSpec((w_blk, N, c), lambda i: (i, 0, 0)),
            pl.BlockSpec((w_blk, N, c), lambda i: (i, 0, 0)),
        ],
        out_specs=pl.BlockSpec((N, w_blk * c), lambda i: (i, 0)),
        compiler_params=pltpu.CompilerParams(
            dimension_semantics=("parallel",)),
    )(mask, taps, bias2d, q_in, k_in, v_in)

    # Unpack lane-packed windows (layout plumbing) + windows2img + view(B, L, C).
    out_w = out_packed.reshape(grid, N, w_blk, c)
    out_w = jnp.transpose(out_w, (0, 2, 1, 3)).reshape(num_windows, N, c)
    x = out_w.reshape(b, h // H_sp, w // W_sp, H_sp, W_sp, c)
    x = jnp.transpose(x, (0, 1, 3, 2, 4, 5)).reshape(b, h, w, c)
    return x.reshape(b, h * w, c)


def lepe_attention_reference(qkv, conv_weight, conv_bias, *, dim, resolution,
                             idx, split_size, num_heads):
    """Pure-JAX transcription of the PyTorch forward (for validation)."""
    q, k, v = qkv[0], qkv[1], qkv[2]
    b, l, c = q.shape
    h = w = resolution
    if idx == 0:
        H_sp, W_sp = resolution, split_size
    else:
        W_sp, H_sp = resolution, split_size
    head_dim = c // num_heads
    scale = head_dim ** (-0.5)
    N = H_sp * W_sp

    def im2cswin(x):
        xi = jnp.transpose(x, (0, 2, 1)).reshape(b, c, h, w)
        xi = xi.reshape(b, c, h // H_sp, H_sp, w // W_sp, W_sp)
        xi = jnp.transpose(xi, (0, 2, 4, 3, 5, 1)).reshape(-1, N, c)
        return jnp.transpose(xi.reshape(-1, N, num_heads, head_dim), (0, 2, 1, 3))

    qh = im2cswin(q) * scale
    kh = im2cswin(k)

    v_sp = jnp.transpose(v, (0, 2, 1)).reshape(b, c, h, w)
    v_sp = v_sp.reshape(b, c, h // H_sp, H_sp, w // W_sp, W_sp)
    v_sp = jnp.transpose(v_sp, (0, 2, 4, 1, 3, 5)).reshape(-1, c, H_sp, W_sp)

    vp = jnp.pad(v_sp, ((0, 0), (0, 0), (1, 1), (1, 1)))
    lepe_sp = jnp.zeros_like(v_sp)
    for di in range(3):
        for dj in range(3):
            wtap = conv_weight[:, 0, di, dj][None, :, None, None]
            lepe_sp = lepe_sp + vp[:, :, di:di + H_sp, dj:dj + W_sp] * wtap
    lepe_sp = lepe_sp + conv_bias[None, :, None, None]

    vh = jnp.transpose(v_sp.reshape(-1, num_heads, head_dim, N), (0, 1, 3, 2))
    lepe = jnp.transpose(lepe_sp.reshape(-1, num_heads, head_dim, N), (0, 1, 3, 2))

    attn = jnp.einsum("whnd,whmd->whnm", qh, kh)
    attn = jax.nn.softmax(attn, axis=-1)
    x = jnp.einsum("whnm,whmd->whnd", attn, vh) + lepe
    x = jnp.transpose(x, (0, 2, 1, 3)).reshape(-1, N, c)
    x = x.reshape(b, h // H_sp, w // W_sp, H_sp, W_sp, c)
    x = jnp.transpose(x, (0, 1, 3, 2, 4, 5)).reshape(b, h, w, c)
    return x.reshape(b, h * w, c)


if __name__ == "__main__":
    # Module config (small, consistent with LePEAttention.__init__ / forward).
    dim = 32
    resolution = 8          # h = w = 8  ->  L = 64
    split_size = 4
    num_heads = 4
    idx = 0                 # H_sp = resolution, W_sp = split_size
    B = 2
    L = resolution * resolution

    key = jax.random.PRNGKey(0)
    k1, k2, k3 = jax.random.split(key, 3)
    qkv = jax.random.normal(k1, (3, B, L, dim), dtype=jnp.float32)
    # Deterministic synthetic parameters for get_v = Conv2d(dim, dim, 3, padding=1, groups=dim)
    conv_weight = 0.1 * jax.random.normal(k2, (dim, 1, 3, 3), dtype=jnp.float32)
    conv_bias = 0.1 * jax.random.normal(k3, (dim,), dtype=jnp.float32)

    out = lepe_attention(qkv, conv_weight, conv_bias, dim=dim,
                         resolution=resolution, idx=idx,
                         split_size=split_size, num_heads=num_heads)
    out = jax.block_until_ready(out)

    ref = lepe_attention_reference(qkv, conv_weight, conv_bias, dim=dim,
                                   resolution=resolution, idx=idx,
                                   split_size=split_size, num_heads=num_heads)
    # bf16 MXU / V inputs (f32 accumulation, f32 softmax) -> tolerance loosened vs
    # the pure-f32 reference.
    np.testing.assert_allclose(np.asarray(out), np.asarray(ref),
                               rtol=2e-2, atol=2e-2)
    print("KERNEL_OK")
</pallas_src>

<mosaic_0001>
module attributes {stable_mosaic.version = 11 : i64} {
  func.func @_lepe_attn_kernel(%arg0: i32, %arg1: memref<9x32x1xf32, #tpu.memory_space<vmem>>, %arg2: memref<9x1x32xf32, #tpu.memory_space<vmem>>, %arg3: memref<1x32xf32, #tpu.memory_space<vmem>>, %arg4: memref<4x32x32xbf16, #tpu.memory_space<vmem>>, %arg5: memref<4x32x32xbf16, #tpu.memory_space<vmem>>, %arg6: memref<4x32x32xbf16, #tpu.memory_space<vmem>>, %arg7: memref<32x128xf32, #tpu.memory_space<vmem>>) attributes {dimension_semantics = [#tpu.dimension_semantics<parallel>], iteration_bounds = array<i64: 1>, scalar_prefetch = 0 : i64, scratch_operands = 0 : i64, tpu.core_type = #tpu.core_type<tc>, window_params = [{pipeline_mode = #tpu.pipeline_mode<synchronous>, transform_indices = @transform_0, window_bounds = array<i64: 9, 32, 1>}, {pipeline_mode = #tpu.pipeline_mode<synchronous>, transform_indices = @transform_1, window_bounds = array<i64: 9, 1, 32>}, {pipeline_mode = #tpu.pipeline_mode<synchronous>, transform_indices = @transform_2, window_bounds = array<i64: 1, 32>}, {transform_indices = @transform_3, window_bounds = array<i64: 4, 32, 32>}, {transform_indices = @transform_4, window_bounds = array<i64: 4, 32, 32>}, {transform_indices = @transform_5, window_bounds = array<i64: 4, 32, 32>}, {transform_indices = @transform_6, window_bounds = array<i64: 32, 128>}]} {
    %c0 = arith.constant 0 : index
    %c0_0 = arith.constant 0 : index
    %c0_1 = arith.constant 0 : index
    %0 = vector.load %arg6[%c0, %c0_0, %c0_1] : memref<4x32x32xbf16, #tpu.memory_space<vmem>>, vector<4x32x32xbf16>
    %1 = arith.extf %0 : vector<4x32x32xbf16> to vector<4x32x32xf32>
    %2 = vector.shape_cast %1 : vector<4x32x32xf32> to vector<128x32xf32>
    %cst = arith.constant 0.000000e+00 : f32
    %3 = vector.broadcast %cst : f32 to vector<4x32x32xf32>
    %c5_i32 = arith.constant 5 : i32
    %4 = tpu.dynamic_rotate %2 by %c5_i32 dim 0 : vector<128x32xf32>, i32 -> vector<128x32xf32>
    %5 = vector.shape_cast %4 : vector<128x32xf32> to vector<4x32x32xf32>
    %c0_2 = arith.constant 0 : index
    %c0_3 = arith.constant 0 : index
    %c0_4 = arith.constant 0 : index
    %6 = vector.load %arg1[%c0_2, %c0_3, %c0_4] : memref<9x32x1xf32, #tpu.memory_space<vmem>>, vector<1x32x1xf32>
    %7 = vector.shape_cast %6 : vector<1x32x1xf32> to vector<32x1xf32>
    %c0_5 = arith.constant 0 : index
    %c0_6 = arith.constant 0 : index
    %c0_7 = arith.constant 0 : index
    %8 = vector.load %arg2[%c0_5, %c0_6, %c0_7] : memref<9x1x32xf32, #tpu.memory_space<vmem>>, vector<1x1x32xf32>
    %9 = vector.shape_cast %8 : vector<1x1x32xf32> to vector<1x32xf32>
    %10 = vector.broadcast %7 : vector<32x1xf32> to vector<32x32xf32>
    %11 = vector.broadcast %9 : vector<1x32xf32> to vector<32x32xf32>
    %12 = arith.mulf %10, %11 : vector<32x32xf32>
    %13 = vector.shape_cast %12 : vector<32x32xf32> to vector<1x32x32xf32>
    %14 = vector.broadcast %13 : vector<1x32x32xf32> to vector<4x32x32xf32>
    %15 = arith.mulf %5, %14 : vector<4x32x32xf32>
    %16 = arith.addf %3, %15 : vector<4x32x32xf32>
    %c4_i32 = arith.constant 4 : i32
    %17 = tpu.dynamic_rotate %2 by %c4_i32 dim 0 : vector<128x32xf32>, i32 -> vector<128x32xf32>
    %18 = vector.shape_cast %17 : vector<128x32xf32> to vector<4x32x32xf32>
    %c1 = arith.constant 1 : index
    %c0_8 = arith.constant 0 : index
    %c0_9 = arith.constant 0 : index
    %19 = vector.load %arg1[%c1, %c0_8, %c0_9] : memref<9x32x1xf32, #tpu.memory_space<vmem>>, vector<1x32x1xf32>
    %20 = vector.shape_cast %19 : vector<1x32x1xf32> to vector<32x1xf32>
    %c1_10 = arith.constant 1 : index
    %c0_11 = arith.constant 0 : index
    %c0_12 = arith.constant 0 : index
    %21 = vector.load %arg2[%c1_10, %c0_11, %c0_12] : memref<9x1x32xf32, #tpu.memory_space<vmem>>, vector<1x1x32xf32>
    %22 = vector.shape_cast %21 : vector<1x1x32xf32> to vector<1x32xf32>
    %23 = vector.broadcast %20 : vector<32x1xf32> to vector<32x32xf32>
    %24 = vector.broadcast %22 : vector<1x32xf32> to vector<32x32xf32>
    %25 = arith.mulf %23, %24 : vector<32x32xf32>
    %26 = vector.shape_cast %25 : vector<32x32xf32> to vector<1x32x32xf32>
    %27 = vector.broadcast %26 : vector<1x32x32xf32> to vector<4x32x32xf32>
    %28 = arith.mulf %18, %27 : vector<4x32x32xf32>
    %29 = arith.addf %16, %28 : vector<4x32x32xf32>
    %c3_i32 = arith.constant 3 : i32
    %30 = tpu.dynamic_rotate %2 by %c3_i32 dim 0 : vector<128x32xf32>, i32 -> vector<128x32xf32>
    %31 = vector.shape_cast %30 : vector<128x32xf32> to vector<4x32x32xf32>
    %c2 = arith.constant 2 : index
    %c0_13 = arith.constant 0 : index
    %c0_14 = arith.constant 0 : index
    %32 = vector.load %arg1[%c2, %c0_13, %c0_14] : memref<9x32x1xf32, #tpu.memory_space<vmem>>, vector<1x32x1xf32>
    %33 = vector.shape_cast %32 : vector<1x32x1xf32> to vector<32x1xf32>
    %c2_15 = arith.constant 2 : index
    %c0_16 = arith.constant 0 : index
    %c0_17 = arith.constant 0 : index
    %34 = vector.load %arg2[%c2_15, %c0_16, %c0_17] : memref<9x1x32xf32, #tpu.memory_space<vmem>>, vector<1x1x32xf32>
    %35 = vector.shape_cast %34 : vector<1x1x32xf32> to vector<1x32xf32>
    %36 = vector.broadcast %33 : vector<32x1xf32> to vector<32x32xf32>
    %37 = vector.broadcast %35 : vector<1x32xf32> to vector<32x32xf32>
    %38 = arith.mulf %36, %37 : vector<32x32xf32>
    %39 = vector.shape_cast %38 : vector<32x32xf32> to vector<1x32x32xf32>
    %40 = vector.broadcast %39 : vector<1x32x32xf32> to vector<4x32x32xf32>
    %41 = arith.mulf %31, %40 : vector<4x32x32xf32>
    %42 = arith.addf %29, %41 : vector<4x32x32xf32>
    %c1_i32 = arith.constant 1 : i32
    %43 = tpu.dynamic_rotate %2 by %c1_i32 dim 0 : vector<128x32xf32>, i32 -> vector<128x32xf32>
    %44 = vector.shape_cast %43 : vector<128x32xf32> to vector<4x32x32xf32>
    %c3 = arith.constant 3 : index
    %c0_18 = arith.constant 0 : index
    %c0_19 = arith.constant 0 : index
    %45 = vector.load %arg1[%c3, %c0_18, %c0_19] : memref<9x32x1xf32, #tpu.memory_space<vmem>>, vector<1x32x1xf32>
    %46 = vector.shape_cast %45 : vector<1x32x1xf32> to vector<32x1xf32>
    %c3_20 = arith.constant 3 : index
    %c0_21 = arith.constant 0 : index
    %c0_22 = arith.constant 0 : index
    %47 = vector.load %arg2[%c3_20, %c0_21, %c0_22] : memref<9x1x32xf32, #tpu.memory_space<vmem>>, vector<1x1x32xf32>
    %48 = vector.shape_cast %47 : vector<1x1x32xf32> to vector<1x32xf32>
    %49 = vector.broadcast %46 : vector<32x1xf32> to vector<32x32xf32>
    %50 = vector.broadcast %48 : vector<1x32xf32> to vector<32x32xf32>
    %51 = arith.mulf %49, %50 : vector<32x32xf32>
    %52 = vector.shape_cast %51 : vector<32x32xf32> to vector<1x32x32xf32>
    %53 = vector.broadcast %52 : vector<1x32x32xf32> to vector<4x32x32xf32>
    %54 = arith.mulf %44, %53 : vector<4x32x32xf32>
    %55 = arith.addf %42, %54 : vector<4x32x32xf32>
    %c4 = arith.constant 4 : index
    %c0_23 = arith.constant 0 : index
    %c0_24 = arith.constant 0 : index
    %56 = vector.load %arg1[%c4, %c0_23, %c0_24] : memref<9x32x1xf32, #tpu.memory_space<vmem>>, vector<1x32x1xf32>
    %57 = vector.shape_cast %56 : vector<1x32x1xf32> to vector<32x1xf32>
    %c4_25 = arith.constant 4 : index
    %c0_26 = arith.constant 0 : index
    %c0_27 = arith.constant 0 : index
    %58 = vector.load %arg2[%c4_25, %c0_26, %c0_27] : memref<9x1x32xf32, #tpu.memory_space<vmem>>, vector<1x1x32xf32>
    %59 = vector.shape_cast %58 : vector<1x1x32xf32> to vector<1x32xf32>
    %60 = vector.broadcast %57 : vector<32x1xf32> to vector<32x32xf32>
    %61 = vector.broadcast %59 : vector<1x32xf32> to vector<32x32xf32>
    %62 = arith.mulf %60, %61 : vector<32x32xf32>
    %63 = vector.shape_cast %62 : vector<32x32xf32> to vector<1x32x32xf32>
    %64 = vector.broadcast %63 : vector<1x32x32xf32> to vector<4x32x32xf32>
    %65 = arith.mulf %1, %64 : vector<4x32x32xf32>
    %66 = arith.addf %55, %65 : vector<4x32x32xf32>
    %c127_i32 = arith.constant 127 : i32
    %67 = tpu.dynamic_rotate %2 by %c127_i32 dim 0 : vector<128x32xf32>, i32 -> vector<128x32xf32>
    %68 = vector.shape_cast %67 : vector<128x32xf32> to vector<4x32x32xf32>
    %c5 = arith.constant 5 : index
    %c0_28 = arith.constant 0 : index
    %c0_29 = arith.constant 0 : index
    %69 = vector.load %arg1[%c5, %c0_28, %c0_29] : memref<9x32x1xf32, #tpu.memory_space<vmem>>, vector<1x32x1xf32>
    %70 = vector.shape_cast %69 : vector<1x32x1xf32> to vector<32x1xf32>
    %c5_30 = arith.constant 5 : index
    %c0_31 = arith.constant 0 : index
    %c0_32 = arith.constant 0 : index
    %71 = vector.load %arg2[%c5_30, %c0_31, %c0_32] : memref<9x1x32xf32, #tpu.memory_space<vmem>>, vector<1x1x32xf32>
    %72 = vector.shape_cast %71 : vector<1x1x32xf32> to vector<1x32xf32>
    %73 = vector.broadcast %70 : vector<32x1xf32> to vector<32x32xf32>
    %74 = vector.broadcast %72 : vector<1x32xf32> to vector<32x32xf32>
    %75 = arith.mulf %73, %74 : vector<32x32xf32>
    %76 = vector.shape_cast %75 : vector<32x32xf32> to vector<1x32x32xf32>
    %77 = vector.broadcast %76 : vector<1x32x32xf32> to vector<4x32x32xf32>
    %78 = arith.mulf %68, %77 : vector<4x32x32xf32>
    %79 = arith.addf %66, %78 : vector<4x32x32xf32>
    %c125_i32 = arith.constant 125 : i32
    %80 = tpu.dynamic_rotate %2 by %c125_i32 dim 0 : vector<128x32xf32>, i32 -> vector<128x32xf32>
    %81 = vector.shape_cast %80 : vector<128x32xf32> to vector<4x32x32xf32>
    %c6 = arith.constant 6 : index
    %c0_33 = arith.constant 0 : index
    %c0_34 = arith.constant 0 : index
    %82 = vector.load %arg1[%c6, %c0_33, %c0_34] : memref<9x32x1xf32, #tpu.memory_space<vmem>>, vector<1x32x1xf32>
    %83 = vector.shape_cast %82 : vector<1x32x1xf32> to vector<32x1xf32>
    %c6_35 = arith.constant 6 : index
    %c0_36 = arith.constant 0 : index
    %c0_37 = arith.constant 0 : index
    %84 = vector.load %arg2[%c6_35, %c0_36, %c0_37] : memref<9x1x32xf32, #tpu.memory_space<vmem>>, vector<1x1x32xf32>
    %85 = vector.shape_cast %84 : vector<1x1x32xf32> to vector<1x32xf32>
    %86 = vector.broadcast %83 : vector<32x1xf32> to vector<32x32xf32>
    %87 = vector.broadcast %85 : vector<1x32xf32> to vector<32x32xf32>
    %88 = arith.mulf %86, %87 : vector<32x32xf32>
    %89 = vector.shape_cast %88 : vector<32x32xf32> to vector<1x32x32xf32>
    %90 = vector.broadcast %89 : vector<1x32x32xf32> to vector<4x32x32xf32>
    %91 = arith.mulf %81, %90 : vector<4x32x32xf32>
    %92 = arith.addf %79, %91 : vector<4x32x32xf32>
    %c124_i32 = arith.constant 124 : i32
    %93 = tpu.dynamic_rotate %2 by %c124_i32 dim 0 : vector<128x32xf32>, i32 -> vector<128x32xf32>
    %94 = vector.shape_cast %93 : vector<128x32xf32> to vector<4x32x32xf32>
    %c7 = arith.constant 7 : index
    %c0_38 = arith.constant 0 : index
    %c0_39 = arith.constant 0 : index
    %95 = vector.load %arg1[%c7, %c0_38, %c0_39] : memref<9x32x1xf32, #tpu.memory_space<vmem>>, vector<1x32x1xf32>
    %96 = vector.shape_cast %95 : vector<1x32x1xf32> to vector<32x1xf32>
    %c7_40 = arith.constant 7 : index
    %c0_41 = arith.constant 0 : index
    %c0_42 = arith.constant 0 : index
    %97 = vector.load %arg2[%c7_40, %c0_41, %c0_42] : memref<9x1x32xf32, #tpu.memory_space<vmem>>, vector<1x1x32xf32>
    %98 = vector.shape_cast %97 : vector<1x1x32xf32> to vector<1x32xf32>
    %99 = vector.broadcast %96 : vector<32x1xf32> to vector<32x32xf32>
    %100 = vector.broadcast %98 : vector<1x32xf32> to vector<32x32xf32>
    %101 = arith.mulf %99, %100 : vector<32x32xf32>
    %102 = vector.shape_cast %101 : vector<32x32xf32> to vector<1x32x32xf32>
    %103 = vector.broadcast %102 : vector<1x32x32xf32> to vector<4x32x32xf32>
    %104 = arith.mulf %94, %103 : vector<4x32x32xf32>
    %105 = arith.addf %92, %104 : vector<4x32x32xf32>
    %c123_i32 = arith.constant 123 : i32
    %106 = tpu.dynamic_rotate %2 by %c123_i32 dim 0 : vector<128x32xf32>, i32 -> vector<128x32xf32>
    %107 = vector.shape_cast %106 : vector<128x32xf32> to vector<4x32x32xf32>
    %c8 = arith.constant 8 : index
    %c0_43 = arith.constant 0 : index
    %c0_44 = arith.constant 0 : index
    %108 = vector.load %arg1[%c8, %c0_43, %c0_44] : memref<9x32x1xf32, #tpu.memory_space<vmem>>, vector<1x32x1xf32>
    %109 = vector.shape_cast %108 : vector<1x32x1xf32> to vector<32x1xf32>
    %c8_45 = arith.constant 8 : index
    %c0_46 = arith.constant 0 : index
    %c0_47 = arith.constant 0 : index
    %110 = vector.load %arg2[%c8_45, %c0_46, %c0_47] : memref<9x1x32xf32, #tpu.memory_space<vmem>>, vector<1x1x32xf32>
    %111 = vector.shape_cast %110 : vector<1x1x32xf32> to vector<1x32xf32>
    %112 = vector.broadcast %109 : vector<32x1xf32> to vector<32x32xf32>
    %113 = vector.broadcast %111 : vector<1x32xf32> to vector<32x32xf32>
    %114 = arith.mulf %112, %113 : vector<32x32xf32>
    %115 = vector.shape_cast %114 : vector<32x32xf32> to vector<1x32x32xf32>
    %116 = vector.broadcast %115 : vector<1x32x32xf32> to vector<4x32x32xf32>
    %117 = arith.mulf %107, %116 : vector<4x32x32xf32>
    %118 = arith.addf %105, %117 : vector<4x32x32xf32>
    %c0_48 = arith.constant 0 : index
    %c0_49 = arith.constant 0 : index
    %119 = vector.load %arg3[%c0_48, %c0_49] : memref<1x32xf32, #tpu.memory_space<vmem>>, vector<1x32xf32>
    %120 = vector.shape_cast %119 : vector<1x32xf32> to vector<1x1x32xf32>
    %121 = vector.broadcast %120 : vector<1x1x32xf32> to vector<4x32x32xf32>
    %122 = arith.addf %118, %121 : vector<4x32x32xf32>
    %c0_50 = arith.constant 0 : index
    %c0_51 = arith.constant 0 : index
    %c0_52 = arith.constant 0 : index
    %123 = vector.load %arg4[%c0_50, %c0_51, %c0_52] : memref<4x32x32xbf16, #tpu.memory_space<vmem>>, vector<4x32x32xbf16>
    %c0_53 = arith.constant 0 : index
    %c0_54 = arith.constant 0 : index
    %c0_55 = arith.constant 0 : index
    %124 = vector.load %arg5[%c0_53, %c0_54, %c0_55] : memref<4x32x32xbf16, #tpu.memory_space<vmem>>, vector<4x32x32xbf16>
    %125 = vector.extract_strided_slice %123 {offsets = [0, 0, 0], sizes = [4, 32, 8], strides = [1, 1, 1]} : vector<4x32x32xbf16> to vector<4x32x8xbf16>
    %126 = vector.extract_strided_slice %124 {offsets = [0, 0, 0], sizes = [4, 32, 8], strides = [1, 1, 1]} : vector<4x32x32xbf16> to vector<4x32x8xbf16>
    "tpu.trace_start"() <{level = 10 : i32, message = "bqd,bkd->bqk"}> : () -> ()
    %cst_56 = arith.constant dense<0.000000e+00> : vector<4x32x32xf32>
    %127 = tpu.matmul %125, %126, %cst_56 {dimension_numbers = #tpu.dot_dimension_numbers<[2], [2], [1], [1], [0, 0, 0, 1, 1, 1], [0], [0]>} : vector<4x32x8xbf16>, vector<4x32x8xbf16>, vector<4x32x32xf32> -> vector<4x32x32xf32>
    "tpu.trace_stop"() : () -> ()
    %cst_57 = arith.constant dense<0xFF800000> : vector<4x32xf32>
    %128 = vector.multi_reduction <maximumf>, %127, %cst_57 [2] : vector<4x32x32xf32> to vector<4x32xf32>
    %129 = vector.shape_cast %128 : vector<4x32xf32> to vector<4x32x1xf32>
    %130 = vector.broadcast %129 : vector<4x32x1xf32> to vector<4x32x32xf32>
    %131 = arith.subf %127, %130 : vector<4x32x32xf32>
    %132 = math.exp %131 : vector<4x32x32xf32>
    %cst_58 = arith.constant dense<0.000000e+00> : vector<4x32xf32>
    %133 = vector.multi_reduction <add>, %132, %cst_58 [2] : vector<4x32x32xf32> to vector<4x32xf32>
    %134 = vector.shape_cast %133 : vector<4x32xf32> to vector<4x32x1xf32>
    %135 = tpu.reciprocal %134 {approx = true} : vector<4x32x1xf32> -> vector<4x32x1xf32>
    %136 = vector.broadcast %135 : vector<4x32x1xf32> to vector<4x32x32xf32>
    %137 = arith.mulf %132, %136 : vector<4x32x32xf32>
    %138 = arith.truncf %137 : vector<4x32x32xf32> to vector<4x32x32xbf16>
    %139 = vector.extract_strided_slice %0 {offsets = [0, 0, 0], sizes = [4, 32, 8], strides = [1, 1, 1]} : vector<4x32x32xbf16> to vector<4x32x8xbf16>
    "tpu.trace_start"() <{level = 10 : i32, message = "bqk,bkd->bqd"}> : () -> ()
    %cst_59 = arith.constant dense<0.000000e+00> : vector<4x32x8xf32>
    %140 = tpu.matmul %138, %139, %cst_59 {dimension_numbers = #tpu.dot_dimension_numbers<[2], [1], [1], [2], [0, 0, 0, 1, 1, 2], [0], [0]>} : vector<4x32x32xbf16>, vector<4x32x8xbf16>, vector<4x32x8xf32> -> vector<4x32x8xf32>
    "tpu.trace_stop"() : () -> ()
    %141 = vector.extract_strided_slice %123 {offsets = [0, 0, 8], sizes = [4, 32, 8], strides = [1, 1, 1]} : vector<4x32x32xbf16> to vector<4x32x8xbf16>
    %142 = vector.extract_strided_slice %124 {offsets = [0, 0, 8], sizes = [4, 32, 8], strides = [1, 1, 1]} : vector<4x32x32xbf16> to vector<4x32x8xbf16>
    "tpu.trace_start"() <{level = 10 : i32, message = "bqd,bkd->bqk"}> : () -> ()
    %cst_60 = arith.constant dense<0.000000e+00> : vector<4x32x32xf32>
    %143 = tpu.matmul %141, %142, %cst_60 {dimension_numbers = #tpu.dot_dimension_numbers<[2], [2], [1], [1], [0, 0, 0, 1, 1, 1], [0], [0]>} : vector<4x32x8xbf16>, vector<4x32x8xbf16>, vector<4x32x32xf32> -> vector<4x32x32xf32>
    "tpu.trace_stop"() : () -> ()
    %cst_61 = arith.constant dense<0xFF800000> : vector<4x32xf32>
    %144 = vector.multi_reduction <maximumf>, %143, %cst_61 [2] : vector<4x32x32xf32> to vector<4x32xf32>
    %145 = vector.shape_cast %144 : vector<4x32xf32> to vector<4x32x1xf32>
    %146 = vector.broadcast %145 : vector<4x32x1xf32> to vector<4x32x32xf32>
    %147 = arith.subf %143, %146 : vector<4x32x32xf32>
    %148 = math.exp %147 : vector<4x32x32xf32>
    %cst_62 = arith.constant dense<0.000000e+00> : vector<4x32xf32>
    %149 = vector.multi_reduction <add>, %148, %cst_62 [2] : vector<4x32x32xf32> to vector<4x32xf32>
    %150 = vector.shape_cast %149 : vector<4x32xf32> to vector<4x32x1xf32>
    %151 = tpu.reciprocal %150 {approx = true} : vector<4x32x1xf32> -> vector<4x32x1xf32>
    %152 = vector.broadcast %151 : vector<4x32x1xf32> to vector<4x32x32xf32>
    %153 = arith.mulf %148, %152 : vector<4x32x32xf32>
    %154 = arith.truncf %153 : vector<4x32x32xf32> to vector<4x32x32xbf16>
    %155 = vector.extract_strided_slice %0 {offsets = [0, 0, 8], sizes = [4, 32, 8], strides = [1, 1, 1]} : vector<4x32x32xbf16> to vector<4x32x8xbf16>
    "tpu.trace_start"() <{level = 10 : i32, message = "bqk,bkd->bqd"}> : () -> ()
    %cst_63 = arith.constant dense<0.000000e+00> : vector<4x32x8xf32>
    %156 = tpu.matmul %154, %155, %cst_63 {dimension_numbers = #tpu.dot_dimension_numbers<[2], [1], [1], [2], [0, 0, 0, 1, 1, 2], [0], [0]>} : vector<4x32x32xbf16>, vector<4x32x8xbf16>, vector<4x32x8xf32> -> vector<4x32x8xf32>
    "tpu.trace_stop"() : () -> ()
    %157 = vector.extract_strided_slice %123 {offsets = [0, 0, 16], sizes = [4, 32, 8], strides = [1, 1, 1]} : vector<4x32x32xbf16> to vector<4x32x8xbf16>
    %158 = vector.extract_strided_slice %124 {offsets = [0, 0, 16], sizes = [4, 32, 8], strides = [1, 1, 1]} : vector<4x32x32xbf16> to vector<4x32x8xbf16>
    "tpu.trace_start"() <{level = 10 : i32, message = "bqd,bkd->bqk"}> : () -> ()
    %cst_64 = arith.constant dense<0.000000e+00> : vector<4x32x32xf32>
    %159 = tpu.matmul %157, %158, %cst_64 {dimension_numbers = #tpu.dot_dimension_numbers<[2], [2], [1], [1], [0, 0, 0, 1, 1, 1], [0], [0]>} : vector<4x32x8xbf16>, vector<4x32x8xbf16>, vector<4x32x32xf32> -> vector<4x32x32xf32>
    "tpu.trace_stop"() : () -> ()
    %cst_65 = arith.constant dense<0xFF800000> : vector<4x32xf32>
    %160 = vector.multi_reduction <maximumf>, %159, %cst_65 [2] : vector<4x32x32xf32> to vector<4x32xf32>
    %161 = vector.shape_cast %160 : vector<4x32xf32> to vector<4x32x1xf32>
    %162 = vector.broadcast %161 : vector<4x32x1xf32> to vector<4x32x32xf32>
    %163 = arith.subf %159, %162 : vector<4x32x32xf32>
    %164 = math.exp %163 : vector<4x32x32xf32>
    %cst_66 = arith.constant dense<0.000000e+00> : vector<4x32xf32>
    %165 = vector.multi_reduction <add>, %164, %cst_66 [2] : vector<4x32x32xf32> to vector<4x32xf32>
    %166 = vector.shape_cast %165 : vector<4x32xf32> to vector<4x32x1xf32>
    %167 = tpu.reciprocal %166 {approx = true} : vector<4x32x1xf32> -> vector<4x32x1xf32>
    %168 = vector.broadcast %167 : vector<4x32x1xf32> to vector<4x32x32xf32>
    %169 = arith.mulf %164, %168 : vector<4x32x32xf32>
    %170 = arith.truncf %169 : vector<4x32x32xf32> to vector<4x32x32xbf16>
    %171 = vector.extract_strided_slice %0 {offsets = [0, 0, 16], sizes = [4, 32, 8], strides = [1, 1, 1]} : vector<4x32x32xbf16> to vector<4x32x8xbf16>
    "tpu.trace_start"() <{level = 10 : i32, message = "bqk,bkd->bqd"}> : () -> ()
    %cst_67 = arith.constant dense<0.000000e+00> : vector<4x32x8xf32>
    %172 = tpu.matmul %170, %171, %cst_67 {dimension_numbers = #tpu.dot_dimension_numbers<[2], [1], [1], [2], [0, 0, 0, 1, 1, 2], [0], [0]>} : vector<4x32x32xbf16>, vector<4x32x8xbf16>, vector<4x32x8xf32> -> vector<4x32x8xf32>
    "tpu.trace_stop"() : () -> ()
    %173 = vector.extract_strided_slice %123 {offsets = [0, 0, 24], sizes = [4, 32, 8], strides = [1, 1, 1]} : vector<4x32x32xbf16> to vector<4x32x8xbf16>
    %174 = vector.extract_strided_slice %124 {offsets = [0, 0, 24], sizes = [4, 32, 8], strides = [1, 1, 1]} : vector<4x32x32xbf16> to vector<4x32x8xbf16>
    "tpu.trace_start"() <{level = 10 : i32, message = "bqd,bkd->bqk"}> : () -> ()
    %cst_68 = arith.constant dense<0.000000e+00> : vector<4x32x32xf32>
    %175 = tpu.matmul %173, %174, %cst_68 {dimension_numbers = #tpu.dot_dimension_numbers<[2], [2], [1], [1], [0, 0, 0, 1, 1, 1], [0], [0]>} : vector<4x32x8xbf16>, vector<4x32x8xbf16>, vector<4x32x32xf32> -> vector<4x32x32xf32>
    "tpu.trace_stop"() : () -> ()
    %cst_69 = arith.constant dense<0xFF800000> : vector<4x32xf32>
    %176 = vector.multi_reduction <maximumf>, %175, %cst_69 [2] : vector<4x32x32xf32> to vector<4x32xf32>
    %177 = vector.shape_cast %176 : vector<4x32xf32> to vector<4x32x1xf32>
    %178 = vector.broadcast %177 : vector<4x32x1xf32> to vector<4x32x32xf32>
    %179 = arith.subf %175, %178 : vector<4x32x32xf32>
    %180 = math.exp %179 : vector<4x32x32xf32>
    %cst_70 = arith.constant dense<0.000000e+00> : vector<4x32xf32>
    %181 = vector.multi_reduction <add>, %180, %cst_70 [2] : vector<4x32x32xf32> to vector<4x32xf32>
    %182 = vector.shape_cast %181 : vector<4x32xf32> to vector<4x32x1xf32>
    %183 = tpu.reciprocal %182 {approx = true} : vector<4x32x1xf32> -> vector<4x32x1xf32>
    %184 = vector.broadcast %183 : vector<4x32x1xf32> to vector<4x32x32xf32>
    %185 = arith.mulf %180, %184 : vector<4x32x32xf32>
    %186 = arith.truncf %185 : vector<4x32x32xf32> to vector<4x32x32xbf16>
    %187 = vector.extract_strided_slice %0 {offsets = [0, 0, 24], sizes = [4, 32, 8], strides = [1, 1, 1]} : vector<4x32x32xbf16> to vector<4x32x8xbf16>
    "tpu.trace_start"() <{level = 10 : i32, message = "bqk,bkd->bqd"}> : () -> ()
    %cst_71 = arith.constant dense<0.000000e+00> : vector<4x32x8xf32>
    %188 = tpu.matmul %186, %187, %cst_71 {dimension_numbers = #tpu.dot_dimension_numbers<[2], [1], [1], [2], [0, 0, 0, 1, 1, 2], [0], [0]>} : vector<4x32x32xbf16>, vector<4x32x8xbf16>, vector<4x32x8xf32> -> vector<4x32x8xf32>
    "tpu.trace_stop"() : () -> ()
    %189 = tpu.concatenate %140, %156, %172, %188 in 2 : vector<4x32x8xf32>, vector<4x32x8xf32>, vector<4x32x8xf32>, vector<4x32x8xf32> -> vector<4x32x32xf32>
    %190 = arith.addf %189, %122 : vector<4x32x32xf32>
    %191 = vector.extract_strided_slice %190 {offsets = [0, 0, 0], sizes = [1, 32, 32], strides = [1, 1, 1]} : vector<4x32x32xf32> to vector<1x32x32xf32>
    %192 = vector.shape_cast %191 : vector<1x32x32xf32> to vector<32x32xf32>
    %193 = vector.extract_strided_slice %190 {offsets = [1, 0, 0], sizes = [1, 32, 32], strides = [1, 1, 1]} : vector<4x32x32xf32> to vector<1x32x32xf32>
    %194 = vector.shape_cast %193 : vector<1x32x32xf32> to vector<32x32xf32>
    %195 = vector.extract_strided_slice %190 {offsets = [2, 0, 0], sizes = [1, 32, 32], strides = [1, 1, 1]} : vector<4x32x32xf32> to vector<1x32x32xf32>
    %196 = vector.shape_cast %195 : vector<1x32x32xf32> to vector<32x32xf32>
    %197 = vector.extract_strided_slice %190 {offsets = [3, 0, 0], sizes = [1, 32, 32], strides = [1, 1, 1]} : vector<4x32x32xf32> to vector<1x32x32xf32>
    %198 = vector.shape_cast %197 : vector<1x32x32xf32> to vector<32x32xf32>
    %199 = tpu.concatenate %192, %194, %196, %198 in 1 : vector<32x32xf32>, vector<32x32xf32>, vector<32x32xf32>, vector<32x32xf32> -> vector<32x128xf32>
    %c0_72 = arith.constant 0 : index
    %c0_73 = arith.constant 0 : index
    %200 = vector.load %arg7[%c0_72, %c0_73] : memref<32x128xf32, #tpu.memory_space<vmem>>, vector<32x128xf32>
    tpu.vector_store %arg7[%c0_72, %c0_73], %199 {strides = array<i32>} : memref<32x128xf32, #tpu.memory_space<vmem>>, vector<32x128xf32>,
    return
  }
  func.func @transform_0(%arg0: i32) -> (i32, i32, i32) {
    %c0_i32 = arith.constant 0 : i32
    %c0_i32_0 = arith.constant 0 : i32
    %c0_i32_1 = arith.constant 0 : i32
    %c0_i32_2 = arith.constant 0 : i32
    return %c0_i32, %c0_i32_0, %c0_i32_1 : i32, i32, i32
  }
  func.func @transform_1(%arg0: i32) -> (i32, i32, i32) {
    %c0_i32 = arith.constant 0 : i32
    %c0_i32_0 = arith.constant 0 : i32
    %c0_i32_1 = arith.constant 0 : i32
    %c0_i32_2 = arith.constant 0 : i32
    return %c0_i32, %c0_i32_0, %c0_i32_1 : i32, i32, i32
  }
  func.func @transform_2(%arg0: i32) -> (i32, i32) {
    %c0_i32 = arith.constant 0 : i32
    %c0_i32_0 = arith.constant 0 : i32
    %c0_i32_1 = arith.constant 0 : i32
    return %c0_i32, %c0_i32_0 : i32, i32
  }
  func.func @transform_3(%arg0: i32) -> (i32, i32, i32) {
    %c0_i32 = arith.constant 0 : i32
    %c0_i32_0 = arith.constant 0 : i32
    %c0_i32_1 = arith.constant 0 : i32
    return %arg0, %c0_i32, %c0_i32_0 : i32, i32, i32
  }
  func.func @transform_4(%arg0: i32) -> (i32, i32, i32) {
    %c0_i32 = arith.constant 0 : i32
    %c0_i32_0 = arith.constant 0 : i32
    %c0_i32_1 = arith.constant 0 : i32
    return %arg0, %c0_i32, %c0_i32_0 : i32, i32, i32
  }
  func.func @transform_5(%arg0: i32) -> (i32, i32, i32) {
    %c0_i32 = arith.constant 0 : i32
    %c0_i32_0 = arith.constant 0 : i32
    %c0_i32_1 = arith.constant 0 : i32
    return %arg0, %c0_i32, %c0_i32_0 : i32, i32, i32
  }
  func.func @transform_6(%arg0: i32) -> (i32, i32) {
    %c0_i32 = arith.constant 0 : i32
    %c0_i32_0 = arith.constant 0 : i32
    return %arg0, %c0_i32 : i32, i32
  }
}

</mosaic_0001>

<bundles_post_ra>
// kernel: tpu_custom_call.1
= control target key start
LH: loop header
LB: loop body
LE: loop exit
PB: predicated region body
PF: predicated region fallthrough
CT: control target
= control target key end

     0   :  { %vm888_vm0 = vcmask 64512   ;;  %s3887_s9 = smov 120   ;;  %s6584_s0 = inlined_call_operand.vmem [shape: f32[9,32,1], index: 0, kind: input, shape index: {}]   ;;  %s6585_s1 = inlined_call_operand.vmem [shape: f32[9,1,32], index: 1, kind: input, shape index: {}]   ;;  %s6586_s2 = inlined_call_operand.vmem [shape: f32[1,32], index: 2, kind: input, shape index: {}]   ;;  %s6587_s3 = inlined_call_operand.vmem [shape: bf16[4,32,32], index: 3, kind: input, shape index: {}]   ;;  %s6588_s4 = inlined_call_operand.vmem [shape: bf16[4,32,32], index: 4, kind: input, shape index: {}]   ;;  %s6589_s5 = inlined_call_operand.vmem [shape: bf16[4,32,32], index: 5, kind: input, shape index: {}]   ;;  %s6590_s6 = inlined_call_operand.hbm [shape: f32[32,128], index: 6, kind: output, shape index: {}]  }
   0x1   :  { %v3937_v0 = vld [vmem:[%s6588_s4 + $0x8] sm:$0xff]  ;;  %v3942_v1 = vld [vmem:[%s6588_s4 + $0x18] sm:$0xff]  ;;  %v3957_v4 = vld [vmem:[%s6588_s4] sm:$0xff] }
   0x2   :  { %v3947_v2 = vld [vmem:[%s6588_s4 + $0x28] sm:$0xff]  ;;  %v3952_v3 = vld [vmem:[%s6588_s4 + $0x38] sm:$0xff]  ;;  %v3962_v5 = vld [vmem:[%s6588_s4 + $0x10] sm:$0xff]  ;;  %v899_v6 = vsel %vm888_vm0, %v3937_v0, 0  ;;  %v950_v7 = vsel %vm888_vm0, %v3942_v1, 0  ;;  %v896_v11 = vsel %vm888_vm0, %v3957_v4, 0 }
   0x3   :  { %v1001_v8 = vsel %vm888_vm0, %v3947_v2, 0  ;;  %1538 = vrot.lane.b32.xlu2 %v3947_v2, %s3887_s9  ;;  %907 = vmatpush.bf16.xpose.msra.mxu0 %v899_v6  ;;  %v1052_v9 = vsel %vm888_vm0, %v3952_v3, 0  ;;  %v3977_v10 = vld [vmem:[%s6588_s4 + $0x20] sm:$0xff]  ;;  %v947_v12 = vsel %vm888_vm0, %v3962_v5, 0  ;;  %v3986_v13 = vld [vmem:[%s6588_s4 + $0x30] sm:$0xff] }
   0x4   :  { %958 = vmatpush.bf16.xpose.msra.mxu1 %v950_v7  ;;  %1009 = vmatpush.bf16.xpose.msra.mxu2 %v1001_v8  ;;  %v998_v14 = vsel %vm888_vm0, %v3977_v10, 0  ;;  %v1049_v15 = vsel %vm888_vm0, %v3986_v13, 0 }
   0x5   :  { %1060 = vmatpush.bf16.xpose.msra.mxu3 %v1052_v9  ;;  %1577 = vrot.lane.b32.xlu0 %v3952_v3, %s3887_s9 }
   0x6   :  { %1536 = vrot.lane.b32.xlu1 %v3977_v10, %s3887_s9 }
   0x7   :  { %11 = vsyncpa [#allocation3], 0  ;;  %v4001_v16 = vld [vmem:[%s6587_s3 + $0x20] sm:$0xff]  ;;  %v4013_v18 = vld [vmem:[%s6587_s3 + $0x10] sm:$0xff]  ;;  %vm1073_vm1 = vcmask 261120   ;;  %s3888_s23 = smov 112  }
   0x8   :  { %v4008_v17 = vld [vmem:[%s6587_s3] sm:$0xff]  ;;  %v4018_v19 = vld [vmem:[%s6587_s3 + $0x30] sm:$0xff]  ;;  %v4031_v20 = vld [vmem:[%s6587_s3 + $0x18] sm:$0xff]  ;;  %s3889_s10 = smov 104   ;;  %s3891_s28 = smov 8   ;;  %vm3198_vm7 = vcmask 130048  }
   0x9   :  { %v4036_v21 = vld [vmem:[%s6587_s3 + $0x8] sm:$0xff]  ;;  %v4046_v23 = vld [vmem:[%s6587_s3 + $0x38] sm:$0xff]  ;;  %v4093_v39 = vld [vmem:[%s6589_s5 + $0x20] sm:$0xff]  ;;  %s3892_s16 = smov 16   ;;  %s3893_s27 = smov 24   ;;  %vm3215_vm8 = vcmask 195584  }
   0xa   :  { %v4041_v22 = vld [vmem:[%s6587_s3 + $0x28] sm:$0xff]  ;;  %v4086_v36 = vld [vmem:[%s6589_s5 + $0x38] sm:$0xff]  ;;  %v4098_v40 = vld [vmem:[%s6589_s5 + $0x30] sm:$0xff]  ;;  %s3895_s29 = smov 96   ;;  %s3896_s30 = smov 64   ;;  %vm3305_vm9 = vcmask 785408  }
   0xb   :  { %1575 = vrot.lane.b32.xlu2 %v3986_v13, %s3887_s9  ;;  %908 = vmatpush.bf16.xpose.msra.mxu0 %v896_v11  ;;  %v4081_v35 = vld [vmem:[%s6589_s5 + $0x28] sm:$0xff]  ;;  %vm3300_vm10 = vcmask 523264   ;;  %s3897_s11 = smov [#allocation2]   ;;  %s3898_s13 = smov 128  }
   0xc   :  { %959 = vmatpush.bf16.xpose.msra.mxu1 %v947_v12  ;;  %1010 = vmatpush.bf16.xpose.msra.mxu2 %v998_v14  ;;  %s3318_s12 = sshll.u32 %s3897_s11, 4  ;;  %s3319_s12 = int_to_ptr.vmem [resolvable:$true] %s3318_s12 }
   0xd   :  { %1061 = vmatpush.bf16.xpose.msra.mxu3 %v1049_v15  ;;  %1532 = vrot.lane.b32.xlu0 %v4001_v16, %s3887_s9 }
  0x12   :  { %3388 = vmatmul.msk.bf16.vlgmr.msra.gmra.mxu0 %vm888_vm0, %v4008_v17 }
  0x13   :  { %3406 = vmatmul.msk.bf16.vlgmr.msra.gmra.mxu1 %vm888_vm0, %v4013_v18  ;;  %3424 = vmatmul.msk.bf16.vlgmr.msra.gmra.mxu2 %vm888_vm0, %v4001_v16 }
  0x14   :  { %3442 = vmatmul.msk.bf16.vlgmr.msra.gmra.mxu3 %vm888_vm0, %v4018_v19  ;;  %1394 = vmatpush.bf16.msrb.mxu2 %v4081_v35 }
  0x15   :  { %1441 = vmatpush.bf16.msrb.mxu3 %v4086_v36 }
  0x18   :  { %1395 = vmatpush.bf16.msrb.mxu2 %v4093_v39 }
  0x19   :  { %1442 = vmatpush.bf16.msrb.mxu3 %v4098_v40 }
  0x22   :  { %3389 = vmatmul.msk.bf16.gmra.mxu0 %vm888_vm0, %v4036_v21 }
  0x23   :  { %3407 = vmatmul.msk.bf16.gmra.mxu1 %vm888_vm0, %v4031_v20  ;;  %3425 = vmatmul.msk.bf16.gmra.mxu2 %vm888_vm0, %v4041_v22 }
  0x24   :  { %3443 = vmatmul.msk.bf16.gmra.mxu3 %vm888_vm0, %v4046_v23 }
  0x5d   :  { %v1539_v37 = vpop.permute.xlu2 %1538 }
  0x5e   :  { %v1550_v41 = vsel %vm888_vm0, %v1539_v37, 0 }
  0x5f   :  { %1558 = vmatpush.bf16.xpose.msra.mxu2 %v1550_v41 }
  0x65   :  { %v1576_v49 = vpop.permute.xlu2 %1575 }
  0x66   :  { %v1586_v53 = vsel %vm888_vm0, %v1576_v49, 0 }
  0x77   :  { %v1578_v38 = vpop.permute.xlu0 %1577 }
  0x78   :  { %v1589_v44 = vsel %vm888_vm0, %v1578_v38, 0  ;;  %v1537_v50 = vpop.permute.xlu1 %1536 }
  0x79   :  { %1597 = vmatpush.bf16.xpose.msra.mxu3 %v1589_v44  ;;  %v1547_v56 = vsel %vm888_vm0, %v1537_v50, 0 }
  0x7a   :  { %1559 = vmatpush.bf16.xpose.msra.mxu2 %v1547_v56 }
  0x7f   :  { %v4150_v11 = vpop.permute.xlu0 %1532 }
  0x81   :  { %1598 = vmatpush.bf16.xpose.msra.mxu3 %v1586_v53 }
  0x8f   :  { %v4056_v24 = vpop.f32.mrf.mxu0 }
  0x90   :  { %v4058_v25 = vpop.f32.mrf.mxu1  ;;  %v1074_v27 = vsel %vm1073_vm1, %v4056_v24, -inf }
  0x91   :  { %v1086_v26 = vsel %vm1073_vm1, %v4058_v25, -inf  ;;  %1075 = vmax.xlane.f32.xlu1 %v1074_v27 }
  0x92   :  { %1087 = vmax.xlane.f32.xlu2 %v1086_v26 }
  0x96   :  { %v4064_v28 = vpop.f32.mrf.mxu2 }
  0x97   :  { %v4066_v29 = vpop.f32.mrf.mxu3  ;;  %v1098_v30 = vsel %vm1073_vm1, %v4064_v28, -inf  ;;  %v4070_v31 = vpop.f32.mrf.mxu0 }
  0x98   :  { %v1110_v32 = vsel %vm1073_vm1, %v4066_v29, -inf  ;;  %1099 = vmax.xlane.f32.xlu0 %v1098_v30  ;;  %v4074_v33 = vpop.f32.mrf.mxu1  ;;  %v1077_v34 = vsel %vm1073_vm1, %v4070_v31, -inf }
  0x99   :  { %1111 = vmax.xlane.f32.xlu1 %v1110_v32  ;;  %v1089_v45 = vsel %vm1073_vm1, %v4074_v33, -inf }
  0x9a   :  { %1078 = vmax.xlane.f32.xlu2 %v1077_v34 }
  0x9e   :  { %v4101_v42 = vpop.f32.mrf.mxu2 }
  0x9f   :  { %v4103_v43 = vpop.f32.mrf.mxu3  ;;  %v4114_v48 = vpop.f32.mrf.mxu0  ;;  %v1101_v54 = vsel %vm1073_vm1, %v4101_v42, -inf }
  0xa0   :  { %1090 = vmax.xlane.f32.xlu0 %v1089_v45  ;;  %v1113_v46 = vsel %vm1073_vm1, %v4103_v43, -inf  ;;  %v4112_v47 = vpop.f32.mrf.mxu1  ;;  %v1080_v61 = vsel %vm1073_vm1, %v4114_v48, -inf }
  0xa1   :  { %1114 = vmax.xlane.f32.xlu1 %v1113_v46  ;;  %v1092_v52 = vsel %vm1073_vm1, %v4112_v47, -inf }
  0xa6   :  { %v4116_v51 = vpop.f32.mrf.mxu2 }
  0xa7   :  { %v1104_v55 = vsel %vm1073_vm1, %v4116_v51, -inf  ;;  %v4126_v57 = vpop.f32.mrf.mxu3  ;;  %v4130_v59 = vpop.f32.mrf.mxu0 }
  0xa8   :  { %1102 = vmax.xlane.f32.xlu0 %v1101_v54  ;;  %1105 = vmax.xlane.f32.xlu2 %v1104_v55  ;;  %v4128_v58 = vpop.f32.mrf.mxu1  ;;  %v1083_v62 = vsel %vm1073_vm1, %v4130_v59, -inf  ;;  %v1116_v7 = vsel %vm1073_vm1, %v4126_v57, -inf }
  0xa9   :  { %1093 = vmax.xlane.f32.xlu1 %v1092_v52  ;;  %v1095_v60 = vsel %vm1073_vm1, %v4128_v58, -inf }
  0xae   :  { %v4140_v6 = vpop.f32.mrf.mxu2 }
  0xaf   :  { %v4138_v63 = vpop.f32.mrf.mxu3  ;;  %v1107_v9 = vsel %vm1073_vm1, %v4140_v6, -inf }
  0xb0   :  { %1096 = vmax.xlane.f32.xlu2 %v1095_v60  ;;  %1081 = vmax.xlane.f32.xlu0 %v1080_v61  ;;  %v1119_v8 = vsel %vm1073_vm1, %v4138_v63, -inf }
  0xb1   :  { %1084 = vmax.xlane.f32.xlu1 %v1083_v62 }
  0xb8   :  { %1108 = vmax.xlane.f32.xlu2 %v1107_v9  ;;  %1117 = vmax.xlane.f32.xlu0 %v1116_v7 }
  0xb9   :  { %1120 = vmax.xlane.f32.xlu1 %v1119_v8 }
  0xd0   :  { %1571 = vrot.lane.b32.xlu2 %v4018_v19, %s3887_s9 }
 0x104   :  { %v4152_v14 = vpop.xlane.xlu1 %1075 }
 0x105   :  { %v1088_v12 = vpop.xlane.xlu2 %1087 }
 0x106   :  { %v1126_v15 = vsub.f32 %v4058_v25, %v1088_v12 }
 0x108   :  { %v1146_v26 = vmul.f32 1.442695, %v1126_v15 }
 0x10a   :  { %3581 = vpow2.f32 %v1146_v26 }
 0x10b   :  { %v1100_v27 = vpop.xlane.xlu0 %1099 }
 0x10c   :  { %v1130_v30 = vsub.f32 %v4064_v28, %v1100_v27  ;;  %v1112_v32 = vpop.xlane.xlu1 %1111 }
 0x10d   :  { %v1134_v34 = vsub.f32 %v4066_v29, %v1112_v32  ;;  %v4161_v44 = vpop.xlane.xlu2 %1078 }
 0x10e   :  { %v1154_v37 = vmul.f32 1.442695, %v1130_v30 }
 0x10f   :  { %v1162_v41 = vmul.f32 1.442695, %v1134_v34 }
 0x110   :  { %v4157_v38 = vpop.eup %3581  ;;  %3583 = vpow2.f32 %v1154_v37 }
 0x111   :  { %v1182_v19 = vsel %vm1073_vm1, %v4157_v38, 0.0  ;;  %3585 = vpow2.f32 %v1162_v41 }
 0x112   :  { %1183 = vadd.xlane.f32.xlu1 %v1182_v19 }
 0x113   :  { %v1091_v25 = vpop.xlane.xlu0 %1090 }
 0x114   :  { %v1127_v45 = vsub.f32 %v4074_v33, %v1091_v25  ;;  %v1115_v46 = vpop.xlane.xlu1 %1114 }
 0x115   :  { %v1135_v28 = vsub.f32 %v4103_v43, %v1115_v46 }
 0x116   :  { %v4165_v49 = vpop.eup %3583  ;;  %v1148_v29 = vmul.f32 1.442695, %v1127_v45 }
 0x117   :  { %v4167_v50 = vpop.eup %3585  ;;  %v1164_v52 = vmul.f32 1.442695, %v1135_v28  ;;  %v1194_v53 = vsel %vm1073_vm1, %v4165_v49, 0.0 }
 0x118   :  { %3587 = vpow2.f32 %v1148_v29  ;;  %1195 = vadd.xlane.f32.xlu0 %v1194_v53  ;;  %v1206_v54 = vsel %vm1073_vm1, %v4167_v50, 0.0  ;;  %v1122_v53 = vsub.f32 %v4056_v24, %v4152_v14 }
 0x119   :  { %3589 = vpow2.f32 %v1164_v52  ;;  %1207 = vadd.xlane.f32.xlu2 %v1206_v54 }
 0x11b   :  { %v1103_v33 = vpop.xlane.xlu0 %1102  ;;  %v1106_v55 = vpop.xlane.xlu2 %1105 }
 0x11c   :  { %v1131_v43 = vsub.f32 %v4101_v42, %v1103_v33  ;;  %v1132_v56 = vsub.f32 %v4116_v51, %v1106_v55  ;;  %v1094_v60 = vpop.xlane.xlu1 %1093 }
 0x11d   :  { %v1128_v8 = vsub.f32 %v4112_v47, %v1094_v60 }
 0x11e   :  { %v4175_v61 = vpop.eup %3587  ;;  %v1156_v62 = vmul.f32 1.442695, %v1131_v43  ;;  %v1158_v7 = vmul.f32 1.442695, %v1132_v56  ;;  %v1138_v43 = vmul.f32 1.442695, %v1122_v53 }
 0x11f   :  { %v4178_v9 = vpop.eup %3589  ;;  %v1185_v12 = vsel %vm1073_vm1, %v4175_v61, 0.0  ;;  %v1150_v42 = vmul.f32 1.442695, %v1128_v8 }
 0x120   :  { %3591 = vpow2.f32 %v1156_v62  ;;  %v1209_v15 = vsel %vm1073_vm1, %v4178_v9, 0.0 }
 0x121   :  { %3593 = vpow2.f32 %v1158_v7  ;;  %1186 = vadd.xlane.f32.xlu2 %v1185_v12  ;;  %1210 = vadd.xlane.f32.xlu0 %v1209_v15 }
 0x122   :  { %3595 = vpow2.f32 %v1150_v42 }
 0x123   :  { %v1097_v51 = vpop.xlane.xlu2 %1096  ;;  %v4184_v26 = vpop.xlane.xlu0 %1081 }
 0x124   :  { %v1085_v27 = vpop.xlane.xlu1 %1084  ;;  %v1129_v47 = vsub.f32 %v4128_v58, %v1097_v51  ;;  %v1123_v51 = vsub.f32 %v4070_v31, %v4161_v44 }
 0x126   :  { %v4186_v30 = vpop.eup %3591  ;;  %v1152_v41 = vmul.f32 1.442695, %v1129_v47 }
 0x127   :  { %v4189_v32 = vpop.eup %3593  ;;  %v1197_v34 = vsel %vm1073_vm1, %v4186_v30, 0.0 }
 0x128   :  { %1198 = vadd.xlane.f32.xlu1 %v1197_v34  ;;  %v1200_v37 = vsel %vm1073_vm1, %v4189_v32, 0.0  ;;  %v4195_v45 = vpop.eup %3595  ;;  %3597 = vpow2.f32 %v1152_v41 }
 0x129   :  { %1201 = vadd.xlane.f32.xlu0 %v1200_v37  ;;  %v1188_v33 = vsel %vm1073_vm1, %v4195_v45, 0.0 }
 0x12b   :  { %v1109_v19 = vpop.xlane.xlu2 %1108  ;;  %v1118_v25 = vpop.xlane.xlu0 %1117 }
 0x12c   :  { %v1136_v46 = vsub.f32 %v4126_v57, %v1118_v25  ;;  %v1121_v28 = vpop.xlane.xlu1 %1120  ;;  %v1133_v29 = vsub.f32 %v4140_v6, %v1109_v19  ;;  %v1125_v6 = vsub.f32 %v4130_v59, %v1085_v27  ;;  %v1140_v27 = vmul.f32 1.442695, %v1123_v51 }
 0x12d   :  { %v1137_v58 = vsub.f32 %v4138_v63, %v1121_v28 }
 0x12e   :  { %v1166_v52 = vmul.f32 1.442695, %v1136_v46  ;;  %v1160_v55 = vmul.f32 1.442695, %v1133_v29  ;;  %v4204_v57 = vpop.eup %3597  ;;  %v1144_v62 = vmul.f32 1.442695, %v1125_v6 }
 0x12f   :  { %v1168_v54 = vmul.f32 1.442695, %v1137_v58  ;;  %v1191_v24 = vsel %vm1073_vm1, %v4204_v57, 0.0 }
 0x130   :  { %1189 = vadd.xlane.f32.xlu1 %v1188_v33  ;;  %3599 = vpow2.f32 %v1166_v52 }
 0x131   :  { %3601 = vpow2.f32 %v1168_v54 }
 0x132   :  { %3603 = vpow2.f32 %v1160_v55 }
 0x133   :  { %3605 = vpow2.f32 %v1138_v43 }
 0x134   :  { %3607 = vpow2.f32 %v1144_v62 }
 0x135   :  { %3609 = vpow2.f32 %v1140_v27 }
 0x136   :  { %v4206_v63 = vpop.eup %3599 }
 0x137   :  { %v4211_v14 = vpop.eup %3601  ;;  %v1212_v56 = vsel %vm1073_vm1, %v4206_v63, 0.0 }
 0x138   :  { %1192 = vadd.xlane.f32.xlu1 %v1191_v24  ;;  %1213 = vadd.xlane.f32.xlu2 %v1212_v56  ;;  %v1215_v60 = vsel %vm1073_vm1, %v4211_v14, 0.0  ;;  %v4217_v7 = vpop.eup %3603 }
 0x139   :  { %1216 = vadd.xlane.f32.xlu0 %v1215_v60  ;;  %v4219_v8 = vpop.eup %3605  ;;  %v1203_v59 = vsel %vm1073_vm1, %v4217_v7, 0.0 }
 0x13a   :  { %v1170_v12 = vsel %vm1073_vm1, %v4219_v8, 0.0  ;;  %v4225_v15 = vpop.eup %3607 }
 0x13b   :  { %v1179_v42 = vsel %vm1073_vm1, %v4225_v15, 0.0 }
 0x140   :  { %1204 = vadd.xlane.f32.xlu1 %v1203_v59  ;;  %1171 = vadd.xlane.f32.xlu2 %v1170_v12 }
 0x148   :  { %1180 = vadd.xlane.f32.xlu2 %v1179_v42 }
 0x14d   :  { %1499 = vrot.lane.b32.xlu0 %v3942_v1, %s3887_s9  ;;  %v4247_v1 = vpop.eup %3609 }
 0x159   :  { %1497 = vrot.lane.b32.xlu1 %v3962_v5, %s3887_s9  ;;  %v4254_v5 = vld [vmem:[%s6589_s5 + $0x18] sm:$0xff] }
 0x15a   :  { %1347 = vmatpush.bf16.msrb.mxu1 %v4254_v5 }
 0x160   :  { %1460 = vrot.lane.b32.xlu2 %v3937_v0, %s3887_s9  ;;  %v1173_v0 = vsel %vm1073_vm1, %v4247_v1, 0.0 }
 0x161   :  { %1534 = vrot.lane.b32.xlu1 %v4041_v22, %s3887_s9  ;;  %v1124_v22 = vsub.f32 %v4114_v48, %v4184_v26 }
 0x163   :  { %v1142_v44 = vmul.f32 1.442695, %v1124_v22 }
 0x168   :  { %1454 = vrot.lane.b32.xlu2 %v4008_v17, %s3887_s9  ;;  %v4260_v17 = vld [vmem:[%s6589_s5 + $0x10] sm:$0xff] }
 0x169   :  { %1573 = vrot.lane.b32.xlu1 %v4046_v23, %s3887_s9  ;;  %1348 = vmatpush.bf16.msrb.mxu1 %v4260_v17 }
 0x170   :  { %1937 = vrot.lane.b32.xlu2 %v4086_v36, %s3887_s9 }
 0x171   :  { %1493 = vrot.lane.b32.xlu1 %v4013_v18, %s3887_s9  ;;  %v4262_v18 = vpop.permute.xlu2 %1571 }
 0x177   :  { %1174 = vadd.xlane.f32.xlu0 %v1173_v0 }
 0x185   :  { %v1184_v23 = vpop.xlane.xlu1 %1183 }
 0x186   :  { %3611 = vrcp.f32 %v1184_v23 }
 0x18b   :  { %v1196_v31 = vpop.xlane.xlu0 %1195  ;;  %1495 = vrot.lane.b32.xlu0 %v4031_v20, %s3887_s9 }
 0x18c   :  { %v1208_v36 = vpop.xlane.xlu2 %1207  ;;  %v3612_v37 = vpop.eup %3611 }
 0x18d   :  { %3613 = vrcp.f32 %v1208_v36  ;;  %v1238_v26 = vmul.f32 %v3612_v37, %v4157_v38 }
 0x18e   :  { %3615 = vpow2.f32 %v1142_v44 }
 0x18f   :  { %3617 = vrcp.f32 %v1196_v31  ;;  %v1254_v29 = vpack.c.bf16 %v1238_v26, %v1238_v26 }
 0x191   :  { %v1317_v33 = vunpack.c.l.b16 %v1254_v29 }
 0x193   :  { %1458 = vrot.lane.b32.xlu0 %v3957_v4, %s3887_s9  ;;  %v3614_v41 = vpop.eup %3613 }
 0x194   :  { %v1187_v47 = vpop.xlane.xlu2 %1186  ;;  %v1211_v34 = vpop.xlane.xlu0 %1210  ;;  %v1246_v20 = vmul.f32 %v3614_v41, %v4167_v50 }
 0x195   :  { %3619 = vrcp.f32 %v1187_v47  ;;  %v4271_v48 = vpop.eup %3615 }
 0x196   :  { %3621 = vrcp.f32 %v1211_v34  ;;  %v3618_v19 = vpop.eup %3617  ;;  %v1176_v25 = vsel %vm1073_vm1, %v4271_v48, 0.0  ;;  %v1262_v52 = vpack.c.bf16 %v1246_v20, %v1246_v20 }
 0x197   :  { %v1242_v50 = vmul.f32 %v3618_v19, %v4165_v49 }
 0x198   :  { %v1411_v43 = vunpack.c.l.b16 %v1262_v52 }
 0x199   :  { %v1258_v60 = vpack.c.bf16 %v1242_v50, %v1242_v50 }
 0x19b   :  { %v3620_v46 = vpop.eup %3619  ;;  %1177 = vadd.xlane.f32.xlu1 %v1176_v25  ;;  %v1199_v28 = vpop.xlane.xlu1 %1198  ;;  %1456 = vrot.lane.b32.xlu0 %v4036_v21, %s3887_s9  ;;  %v1364_v49 = vunpack.c.l.b16 %v1258_v60 }
 0x19c   :  { %v3622_v58 = vpop.eup %3621  ;;  %v1239_v4 = vmul.f32 %v3620_v46, %v4175_v61  ;;  %3623 = vrcp.f32 %v1199_v28 }
 0x19d   :  { %v1247_v38 = vmul.f32 %v3622_v58, %v4178_v9  ;;  %v1202_v9 = vpop.xlane.xlu0 %1201 }
 0x19e   :  { %v1255_v53 = vpack.c.bf16 %v1239_v4, %v1239_v4 }
 0x19f   :  { %v1263_v54 = vpack.c.bf16 %v1247_v38, %v1247_v38 }
 0x1a0   :  { %v1318_v55 = vunpack.c.l.b16 %v1255_v53 }
 0x1a1   :  { %v1412_v6 = vunpack.c.l.b16 %v1263_v54 }
 0x1a2   :  { %v3624_v24 = vpop.eup %3623  ;;  %v1321_v56 = vpack.c.b16 %v1318_v55, %v1317_v33  ;;  %v4310_v33 = vld [vmem:[%s6589_s5 + $0x8] sm:$0xff]  ;;  %v4316_v55 = vld [vmem:[%s6589_s5] sm:$0xff] }
 0x1a3   :  { %v1243_v61 = vmul.f32 %v3624_v24, %v4186_v30  ;;  %v1190_v62 = vpop.xlane.xlu1 %1189  ;;  %v1415_v59 = vpack.c.b16 %v1412_v6, %v1411_v43  ;;  %1896 = vrot.lane.b32.xlu0 %v4081_v35, %s3887_s9  ;;  %1300 = vmatpush.bf16.msrb.mxu0 %v4310_v33 }
 0x1a4   :  { %3462 = vmatmul.msk.bf16.vlgmr.msrb.gmra.mxu1 %vm1073_vm1, %v1321_v56  ;;  %3625 = vrcp.f32 %v1190_v62 }
 0x1a5   :  { %v1259_v21 = vpack.c.bf16 %v1243_v61, %v1243_v61  ;;  %3482 = vmatmul.msk.bf16.vlgmr.msrb.gmra.mxu3 %vm1073_vm1, %v1415_v59  ;;  %3627 = vrcp.f32 %v1202_v9 }
 0x1a7   :  { %v1365_v12 = vunpack.c.l.b16 %v1259_v21  ;;  %1301 = vmatpush.bf16.msrb.mxu0 %v4316_v55 }
 0x1a9   :  { %v1368_v42 = vpack.c.b16 %v1365_v12, %v1364_v49 }
 0x1aa   :  { %v3626_v30 = vpop.eup %3625 }
 0x1ab   :  { %v1193_v51 = vpop.xlane.xlu1 %1192  ;;  %3472 = vmatmul.msk.bf16.vlgmr.msrb.gmra.mxu2 %vm1073_vm1, %v1368_v42  ;;  %v1214_v27 = vpop.xlane.xlu2 %1213  ;;  %1935 = vrot.lane.b32.xlu0 %v4098_v40, %s3887_s9  ;;  %v1240_v0 = vmul.f32 %v3626_v30, %v4195_v45 }
 0x1ac   :  { %3629 = vrcp.f32 %v1193_v51  ;;  %v1217_v35 = vpop.xlane.xlu0 %1216  ;;  %v3628_v22 = vpop.eup %3627 }
 0x1ad   :  { %3631 = vrcp.f32 %v1214_v27  ;;  %v1256_v47 = vpack.c.bf16 %v1240_v0, %v1240_v0  ;;  %v1244_v25 = vmul.f32 %v3628_v22, %v4189_v32 }
 0x1ae   :  { %3633 = vrcp.f32 %v1217_v35 }
 0x1af   :  { %v1319_v20 = vunpack.c.l.b16 %v1256_v47  ;;  %v1260_v4 = vpack.c.bf16 %v1244_v25, %v1244_v25 }
 0x1b2   :  { %v3630_v23 = vpop.eup %3629 }
 0x1b3   :  { %v3632_v31 = vpop.eup %3631  ;;  %v1205_v36 = vpop.xlane.xlu1 %1204  ;;  %v1241_v44 = vmul.f32 %v3630_v23, %v4204_v57 }
 0x1b4   :  { %v3634_v34 = vpop.eup %3633  ;;  %3635 = vrcp.f32 %v1205_v36  ;;  %v1248_v37 = vmul.f32 %v3632_v31, %v4206_v63  ;;  %1894 = vrot.lane.b32.xlu1 %v4093_v39, %s3887_s9 }
 0x1b5   :  { %v1257_v40 = vpack.c.bf16 %v1241_v44, %v1241_v44  ;;  %v1249_v41 = vmul.f32 %v3634_v34, %v4211_v14  ;;  %v1366_v14 = vunpack.c.l.b16 %v1260_v4 }
 0x1b6   :  { %v1264_v26 = vpack.c.bf16 %v1248_v37, %v1248_v37 }
 0x1b7   :  { %v1320_v45 = vunpack.c.l.b16 %v1257_v40  ;;  %v1265_v19 = vpack.c.bf16 %v1249_v41, %v1249_v41 }
 0x1b8   :  { %v1413_v28 = vunpack.c.l.b16 %v1264_v26 }
 0x1b9   :  { %v1322_v46 = vpack.c.b16 %v1320_v45, %v1319_v20  ;;  %v1414_v57 = vunpack.c.l.b16 %v1265_v19 }
 0x1ba   :  { %v3636_v58 = vpop.eup %3635 }
 0x1bb   :  { %3463 = vmatmul.msk.bf16.gmra.mxu1 %vm1073_vm1, %v1322_v46  ;;  %v1416_v29 = vpack.c.b16 %v1414_v57, %v1413_v28  ;;  %v1245_v63 = vmul.f32 %v3636_v58, %v4217_v7 }
 0x1bd   :  { %3483 = vmatmul.msk.bf16.gmra.mxu3 %vm1073_vm1, %v1416_v29  ;;  %v1261_v39 = vpack.c.bf16 %v1245_v63, %v1245_v63 }
 0x1bf   :  { %v1367_v52 = vunpack.c.l.b16 %v1261_v39  ;;  %v1500_v38 = vpop.permute.xlu0 %1499 }
 0x1c0   :  { %v1511_v53 = vsel %vm888_vm0, %v1500_v38, 0 }
 0x1c1   :  { %v1369_v50 = vpack.c.b16 %v1367_v52, %v1366_v14  ;;  %1519 = vmatpush.bf16.xpose.msra.mxu1 %v1511_v53 }
 0x1c3   :  { %3473 = vmatmul.msk.bf16.gmra.mxu2 %vm1073_vm1, %v1369_v50 }
 0x1cb   :  { %v1498_v32 = vpop.permute.xlu1 %1497 }
 0x1cc   :  { %v1508_v54 = vsel %vm888_vm0, %v1498_v32, 0 }
 0x1cd   :  { %1520 = vmatpush.bf16.xpose.msra.mxu1 %v1508_v54  ;;  %3490 = vmatmul.msk.bf16.vlgmr.msra.gmra.mxu3 %vm888_vm0, %v4262_v18  ;;  %v1172_v18 = vpop.xlane.xlu2 %1171 }
 0x1ce   :  { %3637 = vrcp.f32 %v1172_v18 }
 0x1d3   :  { %v1535_v7 = vpop.permute.xlu1 %1534  ;;  %3488 = vmatmul.msk.bf16.vlgmr.msra.gmra.mxu2 %vm888_vm0, %v4150_v11 }
 0x1d4   :  { %v3638_v56 = vpop.eup %3637 }
 0x1d5   :  { %v1181_v11 = vpop.xlane.xlu2 %1180  ;;  %v1234_v60 = vmul.f32 %v3638_v56, %v4219_v8 }
 0x1d7   :  { %v1250_v21 = vpack.c.bf16 %v1234_v60, %v1234_v60 }
 0x1d9   :  { %v1270_v12 = vunpack.c.l.b16 %v1250_v21 }
 0x1db   :  { %v1574_v43 = vpop.permute.xlu1 %1573 }
 0x1dd   :  { %3491 = vmatmul.msk.bf16.gmra.mxu3 %vm888_vm0, %v1574_v43  ;;  %v1461_v61 = vpop.permute.xlu2 %1460 }
 0x1de   :  { %v1472_v62 = vsel %vm888_vm0, %v1461_v61, 0 }
 0x1df   :  { %1480 = vmatpush.bf16.xpose.msra.mxu0 %v1472_v62 }
 0x1e3   :  { %v1494_v6 = vpop.permute.xlu1 %1493  ;;  %3489 = vmatmul.msk.bf16.gmra.mxu2 %vm888_vm0, %v1535_v7 }
 0x1e4   :  { %3486 = vmatmul.msk.bf16.vlgmr.msra.gmra.mxu1 %vm888_vm0, %v1494_v6 }
 0x1e5   :  { %v1455_v37 = vpop.permute.xlu2 %1454 }
 0x1ea   :  { %v1175_v24 = vpop.xlane.xlu0 %1174 }
 0x1eb   :  { %3639 = vrcp.f32 %v1175_v24 }
 0x1ec   :  { %3641 = vrcp.f32 %v1181_v11 }
 0x1f1   :  { %v3640_v59 = vpop.eup %3639 }
 0x1f2   :  { %v1235_v9 = vmul.f32 %v3640_v59, %v4247_v1  ;;  %v3642_v0 = vpop.eup %3641 }
 0x1f3   :  { %v1237_v22 = vmul.f32 %v3642_v0, %v4225_v15 }
 0x1f4   :  { %v1251_v49 = vpack.c.bf16 %v1235_v9, %v1235_v9 }
 0x1f5   :  { %v1253_v31 = vpack.c.bf16 %v1237_v22, %v1237_v22 }
 0x1f6   :  { %v1271_v42 = vunpack.c.l.b16 %v1251_v49  ;;  %v1938_v49 = vpop.permute.xlu2 %1937 }
 0x1f7   :  { %v1273_v47 = vunpack.c.l.b16 %v1253_v31  ;;  %1953 = vmatpush.bf16.msrb.mxu3 %v1938_v49 }
 0x1f8   :  { %v1274_v51 = vpack.c.b16 %v1271_v42, %v1270_v12 }
 0x1fa   :  { %3452 = vmatmul.msk.bf16.vlgmr.msrb.gmra.mxu0 %vm1073_vm1, %v1274_v51 }
 0x1fd   :  { %v1496_v30 = vpop.permute.xlu0 %1495 }
 0x1fe   :  { %3487 = vmatmul.msk.bf16.gmra.mxu1 %vm888_vm0, %v1496_v30 }
 0x205   :  { %v1459_v27 = vpop.permute.xlu0 %1458 }
 0x206   :  { %v1469_v8 = vsel %vm888_vm0, %v1459_v27, 0 }
 0x207   :  { %1481 = vmatpush.bf16.xpose.msra.mxu0 %v1469_v8 }
 0x20d   :  { %v1457_v40 = vpop.permute.xlu0 %1456 }
 0x20e   :  { %v1178_v35 = vpop.xlane.xlu1 %1177 }
 0x20f   :  { %3643 = vrcp.f32 %v1178_v35 }
 0x215   :  { %v3644_v1 = vpop.eup %3643  ;;  %v1897_v12 = vpop.permute.xlu0 %1896 }
 0x216   :  { %v1236_v23 = vmul.f32 %v3644_v1, %v4271_v48  ;;  %1912 = vmatpush.bf16.msrb.mxu2 %v1897_v12 }
 0x218   :  { %v1252_v36 = vpack.c.bf16 %v1236_v23, %v1236_v23 }
 0x21a   :  { %v1272_v44 = vunpack.c.l.b16 %v1252_v36 }
 0x21c   :  { %v1275_v34 = vpack.c.b16 %v1273_v47, %v1272_v44 }
 0x21d   :  { %v1936_v36 = vpop.permute.xlu0 %1935 }
 0x21e   :  { %3453 = vmatmul.msk.bf16.gmra.mxu0 %vm1073_vm1, %v1275_v34  ;;  %1954 = vmatpush.bf16.msrb.mxu3 %v1936_v36 }
 0x221   :  { %v4332_v41 = vpop.f32.mrf.mxu1 }
 0x222   :  { %6659 = vst [vmem:[#allocation5_spill] sm:$0xff] %v4332_v41 }
 0x226   :  { %v1895_v30 = vpop.permute.xlu1 %1894 }
 0x227   :  { %1913 = vmatpush.bf16.msrb.mxu2 %v1895_v30 }
 0x228   :  { %v4347_v25 = vpop.f32.mrf.mxu3 }
 0x229   :  { %v4335_v26 = vpop.f32.mrf.mxu1  ;;  %6664 = vst [vmem:[#allocation10_spill] sm:$0xff] %v4347_v25 }
 0x22a   :  { %6660 = vst [vmem:[#allocation6_spill] sm:$0xff] %v4335_v26 }
 0x22e   :  { %3484 = vmatmul.msk.bf16.vlgmr.msra.gmra.mxu0 %vm888_vm0, %v1455_v37  ;;  %v4349_v46 = vpop.f32.mrf.mxu2 }
 0x22f   :  { %6665 = vst [vmem:[#allocation11_spill] sm:$0xff] %v4349_v46 }
 0x230   :  { %v4353_v57 = vpop.f32.mrf.mxu3 }
 0x231   :  { %6667 = vst [vmem:[#allocation13_spill] sm:$0xff] %v4353_v57 }
 0x236   :  { %v4357_v29 = vpop.f32.mrf.mxu2 }
 0x237   :  { %6669 = vst [vmem:[#allocation15_spill] sm:$0xff] %v4357_v29 }
 0x238   :  { %v4337_v15 = vpop.f32.mrf.mxu1 }
 0x239   :  { %6661 = vst [vmem:[#allocation7_spill] sm:$0xff] %v4337_v15 }
 0x23e   :  { %3485 = vmatmul.msk.bf16.gmra.mxu0 %vm888_vm0, %v1457_v40 }
 0x240   :  { %v4339_v48 = vpop.f32.mrf.mxu1  ;;  %v4359_v63 = vpop.f32.mrf.mxu3 }
 0x241   :  { %6662 = vst [vmem:[#allocation8_spill] sm:$0xff] %v4339_v48 }
 0x242   :  { %6670 = vst [vmem:[#allocation16_spill] sm:$0xff] %v4359_v63 }
 0x246   :  { %v4363_v39 = vpop.f32.mrf.mxu2 }
 0x247   :  { %6672 = vst [vmem:[#allocation18_spill] sm:$0xff] %v4363_v39 }
 0x248   :  { %v4369_v38 = vpop.f32.mrf.mxu3 }
 0x249   :  { %6673 = vst [vmem:[#allocation19_spill] sm:$0xff] %v4369_v38 }
 0x24e   :  { %v4371_v53 = vpop.f32.mrf.mxu2 }
 0x24f   :  { %6674 = vst [vmem:[#allocation20_spill] sm:$0xff] %v4371_v53 }
 0x250   :  { %v4381_v43 = vpop.f32.mrf.mxu3 }
 0x251   :  { %v1646_v24 = vsel %vm1073_vm1, %v4381_v43, -inf }
 0x256   :  { %v4383_v18 = vpop.f32.mrf.mxu2 }
 0x257   :  { %v1634_v11 = vsel %vm1073_vm1, %v4383_v18, -inf }
 0x258   :  { %v4395_v61 = vpop.f32.mrf.mxu3 }
 0x259   :  { %v1649_v21 = vsel %vm1073_vm1, %v4395_v61, -inf }
 0x25e   :  { %v4397_v62 = vpop.f32.mrf.mxu2 }
 0x25f   :  { %v1637_v9 = vsel %vm1073_vm1, %v4397_v62, -inf }
 0x260   :  { %v4417_v22 = vpop.f32.mrf.mxu3 }
 0x261   :  { %v4341_v20 = vpop.f32.mrf.mxu1  ;;  %v1652_v1 = vsel %vm1073_vm1, %v4417_v22, -inf }
 0x262   :  { %v1622_v45 = vsel %vm1073_vm1, %v4341_v20, -inf }
 0x263   :  { %1623 = vmax.xlane.f32.xlu1 %v1622_v45 }
 0x266   :  { %v4413_v35 = vpop.f32.mrf.mxu2 }
 0x267   :  { %v1640_v0 = vsel %vm1073_vm1, %v4413_v35, -inf }
 0x268   :  { %v4437_v44 = vpop.f32.mrf.mxu3 }
 0x269   :  { %v4373_v50 = vpop.f32.mrf.mxu1  ;;  %v1655_v47 = vsel %vm1073_vm1, %v4437_v44, -inf }
 0x26a   :  { %v1625_v54 = vsel %vm1073_vm1, %v4373_v50, -inf }
 0x26e   :  { %v4423_v23 = vpop.f32.mrf.mxu2 }
 0x26f   :  { %v1643_v31 = vsel %vm1073_vm1, %v4423_v23, -inf }
 0x277   :  { %v4345_v19 = vpop.f32.mrf.mxu0 }
 0x278   :  { %6663 = vst [vmem:[#allocation9_spill] sm:$0xff] %v4345_v19 }
 0x27b   :  { %v4393_v60 = vpop.f32.mrf.mxu1 }
 0x27c   :  { %v1628_v59 = vsel %vm1073_vm1, %v4393_v60, -inf }
 0x27f   :  { %v4351_v28 = vpop.f32.mrf.mxu0 }
 0x280   :  { %6666 = vst [vmem:[#allocation12_spill] sm:$0xff] %v4351_v28 }
 0x283   :  { %v4405_v42 = vpop.f32.mrf.mxu1 }
 0x284   :  { %v1631_v27 = vsel %vm1073_vm1, %v4405_v42, -inf }
 0x29b   :  { %v4355_v58 = vpop.f32.mrf.mxu0 }
 0x29c   :  { %6668 = vst [vmem:[#allocation14_spill] sm:$0xff] %v4355_v58 }
 0x2a3   :  { %v4361_v4 = vpop.f32.mrf.mxu0 }
 0x2a4   :  { %6671 = vst [vmem:[#allocation17_spill] sm:$0xff] %v4361_v4 }
 0x2ab   :  { %v4365_v14 = vpop.f32.mrf.mxu0 }
 0x2ac   :  { %v1610_v52 = vsel %vm1073_vm1, %v4365_v14, -inf }
 0x2ad   :  { %1611 = vmax.xlane.f32.xlu2 %v1610_v52 }
 0x2b3   :  { %v4375_v32 = vpop.f32.mrf.mxu0 }
 0x2b4   :  { %v1613_v7 = vsel %vm1073_vm1, %v4375_v32, -inf }
 0x2b5   :  { %1626 = vmax.xlane.f32.xlu2 %v1625_v54  ;;  %1614 = vmax.xlane.f32.xlu1 %v1613_v7 }
 0x2bb   :  { %v4385_v6 = vpop.f32.mrf.mxu0 }
 0x2bc   :  { %v1616_v56 = vsel %vm1073_vm1, %v4385_v6, -inf }
 0x2bd   :  { %1635 = vmax.xlane.f32.xlu2 %v1634_v11  ;;  %1647 = vmax.xlane.f32.xlu1 %v1646_v24 }
 0x2be   :  { %1617 = vmax.xlane.f32.xlu0 %v1616_v56 }
 0x2c3   :  { %v4407_v51 = vpop.f32.mrf.mxu0 }
 0x2c4   :  { %v1619_v8 = vsel %vm1073_vm1, %v4407_v51, -inf }
 0x2c5   :  { %1629 = vmax.xlane.f32.xlu2 %v1628_v59  ;;  %1650 = vmax.xlane.f32.xlu1 %v1649_v21 }
 0x2c6   :  { %1638 = vmax.xlane.f32.xlu0 %v1637_v9 }
 0x2cd   :  { %1632 = vmax.xlane.f32.xlu1 %v1631_v27  ;;  %1620 = vmax.xlane.f32.xlu2 %v1619_v8 }
 0x2d5   :  { %1641 = vmax.xlane.f32.xlu1 %v1640_v0 }
 0x2da   :  { %1853 = vrot.lane.b32.xlu0 %v4260_v17, %s3887_s9 }
 0x2dd   :  { %1653 = vmax.xlane.f32.xlu1 %v1652_v1 }
 0x2e5   :  { %1644 = vmax.xlane.f32.xlu1 %v1643_v31  ;;  %2050 = vrot.lane.b32.xlu2 %v3947_v2, %s3888_s23  ;;  %v1624_v2 = vpop.xlane.xlu1 %1623 }
 0x2ed   :  { %2089 = vrot.lane.b32.xlu2 %v3952_v3, %s3888_s23  ;;  %v1662_v3 = vsub.f32 %v4341_v20, %v1624_v2 }
 0x2ef   :  { %v1682_v34 = vmul.f32 1.442695, %v1662_v3 }
 0x2f1   :  { %3645 = vpow2.f32 %v1682_v34 }
 0x2f5   :  { %2048 = vrot.lane.b32.xlu2 %v3977_v10, %s3888_s23 }
 0x2f7   :  { %v4444_v37 = vpop.eup %3645 }
 0x2fd   :  { %2087 = vrot.lane.b32.xlu2 %v3986_v13, %s3888_s23  ;;  %v1718_v13 = vsel %vm1073_vm1, %v4444_v37, 0.0 }
 0x2fe   :  { %1855 = vrot.lane.b32.xlu1 %v4254_v5, %s3887_s9 }
 0x304   :  { %1656 = vmax.xlane.f32.xlu0 %v1655_v47 }
 0x305   :  { %2044 = vrot.lane.b32.xlu2 %v4001_v16, %s3888_s23 }
 0x320   :  { %v1612_v10 = vpop.xlane.xlu2 %1611 }
 0x321   :  { %v1658_v3 = vsub.f32 %v4365_v14, %v1612_v10 }
 0x328   :  { %v1627_v40 = vpop.xlane.xlu2 %1626  ;;  %1719 = vadd.xlane.f32.xlu1 %v1718_v13  ;;  %v4448_v45 = vpop.xlane.xlu1 %1614 }
 0x329   :  { %v1663_v52 = vsub.f32 %v4373_v50, %v1627_v40 }
 0x32b   :  { %v1684_v54 = vmul.f32 1.442695, %v1663_v52 }
 0x32d   :  { %3647 = vpow2.f32 %v1684_v54  ;;  %v1674_v54 = vmul.f32 1.442695, %v1658_v3 }
 0x330   :  { %v1636_v16 = vpop.xlane.xlu2 %1635  ;;  %v1648_v7 = vpop.xlane.xlu1 %1647 }
 0x331   :  { %v1666_v20 = vsub.f32 %v4383_v18, %v1636_v16  ;;  %v1670_v11 = vsub.f32 %v4381_v43, %v1648_v7  ;;  %v4453_v24 = vpop.xlane.xlu0 %1617 }
 0x333   :  { %v4455_v56 = vpop.eup %3647  ;;  %v1690_v59 = vmul.f32 1.442695, %v1666_v20  ;;  %v1698_v21 = vmul.f32 1.442695, %v1670_v11 }
 0x334   :  { %v1721_v9 = vsel %vm1073_vm1, %v4455_v56, 0.0 }
 0x335   :  { %3649 = vpow2.f32 %v1690_v59  ;;  %1722 = vadd.xlane.f32.xlu0 %v1721_v9 }
 0x336   :  { %3651 = vpow2.f32 %v1698_v21 }
 0x338   :  { %v1630_v50 = vpop.xlane.xlu2 %1629  ;;  %v1651_v49 = vpop.xlane.xlu1 %1650 }
 0x339   :  { %v1664_v12 = vsub.f32 %v4393_v60, %v1630_v50  ;;  %v1639_v30 = vpop.xlane.xlu0 %1638  ;;  %v1671_v8 = vsub.f32 %v4395_v61, %v1651_v49 }
 0x33a   :  { %v1667_v18 = vsub.f32 %v4397_v62, %v1639_v30 }
 0x33b   :  { %v4461_v43 = vpop.eup %3649  ;;  %v1686_v27 = vmul.f32 1.442695, %v1664_v12  ;;  %v1700_v60 = vmul.f32 1.442695, %v1671_v8 }
 0x33c   :  { %v4464_v0 = vpop.eup %3651  ;;  %v1692_v1 = vmul.f32 1.442695, %v1667_v18  ;;  %v1730_v31 = vsel %vm1073_vm1, %v4461_v43, 0.0 }
 0x33d   :  { %3653 = vpow2.f32 %v1686_v27  ;;  %v1742_v36 = vsel %vm1073_vm1, %v4464_v0, 0.0  ;;  %1731 = vadd.xlane.f32.xlu0 %v1730_v31 }
 0x33e   :  { %1743 = vadd.xlane.f32.xlu1 %v1742_v36  ;;  %3655 = vpow2.f32 %v1692_v1 }
 0x33f   :  { %3657 = vpow2.f32 %v1700_v60 }
 0x340   :  { %v1633_v62 = vpop.xlane.xlu1 %1632  ;;  %v4470_v47 = vpop.xlane.xlu2 %1620 }
 0x341   :  { %v1665_v2 = vsub.f32 %v4405_v42, %v1633_v62 }
 0x343   :  { %v4473_v61 = vpop.eup %3653  ;;  %v1688_v34 = vmul.f32 1.442695, %v1665_v2 }
 0x344   :  { %v1724_v13 = vsel %vm1073_vm1, %v4473_v61, 0.0  ;;  %v4478_v40 = vpop.eup %3655 }
 0x345   :  { %3659 = vpow2.f32 %v1688_v34  ;;  %1725 = vadd.xlane.f32.xlu0 %v1724_v13  ;;  %v1733_v52 = vsel %vm1073_vm1, %v4478_v40, 0.0  ;;  %v4482_v7 = vpop.eup %3657 }
 0x346   :  { %1734 = vadd.xlane.f32.xlu2 %v1733_v52  ;;  %3661 = vpow2.f32 %v1674_v54  ;;  %v1745_v21 = vsel %vm1073_vm1, %v4482_v7, 0.0  ;;  %v4516_v52 = vld [vmem:[%s6587_s3 + $0x30] sm:$0xff] }
 0x348   :  { %v1642_v16 = vpop.xlane.xlu1 %1641  ;;  %v2051_v42 = vpop.permute.xlu2 %2050 }
 0x349   :  { %v1668_v14 = vsub.f32 %v4413_v35, %v1642_v16  ;;  %v2062_v10 = vsel %vm888_vm0, %v2051_v42, 0  ;;  %v4523_v42 = vld [vmem:[%s6587_s3 + $0x28] sm:$0xff] }
 0x34a   :  { %2070 = vmatpush.bf16.xpose.msra.mxu2 %v2062_v10 }
 0x34b   :  { %v4486_v20 = vpop.eup %3659  ;;  %v1694_v11 = vmul.f32 1.442695, %v1668_v14 }
 0x34c   :  { %v1727_v59 = vsel %vm1073_vm1, %v4486_v20, 0.0  ;;  %v4492_v49 = vpop.eup %3661  ;;  %v1854_v54 = vpop.permute.xlu0 %1853 }
 0x34d   :  { %3663 = vpow2.f32 %v1694_v11  ;;  %1728 = vadd.xlane.f32.xlu1 %v1727_v59  ;;  %1746 = vadd.xlane.f32.xlu0 %v1745_v21  ;;  %v1706_v27 = vsel %vm1073_vm1, %v4492_v49, 0.0  ;;  %v4533_v59 = vld [vmem:[%s6588_s4 + $0x18] sm:$0xff] }
 0x34e   :  { %v4540_v21 = vld [vmem:[%s6587_s3 + $0x38] sm:$0xff] }
 0x350   :  { %v1654_v9 = vpop.xlane.xlu1 %1653  ;;  %v2090_v50 = vpop.permute.xlu2 %2089 }
 0x351   :  { %v1672_v35 = vsub.f32 %v4417_v22, %v1654_v9  ;;  %v2101_v12 = vsel %vm888_vm0, %v2090_v50, 0  ;;  %v1659_v9 = vsub.f32 %v4375_v32, %v4448_v45 }
 0x352   :  { %2109 = vmatpush.bf16.xpose.msra.mxu3 %v2101_v12  ;;  %v1661_v12 = vsub.f32 %v4407_v51, %v4470_v47 }
 0x353   :  { %v4496_v30 = vpop.eup %3663  ;;  %v1702_v18 = vmul.f32 1.442695, %v1672_v35  ;;  %v1676_v50 = vmul.f32 1.442695, %v1659_v9  ;;  %v1660_v35 = vsub.f32 %v4385_v6, %v4453_v24  ;;  %v4566_v6 = vld [vmem:[%s6587_s3 + $0x10] sm:$0xff] }
 0x354   :  { %v1736_v8 = vsel %vm1073_vm1, %v4496_v30, 0.0 }
 0x355   :  { %3665 = vpow2.f32 %v1702_v18  ;;  %1707 = vadd.xlane.f32.xlu1 %v1706_v27  ;;  %1737 = vadd.xlane.f32.xlu0 %v1736_v8  ;;  %v1678_v18 = vmul.f32 1.442695, %v1660_v35  ;;  %v4557_v27 = vld [vmem:[%s6588_s4 + $0x10] sm:$0xff]  ;;  %v1680_v8 = vmul.f32 1.442695, %v1661_v12  ;;  %v4605_v12 = vld [vmem:[%s6589_s5 + $0x38] sm:$0xff] }
 0x358   :  { %v1645_v1 = vpop.xlane.xlu1 %1644  ;;  %v2049_v31 = vpop.permute.xlu2 %2048 }
 0x359   :  { %v1669_v36 = vsub.f32 %v4423_v23, %v1645_v1  ;;  %v2059_v22 = vsel %vm888_vm0, %v2049_v31, 0 }
 0x35a   :  { %2071 = vmatpush.bf16.xpose.msra.mxu2 %v2059_v22 }
 0x35b   :  { %v4504_v60 = vpop.eup %3665  ;;  %v1696_v62 = vmul.f32 1.442695, %v1669_v36 }
 0x35c   :  { %v1748_v2 = vsel %vm1073_vm1, %v4504_v60, 0.0 }
 0x35d   :  { %3667 = vpow2.f32 %v1696_v62  ;;  %1749 = vadd.xlane.f32.xlu2 %v1748_v2 }
 0x360   :  { %v2088_v3 = vpop.permute.xlu2 %2087 }
 0x361   :  { %v2098_v34 = vsel %vm888_vm0, %v2088_v3, 0 }
 0x362   :  { %2110 = vmatpush.bf16.xpose.msra.mxu3 %v2098_v34 }
 0x363   :  { %v4509_v13 = vpop.eup %3667 }
 0x364   :  { %v1739_v23 = vsel %vm1073_vm1, %v4509_v13, 0.0 }
 0x365   :  { %1740 = vadd.xlane.f32.xlu2 %v1739_v23 }
 0x369   :  { %2083 = vrot.lane.b32.xlu0 %v4516_v52, %s3888_s23 }
 0x370   :  { %v1856_v16 = vpop.permute.xlu1 %1855 }
 0x371   :  { %1871 = vmatpush.bf16.msrb.mxu1 %v1856_v16  ;;  %2046 = vrot.lane.b32.xlu0 %v4523_v42, %s3888_s23 }
 0x375   :  { %1872 = vmatpush.bf16.msrb.mxu1 %v1854_v54  ;;  %v4584_v54 = vpop.permute.xlu2 %2044 }
 0x377   :  { %v1657_v14 = vpop.xlane.xlu0 %1656 }
 0x378   :  { %v1673_v10 = vsub.f32 %v4437_v44, %v1657_v14 }
 0x379   :  { %1814 = vrot.lane.b32.xlu0 %v4310_v33, %s3887_s9 }
 0x37a   :  { %v1704_v11 = vmul.f32 1.442695, %v1673_v10 }
 0x37c   :  { %3669 = vpow2.f32 %v1704_v11 }
 0x37d   :  { %2011 = vrot.lane.b32.xlu2 %v4533_v59, %s3888_s23  ;;  %3671 = vpow2.f32 %v1676_v50  ;;  %v4597_v50 = vld [vmem:[%s6588_s4] sm:$0xff] }
 0x37e   :  { %3673 = vpow2.f32 %v1678_v18 }
 0x381   :  { %2085 = vrot.lane.b32.xlu0 %v4540_v21, %s3888_s23 }
 0x382   :  { %v4544_v44 = vpop.eup %3669 }
 0x383   :  { %v1751_v33 = vsel %vm1073_vm1, %v4544_v44, 0.0  ;;  %v4561_v32 = vpop.eup %3671 }
 0x384   :  { %1752 = vadd.xlane.f32.xlu1 %v1751_v33  ;;  %v1709_v51 = vsel %vm1073_vm1, %v4561_v32, 0.0  ;;  %v4572_v45 = vpop.eup %3673 }
 0x385   :  { %v1712_v36 = vsel %vm1073_vm1, %v4572_v45, 0.0 }
 0x39b   :  { %v1720_v1 = vpop.xlane.xlu1 %1719 }
 0x39c   :  { %3675 = vrcp.f32 %v1720_v1 }
 0x39d   :  { %2009 = vrot.lane.b32.xlu1 %v4557_v27, %s3888_s23  ;;  %3677 = vpow2.f32 %v1680_v8 }
 0x3a2   :  { %v3676_v47 = vpop.eup %3675 }
 0x3a3   :  { %v4574_v31 = vpop.eup %3677  ;;  %v1774_v22 = vmul.f32 %v3676_v47, %v4444_v37  ;;  %v4589_v37 = vld [vmem:[%s6587_s3 + $0x18] sm:$0xff] }
 0x3a4   :  { %v1715_v62 = vsel %vm1073_vm1, %v4574_v31, 0.0 }
 0x3a5   :  { %2005 = vrot.lane.b32.xlu1 %v4566_v6, %s3888_s23  ;;  %v1790_v3 = vpack.c.bf16 %v1774_v22, %v1774_v22 }
 0x3a6   :  { %1710 = vadd.xlane.f32.xlu2 %v1709_v51 }
 0x3a7   :  { %v1847_v14 = vunpack.c.l.b16 %v1790_v3 }
 0x3a8   :  { %v1723_v24 = vpop.xlane.xlu0 %1722 }
 0x3a9   :  { %3679 = vrcp.f32 %v1723_v24 }
 0x3ab   :  { %1713 = vadd.xlane.f32.xlu0 %v1712_v36 }
 0x3ad   :  { %1812 = vrot.lane.b32.xlu1 %v4316_v55, %s3887_s9 }
 0x3ae   :  { %1716 = vadd.xlane.f32.xlu2 %v1715_v62 }
 0x3af   :  { %v3680_v2 = vpop.eup %3679 }
 0x3b0   :  { %v1775_v34 = vmul.f32 %v3680_v2, %v4455_v56  ;;  %v1732_v23 = vpop.xlane.xlu0 %1731  ;;  %v4615_v2 = vld [vmem:[%s6587_s3] sm:$0xff] }
 0x3b1   :  { %3681 = vrcp.f32 %v1732_v23  ;;  %v1744_v11 = vpop.xlane.xlu1 %1743 }
 0x3b2   :  { %v1791_v16 = vpack.c.bf16 %v1775_v34, %v1775_v34 }
 0x3b4   :  { %v1848_v10 = vunpack.c.l.b16 %v1791_v16 }
 0x3b5   :  { %2007 = vrot.lane.b32.xlu1 %v4589_v37, %s3888_s23 }
 0x3b6   :  { %v1851_v55 = vpack.c.b16 %v1848_v10, %v1847_v14 }
 0x3b7   :  { %v3682_v9 = vpop.eup %3681 }
 0x3b8   :  { %3494 = vmatmul.msk.bf16.vlgmr.msrb.gmra.mxu1 %vm1073_vm1, %v1851_v55  ;;  %v1726_v56 = vpop.xlane.xlu0 %1725  ;;  %v1778_v35 = vmul.f32 %v3682_v9, %v4461_v43 }
 0x3b9   :  { %3683 = vrcp.f32 %v1726_v56  ;;  %v1735_v33 = vpop.xlane.xlu2 %1734 }
 0x3ba   :  { %3685 = vrcp.f32 %v1735_v33  ;;  %v1794_v47 = vpack.c.bf16 %v1778_v35, %v1778_v35 }
 0x3bb   :  { %3687 = vrcp.f32 %v1744_v11 }
 0x3bc   :  { %v1888_v3 = vunpack.c.l.b16 %v1794_v47 }
 0x3bd   :  { %1970 = vrot.lane.b32.xlu1 %v4597_v50, %s3888_s23 }
 0x3bf   :  { %2449 = vrot.lane.b32.xlu0 %v4605_v12, %s3888_s23  ;;  %v3684_v18 = vpop.eup %3683 }
 0x3c0   :  { %v1729_v8 = vpop.xlane.xlu1 %1728  ;;  %v1747_v1 = vpop.xlane.xlu0 %1746  ;;  %v1776_v43 = vmul.f32 %v3684_v18, %v4473_v61 }
 0x3c1   :  { %v3686_v51 = vpop.eup %3685  ;;  %3689 = vrcp.f32 %v1729_v8 }
 0x3c2   :  { %v3688_v24 = vpop.eup %3687  ;;  %v1779_v36 = vmul.f32 %v3686_v51, %v4478_v40  ;;  %3691 = vrcp.f32 %v1747_v1  ;;  %v4622_v40 = vld [vmem:[%s6588_s4 + $0x8] sm:$0xff]  ;;  %v1792_v10 = vpack.c.bf16 %v1776_v43, %v1776_v43 }
 0x3c3   :  { %v1782_v62 = vmul.f32 %v3688_v24, %v4464_v0  ;;  %v4629_v0 = vld [vmem:[%s6589_s5 + $0x20] sm:$0xff]  ;;  %v4639_v1 = vld [vmem:[%s6587_s3 + $0x8] sm:$0xff]  ;;  %v4653_v24 = vld [vmem:[%s6589_s5 + $0x30] sm:$0xff] }
 0x3c4   :  { %v1795_v22 = vpack.c.bf16 %v1779_v36, %v1779_v36  ;;  %v1849_v9 = vunpack.c.l.b16 %v1792_v10 }
 0x3c5   :  { %1966 = vrot.lane.b32.xlu1 %v4615_v2, %s3888_s23  ;;  %v1798_v55 = vpack.c.bf16 %v1782_v62, %v1782_v62 }
 0x3c6   :  { %v1889_v34 = vunpack.c.l.b16 %v1795_v22  ;;  %1972 = vrot.lane.b32.xlu2 %v4622_v40, %s3888_s23 }
 0x3c7   :  { %v3690_v61 = vpop.eup %3689  ;;  %2406 = vrot.lane.b32.xlu0 %v4629_v0, %s3888_s23  ;;  %v1929_v18 = vunpack.c.l.b16 %v1798_v55 }
 0x3c8   :  { %v3692_v23 = vpop.eup %3691  ;;  %v1892_v16 = vpack.c.b16 %v1889_v34, %v1888_v3  ;;  %v1777_v14 = vmul.f32 %v3690_v61, %v4486_v20  ;;  %v1738_v47 = vpop.xlane.xlu0 %1737  ;;  %v3852_v34 = vld [vmem:[%s6588_s4 + $0x28] sm:$0xff] }
 0x3c9   :  { %v1783_v11 = vmul.f32 %v3692_v23, %v4482_v7  ;;  %v4646_v7 = vld [vmem:[%s6589_s5 + $0x28] sm:$0xff]  ;;  %3693 = vrcp.f32 %v1738_v47 }
 0x3ca   :  { %3496 = vmatmul.msk.bf16.vlgmr.msrb.gmra.mxu2 %vm1073_vm1, %v1892_v16  ;;  %v1793_v56 = vpack.c.bf16 %v1777_v14, %v1777_v14 }
 0x3cb   :  { %v1799_v33 = vpack.c.bf16 %v1783_v11, %v1783_v11 }
 0x3cc   :  { %v1850_v35 = vunpack.c.l.b16 %v1793_v56 }
 0x3cd   :  { %v1930_v8 = vunpack.c.l.b16 %v1799_v33  ;;  %1968 = vrot.lane.b32.xlu1 %v4639_v1, %s3888_s23  ;;  %v3854_v33 = vld [vmem:[%s6588_s4 + $0x20] sm:$0xff] }
 0x3ce   :  { %v1852_v20 = vpack.c.b16 %v1850_v35, %v1849_v9  ;;  %2408 = vrot.lane.b32.xlu2 %v4646_v7, %s3888_s23  ;;  %v3855_v9 = vld [vmem:[%s6588_s4 + $0x30] sm:$0xff]  ;;  %v1708_v35 = vpop.xlane.xlu1 %1707 }
 0x3cf   :  { %v1933_v51 = vpack.c.b16 %v1930_v8, %v1929_v18  ;;  %2447 = vrot.lane.b32.xlu0 %v4653_v24, %s3888_s23  ;;  %v3694_v43 = vpop.eup %3693 }
 0x3d0   :  { %3495 = vmatmul.msk.bf16.gmra.mxu1 %vm1073_vm1, %v1852_v20  ;;  %v1750_v36 = vpop.xlane.xlu2 %1749  ;;  %v1780_v3 = vmul.f32 %v3694_v43, %v4496_v30 }
 0x3d1   :  { %3498 = vmatmul.msk.bf16.vlgmr.msrb.gmra.mxu3 %vm1073_vm1, %v1933_v51 }
 0x3d2   :  { %v1796_v16 = vpack.c.bf16 %v1780_v3, %v1780_v3 }
 0x3d4   :  { %v1890_v55 = vunpack.c.l.b16 %v1796_v16 }
 0x3d5   :  { %2367 = vrot.lane.b32.xlu1 %v4254_v5, %s3888_s23  ;;  %v3853_v5 = vld [vmem:[%s6588_s4 + $0x38] sm:$0xff] }
 0x3d6   :  { %2365 = vrot.lane.b32.xlu2 %v4260_v17, %s3888_s23 }
 0x3d7   :  { %2562 = vrot.lane.b32.xlu0 %v3852_v34, %s3889_s10 }
 0x3d8   :  { %v1741_v22 = vpop.xlane.xlu2 %1740 }
 0x3d9   :  { %3695 = vrcp.f32 %v1741_v22 }
 0x3da   :  { %3697 = vrcp.f32 %v1750_v36 }
 0x3db   :  { %v2084_v62 = vpop.permute.xlu0 %2083 }
 0x3de   :  { %2601 = vrot.lane.b32.xlu2 %v3853_v5, %s3889_s10 }
 0x3df   :  { %v3696_v17 = vpop.eup %3695  ;;  %2523 = vrot.lane.b32.xlu0 %v4533_v59, %s3889_s10 }
 0x3e0   :  { %v2012_v61 = vpop.permute.xlu2 %2011  ;;  %v1781_v23 = vmul.f32 %v3696_v17, %v4509_v13  ;;  %v3698_v18 = vpop.eup %3697 }
 0x3e1   :  { %v2023_v30 = vsel %vm888_vm0, %v2012_v61, 0  ;;  %v1784_v8 = vmul.f32 %v3698_v18, %v4504_v60 }
 0x3e2   :  { %2031 = vmatpush.bf16.xpose.msra.mxu1 %v2023_v30  ;;  %v1797_v14 = vpack.c.bf16 %v1781_v23, %v1781_v23 }
 0x3e3   :  { %v2047_v10 = vpop.permute.xlu0 %2046  ;;  %v1800_v47 = vpack.c.bf16 %v1784_v8, %v1784_v8 }
 0x3e4   :  { %v1891_v11 = vunpack.c.l.b16 %v1797_v14 }
 0x3e5   :  { %v1931_v43 = vunpack.c.l.b16 %v1800_v47 }
 0x3e6   :  { %v1893_v56 = vpack.c.b16 %v1891_v11, %v1890_v55  ;;  %2560 = vrot.lane.b32.xlu2 %v3854_v33, %s3889_s10 }
 0x3e8   :  { %3497 = vmatmul.msk.bf16.gmra.mxu2 %vm1073_vm1, %v1893_v56 }
 0x3eb   :  { %v1815_v13 = vpop.permute.xlu0 %1814 }
 0x3ec   :  { %1830 = vmatpush.bf16.msrb.mxu0 %v1815_v13 }
 0x3ee   :  { %2599 = vrot.lane.b32.xlu2 %v3855_v9, %s3889_s10 }
 0x3f3   :  { %v2086_v60 = vpop.permute.xlu0 %2085 }
 0x3f7   :  { %v1753_v59 = vpop.xlane.xlu1 %1752 }
 0x3f8   :  { %3699 = vrcp.f32 %v1753_v59  ;;  %3504 = vmatmul.msk.bf16.vlgmr.msra.gmra.mxu2 %vm888_vm0, %v4584_v54 }
 0x3f9   :  { %3701 = vrcp.f32 %v1708_v35 }
 0x3fe   :  { %v3700_v20 = vpop.eup %3699 }
 0x3ff   :  { %v1785_v51 = vmul.f32 %v3700_v20, %v4544_v44  ;;  %v3702_v17 = vpop.eup %3701 }
 0x400   :  { %v1770_v61 = vmul.f32 %v3702_v17, %v4492_v49 }
 0x401   :  { %v1801_v22 = vpack.c.bf16 %v1785_v51, %v1785_v51 }
 0x402   :  { %v1786_v30 = vpack.c.bf16 %v1770_v61, %v1770_v61 }
 0x403   :  { %v1932_v3 = vunpack.c.l.b16 %v1801_v22 }
 0x405   :  { %v1934_v34 = vpack.c.b16 %v1932_v3, %v1931_v43 }
 0x407   :  { %3499 = vmatmul.msk.bf16.gmra.mxu3 %vm1073_vm1, %v1934_v34 }
 0x408   :  { %3505 = vmatmul.msk.bf16.gmra.mxu2 %vm888_vm0, %v2047_v10 }
 0x40f   :  { %v2010_v36 = vpop.permute.xlu1 %2009 }
 0x410   :  { %v2020_v5 = vsel %vm888_vm0, %v2010_v36, 0 }
 0x411   :  { %2032 = vmatpush.bf16.xpose.msra.mxu1 %v2020_v5 }
 0x417   :  { %v2006_v54 = vpop.permute.xlu1 %2005  ;;  %3506 = vmatmul.msk.bf16.vlgmr.msra.gmra.mxu3 %vm888_vm0, %v2084_v62  ;;  %v1806_v62 = vunpack.c.l.b16 %v1786_v30 }
 0x418   :  { %3502 = vmatmul.msk.bf16.vlgmr.msra.gmra.mxu1 %vm888_vm0, %v2006_v54 }
 0x419   :  { %v1711_v44 = vpop.xlane.xlu2 %1710 }
 0x41a   :  { %3703 = vrcp.f32 %v1711_v44 }
 0x41e   :  { %v1714_v10 = vpop.xlane.xlu0 %1713 }
 0x41f   :  { %v1813_v23 = vpop.permute.xlu1 %1812 }
 0x420   :  { %v3704_v16 = vpop.eup %3703  ;;  %1831 = vmatpush.bf16.msrb.mxu0 %v1813_v23 }
 0x421   :  { %v1771_v14 = vmul.f32 %v3704_v16, %v4561_v32  ;;  %v1717_v55 = vpop.xlane.xlu2 %1716 }
 0x422   :  { %3705 = vrcp.f32 %v1717_v55 }
 0x423   :  { %v1787_v11 = vpack.c.bf16 %v1771_v14, %v1771_v14  ;;  %3707 = vrcp.f32 %v1714_v10 }
 0x425   :  { %v1807_v56 = vunpack.c.l.b16 %v1787_v11 }
 0x427   :  { %v1810_v33 = vpack.c.b16 %v1807_v56, %v1806_v62  ;;  %3507 = vmatmul.msk.bf16.gmra.mxu3 %vm888_vm0, %v2086_v60  ;;  %v2008_v13 = vpop.permute.xlu1 %2007 }
 0x428   :  { %v3706_v9 = vpop.eup %3705  ;;  %3503 = vmatmul.msk.bf16.gmra.mxu1 %vm888_vm0, %v2008_v13 }
 0x429   :  { %3492 = vmatmul.msk.bf16.vlgmr.msrb.gmra.mxu0 %vm1073_vm1, %v1810_v33  ;;  %v1973_v49 = vpop.permute.xlu2 %1972  ;;  %v3708_v35 = vpop.eup %3707  ;;  %v1773_v59 = vmul.f32 %v3706_v9, %v4574_v31 }
 0x42a   :  { %v1984_v32 = vsel %vm888_vm0, %v1973_v49, 0  ;;  %v1772_v18 = vmul.f32 %v3708_v35, %v4572_v45 }
 0x42b   :  { %1992 = vmatpush.bf16.xpose.msra.mxu0 %v1984_v32  ;;  %v1789_v8 = vpack.c.bf16 %v1773_v59, %v1773_v59 }
 0x42c   :  { %v1788_v47 = vpack.c.bf16 %v1772_v18, %v1772_v18 }
 0x42d   :  { %v1809_v22 = vunpack.c.l.b16 %v1789_v8 }
 0x42e   :  { %v1808_v43 = vunpack.c.l.b16 %v1788_v47 }
 0x42f   :  { %v1971_v20 = vpop.permute.xlu1 %1970 }
 0x430   :  { %v1981_v51 = vsel %vm888_vm0, %v1971_v20, 0  ;;  %v1811_v3 = vpack.c.b16 %v1809_v22, %v1808_v43 }
 0x431   :  { %v2450_v33 = vpop.permute.xlu0 %2449  ;;  %v2409_v35 = vpop.permute.xlu2 %2408 }
 0x432   :  { %2465 = vmatpush.bf16.msrb.mxu3 %v2450_v33  ;;  %2424 = vmatpush.bf16.msrb.mxu2 %v2409_v35 }
 0x433   :  { %1993 = vmatpush.bf16.xpose.msra.mxu0 %v1981_v51 }
 0x435   :  { %v4706_v31 = vpop.f32.mrf.mxu1 }
 0x436   :  { %6675 = vst [vmem:[#allocation21_spill] sm:$0xff] %v4706_v31 }
 0x437   :  { %v1967_v34 = vpop.permute.xlu1 %1966 }
 0x439   :  { %3493 = vmatmul.msk.bf16.gmra.mxu0 %vm1073_vm1, %v1811_v3  ;;  %v2407_v49 = vpop.permute.xlu0 %2406  ;;  %v2366_v51 = vpop.permute.xlu2 %2365 }
 0x43a   :  { %2425 = vmatpush.bf16.msrb.mxu2 %v2407_v49 }
 0x43d   :  { %v4708_v45 = vpop.f32.mrf.mxu1 }
 0x43f   :  { %v1969_v36 = vpop.permute.xlu1 %1968 }
 0x441   :  { %v2448_v20 = vpop.permute.xlu0 %2447 }
 0x442   :  { %2466 = vmatpush.bf16.msrb.mxu3 %v2448_v20 }
 0x447   :  { %v2368_v8 = vpop.permute.xlu1 %2367 }
 0x448   :  { %2383 = vmatpush.bf16.msrb.mxu1 %v2368_v8 }
 0x449   :  { %3500 = vmatmul.msk.bf16.vlgmr.msra.gmra.mxu0 %vm888_vm0, %v1967_v34 }
 0x44c   :  { %2384 = vmatpush.bf16.msrb.mxu1 %v2366_v51 }
 0x44d   :  { %v4710_v5 = vpop.f32.mrf.mxu1  ;;  %v4722_v23 = vpop.f32.mrf.mxu2 }
 0x44e   :  { %6676 = vst [vmem:[#allocation22_spill] sm:$0xff] %v4710_v5 }
 0x454   :  { %v4726_v30 = vpop.f32.mrf.mxu3 }
 0x455   :  { %v4712_v54 = vpop.f32.mrf.mxu1  ;;  %6679 = vst [vmem:[#allocation25_spill] sm:$0xff] %v4726_v30  ;;  %v4730_v10 = vpop.f32.mrf.mxu2 }
 0x456   :  { %6677 = vst [vmem:[#allocation23_spill] sm:$0xff] %v4712_v54 }
 0x457   :  { %6681 = vst [vmem:[#allocation27_spill] sm:$0xff] %v4730_v10 }
 0x459   :  { %3501 = vmatmul.msk.bf16.gmra.mxu0 %vm888_vm0, %v1969_v36 }
 0x45c   :  { %v4732_v55 = vpop.f32.mrf.mxu3 }
 0x45d   :  { %6682 = vst [vmem:[#allocation28_spill] sm:$0xff] %v4732_v55 }
 0x46b   :  { %v4736_v62 = vpop.f32.mrf.mxu2 }
 0x46c   :  { %6684 = vst [vmem:[#allocation30_spill] sm:$0xff] %v4736_v62 }
 0x473   :  { %v4742_v9 = vpop.f32.mrf.mxu2 }
 0x474   :  { %6687 = vst [vmem:[#allocation33_spill] sm:$0xff] %v4742_v9 }
 0x47b   :  { %v4750_v47 = vpop.f32.mrf.mxu2 }
 0x47c   :  { %v2146_v3 = vsel %vm1073_vm1, %v4750_v47, -inf }
 0x483   :  { %v4770_v20 = vpop.f32.mrf.mxu2 }
 0x484   :  { %v2149_v46 = vsel %vm1073_vm1, %v4770_v20, -inf }
 0x48a   :  { %v4738_v56 = vpop.f32.mrf.mxu3 }
 0x48b   :  { %6685 = vst [vmem:[#allocation31_spill] sm:$0xff] %v4738_v56  ;;  %v4786_v58 = vpop.f32.mrf.mxu2 }
 0x492   :  { %v4744_v32 = vpop.f32.mrf.mxu3 }
 0x493   :  { %6688 = vst [vmem:[#allocation34_spill] sm:$0xff] %v4744_v32 }
 0x495   :  { %v4714_v60 = vpop.f32.mrf.mxu1 }
 0x496   :  { %v2134_v44 = vsel %vm1073_vm1, %v4714_v60, -inf }
 0x497   :  { %2135 = vmax.xlane.f32.xlu0 %v2134_v44  ;;  %v2563_v44 = vpop.permute.xlu0 %2562 }
 0x498   :  { %v2574_v33 = vsel %vm888_vm0, %v2563_v44, 0 }
 0x499   :  { %2582 = vmatpush.bf16.xpose.msra.mxu2 %v2574_v33 }
 0x49a   :  { %v4754_v43 = vpop.f32.mrf.mxu3 }
 0x49b   :  { %v2158_v4 = vsel %vm1073_vm1, %v4754_v43, -inf }
 0x49d   :  { %v4718_v17 = vpop.f32.mrf.mxu1 }
 0x49e   :  { %v2137_v61 = vsel %vm1073_vm1, %v4718_v17, -inf }
 0x49f   :  { %2138 = vmax.xlane.f32.xlu0 %v2137_v61  ;;  %v2602_v61 = vpop.permute.xlu2 %2601 }
 0x4a0   :  { %v2613_v49 = vsel %vm888_vm0, %v2602_v61, 0 }
 0x4a1   :  { %2621 = vmatpush.bf16.xpose.msra.mxu3 %v2613_v49 }
 0x4a2   :  { %v4772_v51 = vpop.f32.mrf.mxu3 }
 0x4a5   :  { %v4760_v36 = vpop.f32.mrf.mxu1 }
 0x4a6   :  { %v4724_v16 = vpop.f32.mrf.mxu0 }
 0x4a7   :  { %6678 = vst [vmem:[#allocation24_spill] sm:$0xff] %v4724_v16 }
 0x4ad   :  { %v4774_v44 = vpop.f32.mrf.mxu1 }
 0x4ae   :  { %v4728_v14 = vpop.f32.mrf.mxu0 }
 0x4af   :  { %6680 = vst [vmem:[#allocation26_spill] sm:$0xff] %v4728_v14 }
 0x4b6   :  { %v4734_v11 = vpop.f32.mrf.mxu0 }
 0x4b7   :  { %6683 = vst [vmem:[#allocation29_spill] sm:$0xff] %v4734_v11 }
 0x4be   :  { %v4740_v13 = vpop.f32.mrf.mxu0 }
 0x4bf   :  { %6686 = vst [vmem:[#allocation32_spill] sm:$0xff] %v4740_v13 }
 0x4c6   :  { %v4746_v59 = vpop.f32.mrf.mxu0 }
 0x4c7   :  { %v2122_v18 = vsel %vm1073_vm1, %v4746_v59, -inf }
 0x4c8   :  { %2123 = vmax.xlane.f32.xlu2 %v2122_v18  ;;  %v2140_v18 = vsel %vm1073_vm1, %v4760_v36, -inf }
 0x4ce   :  { %v4752_v22 = vpop.f32.mrf.mxu0 }
 0x4cf   :  { %v2125_v34 = vsel %vm1073_vm1, %v4752_v22, -inf }
 0x4d0   :  { %2147 = vmax.xlane.f32.xlu2 %v2146_v3  ;;  %2126 = vmax.xlane.f32.xlu0 %v2125_v34  ;;  %v2524_v3 = vpop.permute.xlu0 %2523  ;;  %v2561_v34 = vpop.permute.xlu2 %2560 }
 0x4d1   :  { %v2535_v61 = vsel %vm888_vm0, %v2524_v3, 0  ;;  %v2571_v33 = vsel %vm888_vm0, %v2561_v34, 0  ;;  %v4788_v3 = vpop.f32.mrf.mxu3 }
 0x4d2   :  { %2583 = vmatpush.bf16.xpose.msra.mxu2 %v2571_v33  ;;  %2543 = vmatpush.bf16.xpose.msra.mxu1 %v2535_v61  ;;  %v2161_v33 = vsel %vm1073_vm1, %v4772_v51, -inf }
 0x4d6   :  { %v4764_v35 = vpop.f32.mrf.mxu0 }
 0x4d7   :  { %v2128_v8 = vsel %vm1073_vm1, %v4764_v35, -inf }
 0x4d8   :  { %2141 = vmax.xlane.f32.xlu0 %v2140_v18  ;;  %2129 = vmax.xlane.f32.xlu1 %v2128_v8  ;;  %v2143_v18 = vsel %vm1073_vm1, %v4774_v44, -inf  ;;  %v2600_v34 = vpop.permute.xlu2 %2599 }
 0x4d9   :  { %v2610_v61 = vsel %vm888_vm0, %v2600_v34, 0 }
 0x4da   :  { %2622 = vmatpush.bf16.xpose.msra.mxu3 %v2610_v61  ;;  %v2164_v61 = vsel %vm1073_vm1, %v4788_v3, -inf }
 0x4de   :  { %v4778_v49 = vpop.f32.mrf.mxu0 }
 0x4df   :  { %v2131_v8 = vsel %vm1073_vm1, %v4778_v49, -inf }
 0x4e0   :  { %2159 = vmax.xlane.f32.xlu0 %v2158_v4  ;;  %2144 = vmax.xlane.f32.xlu1 %v2143_v18  ;;  %v2152_v4 = vsel %vm1073_vm1, %v4786_v58, -inf  ;;  %v4797_v18 = vpop.f32.mrf.mxu2 }
 0x4e1   :  { %2132 = vmax.xlane.f32.xlu2 %v2131_v8  ;;  %v4799_v8 = vpop.f32.mrf.mxu3  ;;  %v2155_v34 = vsel %vm1073_vm1, %v4797_v18, -inf }
 0x4e8   :  { %2162 = vmax.xlane.f32.xlu0 %v2161_v33  ;;  %2150 = vmax.xlane.f32.xlu1 %v2149_v46  ;;  %v2167_v33 = vsel %vm1073_vm1, %v4799_v8, -inf }
 0x4e9   :  { %2153 = vmax.xlane.f32.xlu2 %v2152_v4 }
 0x4f0   :  { %2156 = vmax.xlane.f32.xlu0 %v2155_v34  ;;  %2165 = vmax.xlane.f32.xlu1 %v2164_v61 }
 0x4f1   :  { %2168 = vmax.xlane.f32.xlu2 %v2167_v33 }
 0x50a   :  { %v2136_v46 = vpop.xlane.xlu0 %2135 }
 0x50b   :  { %v2174_v29 = vsub.f32 %v4714_v60, %v2136_v46 }
 0x50d   :  { %v2194_v4 = vmul.f32 1.442695, %v2174_v29 }
 0x50f   :  { %3709 = vpow2.f32 %v2194_v4 }
 0x512   :  { %v2139_v25 = vpop.xlane.xlu0 %2138 }
 0x513   :  { %v2175_v15 = vsub.f32 %v4718_v17, %v2139_v25 }
 0x515   :  { %v4809_v26 = vpop.eup %3709  ;;  %v2196_v48 = vmul.f32 1.442695, %v2175_v15 }
 0x516   :  { %v2230_v19 = vsel %vm1073_vm1, %v4809_v26, 0.0 }
 0x517   :  { %3711 = vpow2.f32 %v2196_v48  ;;  %2231 = vadd.xlane.f32.xlu1 %v2230_v19 }
 0x51d   :  { %v4813_v34 = vpop.eup %3711 }
 0x51e   :  { %v2233_v61 = vsel %vm1073_vm1, %v4813_v34, 0.0 }
 0x51f   :  { %2234 = vadd.xlane.f32.xlu1 %v2233_v61 }
 0x53b   :  { %v4817_v60 = vpop.xlane.xlu2 %2123 }
 0x543   :  { %v2127_v29 = vpop.xlane.xlu0 %2126  ;;  %v2148_v33 = vpop.xlane.xlu2 %2147 }
 0x544   :  { %v2178_v25 = vsub.f32 %v4750_v47, %v2148_v33 }
 0x546   :  { %v2202_v17 = vmul.f32 1.442695, %v2178_v25 }
 0x548   :  { %3713 = vpow2.f32 %v2202_v17 }
 0x54b   :  { %v2142_v15 = vpop.xlane.xlu0 %2141  ;;  %v4820_v46 = vpop.xlane.xlu1 %2129 }
 0x54c   :  { %v2176_v48 = vsub.f32 %v4760_v36, %v2142_v15  ;;  %v2171_v36 = vsub.f32 %v4752_v22, %v2127_v29 }
 0x54e   :  { %v2198_v19 = vmul.f32 1.442695, %v2176_v48  ;;  %v4823_v4 = vpop.eup %3713 }
 0x54f   :  { %v2242_v61 = vsel %vm1073_vm1, %v4823_v4, 0.0 }
 0x550   :  { %3715 = vpow2.f32 %v2198_v19  ;;  %2243 = vadd.xlane.f32.xlu1 %v2242_v61  ;;  %v2188_v19 = vmul.f32 1.442695, %v2171_v36 }
 0x553   :  { %v2160_v41 = vpop.xlane.xlu0 %2159  ;;  %v2145_v38 = vpop.xlane.xlu1 %2144 }
 0x554   :  { %v2182_v28 = vsub.f32 %v4754_v43, %v2160_v41  ;;  %v2177_v47 = vsub.f32 %v4774_v44, %v2145_v38  ;;  %v4834_v48 = vpop.xlane.xlu2 %2132 }
 0x556   :  { %v4829_v33 = vpop.eup %3715  ;;  %v2210_v25 = vmul.f32 1.442695, %v2182_v28  ;;  %v2200_v17 = vmul.f32 1.442695, %v2177_v47 }
 0x557   :  { %v2236_v15 = vsel %vm1073_vm1, %v4829_v33, 0.0 }
 0x558   :  { %3717 = vpow2.f32 %v2210_v25  ;;  %2237 = vadd.xlane.f32.xlu0 %v2236_v15 }
 0x559   :  { %3719 = vpow2.f32 %v2200_v17 }
 0x55a   :  { %3721 = vpow2.f32 %v2188_v19 }
 0x55b   :  { %v2151_v61 = vpop.xlane.xlu1 %2150  ;;  %v2163_v39 = vpop.xlane.xlu0 %2162 }
 0x55c   :  { %v2179_v41 = vsub.f32 %v4770_v20, %v2151_v61  ;;  %v2183_v22 = vsub.f32 %v4772_v51, %v2163_v39  ;;  %v2154_v25 = vpop.xlane.xlu2 %2153 }
 0x55d   :  { %v2180_v36 = vsub.f32 %v4786_v58, %v2154_v25 }
 0x55e   :  { %v4837_v38 = vpop.eup %3717  ;;  %v2204_v43 = vmul.f32 1.442695, %v2179_v41  ;;  %v2212_v47 = vmul.f32 1.442695, %v2183_v22 }
 0x55f   :  { %v4839_v28 = vpop.eup %3719  ;;  %v2254_v44 = vsel %vm1073_vm1, %v4837_v38, 0.0  ;;  %v2206_v15 = vmul.f32 1.442695, %v2180_v36 }
 0x560   :  { %2255 = vadd.xlane.f32.xlu0 %v2254_v44  ;;  %v2239_v29 = vsel %vm1073_vm1, %v4839_v28, 0.0  ;;  %3723 = vpow2.f32 %v2204_v43  ;;  %v4846_v20 = vpop.eup %3721 }
 0x561   :  { %2240 = vadd.xlane.f32.xlu1 %v2239_v29  ;;  %3725 = vpow2.f32 %v2212_v47  ;;  %v2221_v51 = vsel %vm1073_vm1, %v4846_v20, 0.0 }
 0x562   :  { %3727 = vpow2.f32 %v2206_v15 }
 0x563   :  { %v2166_v19 = vpop.xlane.xlu1 %2165 }
 0x564   :  { %v2184_v41 = vsub.f32 %v4788_v3, %v2166_v19  ;;  %v2169_v22 = vpop.xlane.xlu2 %2168 }
 0x565   :  { %v2185_v29 = vsub.f32 %v4799_v8, %v2169_v22 }
 0x566   :  { %v4848_v17 = vpop.eup %3723  ;;  %v2214_v58 = vmul.f32 1.442695, %v2184_v41 }
 0x567   :  { %v2245_v39 = vsel %vm1073_vm1, %v4848_v17, 0.0  ;;  %v4855_v61 = vpop.eup %3725  ;;  %v2216_v25 = vmul.f32 1.442695, %v2185_v29 }
 0x568   :  { %2246 = vadd.xlane.f32.xlu2 %v2245_v39  ;;  %v2257_v43 = vsel %vm1073_vm1, %v4855_v61, 0.0  ;;  %v4862_v44 = vpop.eup %3727  ;;  %3729 = vpow2.f32 %v2214_v58  ;;  %v2170_v58 = vsub.f32 %v4746_v59, %v4817_v60 }
 0x569   :  { %2222 = vadd.xlane.f32.xlu1 %v2221_v51  ;;  %v2248_v47 = vsel %vm1073_vm1, %v4862_v44, 0.0  ;;  %3731 = vpow2.f32 %v2216_v25  ;;  %v2157_v51 = vpop.xlane.xlu0 %2156 }
 0x56a   :  { %v2181_v41 = vsub.f32 %v4797_v18, %v2157_v51 }
 0x56c   :  { %v2208_v22 = vmul.f32 1.442695, %v2181_v41  ;;  %v2172_v41 = vsub.f32 %v4764_v35, %v4820_v46 }
 0x56e   :  { %v4869_v3 = vpop.eup %3729 }
 0x56f   :  { %v2260_v36 = vsel %vm1073_vm1, %v4869_v3, 0.0  ;;  %v4877_v8 = vpop.eup %3731 }
 0x570   :  { %v2263_v39 = vsel %vm1073_vm1, %v4877_v8, 0.0 }
 0x571   :  { %2258 = vadd.xlane.f32.xlu1 %v2257_v43 }
 0x574   :  { %2595 = vrot.lane.b32.xlu0 %v4516_v52, %s3889_s10  ;;  %v3856_v52 = vld [vmem:[%s6587_s3 + $0x20] sm:$0xff] }
 0x579   :  { %2249 = vadd.xlane.f32.xlu1 %v2248_v47 }
 0x57c   :  { %2521 = vrot.lane.b32.xlu0 %v4557_v27, %s3889_s10 }
 0x580   :  { %2556 = vrot.lane.b32.xlu2 %v3856_v52, %s3889_s10 }
 0x581   :  { %2261 = vadd.xlane.f32.xlu1 %v2260_v36  ;;  %v2186_v36 = vmul.f32 1.442695, %v2170_v58  ;;  %v4912_v58 = vld [vmem:[%s6589_s5] sm:$0xff] }
 0x589   :  { %2264 = vadd.xlane.f32.xlu1 %v2263_v39 }
 0x58a   :  { %v2232_v27 = vpop.xlane.xlu1 %2231 }
 0x58b   :  { %3733 = vrcp.f32 %v2232_v27 }
 0x591   :  { %v3734_v19 = vpop.eup %3733 }
 0x592   :  { %v2235_v15 = vpop.xlane.xlu1 %2234  ;;  %v2286_v43 = vmul.f32 %v3734_v19, %v4809_v26  ;;  %v3857_v26 = vld [vmem:[%s6589_s5 + $0x8] sm:$0xff] }
 0x593   :  { %3735 = vrcp.f32 %v2235_v15  ;;  %v2173_v15 = vsub.f32 %v4778_v49, %v4834_v48 }
 0x594   :  { %v2302_v47 = vpack.c.bf16 %v2286_v43, %v2286_v43  ;;  %3737 = vpow2.f32 %v2208_v22  ;;  %v2190_v43 = vmul.f32 1.442695, %v2172_v41 }
 0x595   :  { %3739 = vpow2.f32 %v2186_v36  ;;  %v2192_v59 = vmul.f32 1.442695, %v2173_v15 }
 0x596   :  { %v2359_v39 = vunpack.c.l.b16 %v2302_v47 }
 0x597   :  { %3741 = vpow2.f32 %v2192_v59 }
 0x598   :  { %3743 = vpow2.f32 %v2190_v43 }
 0x599   :  { %v3736_v29 = vpop.eup %3735 }
 0x59a   :  { %v2287_v25 = vmul.f32 %v3736_v29, %v4813_v34  ;;  %v4888_v51 = vpop.eup %3737 }
 0x59b   :  { %v2251_v34 = vsel %vm1073_vm1, %v4888_v51, 0.0  ;;  %v4897_v60 = vpop.eup %3739 }
 0x59c   :  { %v2303_v52 = vpack.c.bf16 %v2287_v25, %v2287_v25  ;;  %v2218_v49 = vsel %vm1073_vm1, %v4897_v60, 0.0 }
 0x59d   :  { %v4901_v48 = vpop.eup %3741 }
 0x59e   :  { %v2360_v27 = vunpack.c.l.b16 %v2303_v52  ;;  %v2227_v19 = vsel %vm1073_vm1, %v4901_v48, 0.0  ;;  %v4916_v22 = vpop.eup %3743 }
 0x5a0   :  { %v2363_v18 = vpack.c.b16 %v2360_v27, %v2359_v39 }
 0x5a2   :  { %3510 = vmatmul.msk.bf16.vlgmr.msrb.gmra.mxu1 %vm1073_vm1, %v2363_v18  ;;  %2326 = vrot.lane.b32.xlu1 %v3857_v26, %s3888_s23 }
 0x5a6   :  { %2252 = vadd.xlane.f32.xlu0 %v2251_v34 }
 0x5a9   :  { %2219 = vadd.xlane.f32.xlu2 %v2218_v49 }
 0x5b1   :  { %2228 = vadd.xlane.f32.xlu2 %v2227_v19 }
 0x5ba   :  { %2517 = vrot.lane.b32.xlu0 %v4566_v6, %s3889_s10  ;;  %v2224_v6 = vsel %vm1073_vm1, %v4916_v22, 0.0 }
 0x5c2   :  { %2324 = vrot.lane.b32.xlu0 %v4912_v58, %s3888_s23 }
 0x5c3   :  { %v2244_v35 = vpop.xlane.xlu1 %2243 }
 0x5c9   :  { %2484 = vrot.lane.b32.xlu2 %v4622_v40, %s3889_s10 }
 0x5ca   :  { %2558 = vrot.lane.b32.xlu0 %v4523_v42, %s3889_s10 }
 0x5cb   :  { %v2238_v46 = vpop.xlane.xlu0 %2237 }
 0x5cc   :  { %2225 = vadd.xlane.f32.xlu1 %v2224_v6  ;;  %3745 = vrcp.f32 %v2238_v46 }
 0x5d1   :  { %2920 = vrot.lane.b32.xlu2 %v4646_v7, %s3889_s10 }
 0x5d2   :  { %2597 = vrot.lane.b32.xlu0 %v4540_v21, %s3889_s10  ;;  %v3746_v47 = vpop.eup %3745 }
 0x5d3   :  { %v2288_v42 = vmul.f32 %v3746_v47, %v4829_v33  ;;  %v2256_v25 = vpop.xlane.xlu0 %2255 }
 0x5d4   :  { %v2241_v29 = vpop.xlane.xlu1 %2240 }
 0x5d5   :  { %3747 = vrcp.f32 %v2241_v29  ;;  %v2304_v7 = vpack.c.bf16 %v2288_v42, %v2288_v42 }
 0x5d6   :  { %3749 = vrcp.f32 %v2244_v35 }
 0x5d7   :  { %v2361_v15 = vunpack.c.l.b16 %v2304_v7 }
 0x5d9   :  { %2959 = vrot.lane.b32.xlu2 %v4653_v24, %s3889_s10 }
 0x5da   :  { %2519 = vrot.lane.b32.xlu0 %v4589_v37, %s3889_s10 }
 0x5db   :  { %v3748_v40 = vpop.eup %3747  ;;  %v2247_v21 = vpop.xlane.xlu2 %2246 }
 0x5dc   :  { %v4933_v36 = vpop.xlane.xlu1 %2222  ;;  %v2289_v52 = vmul.f32 %v3748_v40, %v4839_v28  ;;  %v3750_v39 = vpop.eup %3749  ;;  %3751 = vrcp.f32 %v2247_v21 }
 0x5dd   :  { %3753 = vrcp.f32 %v2256_v25  ;;  %v2290_v18 = vmul.f32 %v3750_v39, %v4823_v4 }
 0x5de   :  { %v2305_v27 = vpack.c.bf16 %v2289_v52, %v2289_v52  ;;  %v3859_v52 = vld [vmem:[%s6589_s5 + $0x18] sm:$0xff] }
 0x5df   :  { %v2306_v34 = vpack.c.bf16 %v2290_v18, %v2290_v18 }
 0x5e0   :  { %v2362_v33 = vunpack.c.l.b16 %v2305_v27 }
 0x5e1   :  { %2838 = vrot.lane.b32.xlu2 %v3857_v26, %s3889_s10 }
 0x5e2   :  { %2482 = vrot.lane.b32.xlu0 %v4597_v50, %s3889_s10  ;;  %v2364_v37 = vpack.c.b16 %v2362_v33, %v2361_v15  ;;  %v3752_v24 = vpop.eup %3751  ;;  %v2400_v50 = vunpack.c.l.b16 %v2306_v34 }
 0x5e3   :  { %v3754_v28 = vpop.eup %3753  ;;  %v2291_v49 = vmul.f32 %v3752_v24, %v4848_v17 }
 0x5e4   :  { %3511 = vmatmul.msk.bf16.gmra.mxu1 %vm1073_vm1, %v2364_v37  ;;  %v2259_v59 = vpop.xlane.xlu1 %2258  ;;  %v2294_v41 = vmul.f32 %v3754_v28, %v4837_v38  ;;  %v92_v28 = vld [vmem:[%s6584_s0] sm:$0xff] }
 0x5e5   :  { %3755 = vrcp.f32 %v2259_v59  ;;  %2918 = vrot.lane.b32.xlu1 %v4629_v0, %s3889_s10  ;;  %v2307_v4 = vpack.c.bf16 %v2291_v49, %v2291_v49  ;;  %v3890_v59 = vmov 0  }
 0x5e6   :  { %v2596_v19 = vpop.permute.xlu0 %2595  ;;  %v2310_v35 = vpack.c.bf16 %v2294_v41, %v2294_v41  ;;  %3568 = vset.pattern.permute.xlu1 %v3890_v59  ;;  %3569 = vset.pattern.permute.xlu2 %v3890_v59 }
 0x5e7   :  { %v2401_v43 = vunpack.c.l.b16 %v2307_v4  ;;  %3570 = vset.pattern.permute.xlu0 %v3890_v59 }
 0x5e8   :  { %v2441_v42 = vunpack.c.l.b16 %v2310_v35 }
 0x5e9   :  { %v2404_v6 = vpack.c.b16 %v2401_v43, %v2400_v50  ;;  %v95_v43 = vld [vmem:[%s6584_s0 + $0x18] sm:$0xff] }
 0x5ea   :  { %2478 = vrot.lane.b32.xlu0 %v4615_v2, %s3889_s10 }
 0x5eb   :  { %v3756_v26 = vpop.eup %3755  ;;  %3512 = vmatmul.msk.bf16.vlgmr.msrb.gmra.mxu2 %vm1073_vm1, %v2404_v6 }
 0x5ec   :  { %v2295_v46 = vmul.f32 %v3756_v26, %v4855_v61  ;;  %v2250_v29 = vpop.xlane.xlu1 %2249 }
 0x5ed   :  { %99 = vperm.xlu1 %3568, %v92_v28  }
 0x5ee   :  { %v2311_v17 = vpack.c.bf16 %v2295_v46, %v2295_v46  ;;  %v2522_v47 = vpop.permute.xlu0 %2521 }
 0x5ef   :  { %v2532_v0 = vsel %vm888_vm0, %v2522_v47, 0  ;;  %v93_v47 = vld [vmem:[%s6584_s0 + $0x8] sm:$0xff] }
 0x5f0   :  { %v2442_v40 = vunpack.c.l.b16 %v2311_v17  ;;  %2544 = vmatpush.bf16.xpose.msra.mxu1 %v2532_v0  ;;  %104 = vperm.xlu2 %3569, %v93_v47   ;;  %v26_v47 = vld [vmem:[%s6589_s5 + $0x4] sm:$0xff]  }
 0x5f2   :  { %v2445_v38 = vpack.c.b16 %v2442_v40, %v2441_v42  ;;  %2480 = vrot.lane.b32.xlu0 %v4639_v1, %s3889_s10 }
 0x5f4   :  { %3514 = vmatmul.msk.bf16.vlgmr.msrb.gmra.mxu3 %vm1073_vm1, %v2445_v38  ;;  %v2262_v2 = vpop.xlane.xlu1 %2261 }
 0x5f5   :  { %3757 = vrcp.f32 %v2262_v2  ;;  %114 = vperm.xlu1 %3568, %v95_v43   ;;  %v3337_v2 = vld [vmem:[%s6584_s0 + $0x40] sm:$0xff]  ;;  %v3340_v43 = vld [vmem:[%s6584_s0 + $0x58] sm:$0xff] }
 0x5fa   :  { %2961 = vrot.lane.b32.xlu0 %v4605_v12, %s3889_s10  ;;  %v3860_v12 = vld [vmem:[%s6589_s5 + $0x10] sm:$0xff] }
 0x5fb   :  { %v3758_v25 = vpop.eup %3757 }
 0x5fc   :  { %v2265_v61 = vpop.xlane.xlu1 %2264  ;;  %v2296_v21 = vmul.f32 %v3758_v25, %v4869_v3  ;;  %v94_v25 = vld [vmem:[%s6584_s0 + $0x10] sm:$0xff] }
 0x5fd   :  { %3759 = vrcp.f32 %v2265_v61  ;;  %109 = vperm.xlu2 %3569, %v94_v25   ;;  %v5066_v25 = vld [vmem:[%s6585_s1] ss:$0 sm:$0xff] }
 0x5fe   :  { %v2312_v39 = vpack.c.bf16 %v2296_v21, %v2296_v21  ;;  %3761 = vrcp.f32 %v2250_v29 }
 0x600   :  { %v2443_v15 = vunpack.c.l.b16 %v2312_v39 }
 0x602   :  { %2879 = vrot.lane.b32.xlu0 %v3859_v52, %s3889_s10  ;;  %v3339_v52 = vld [vmem:[%s6584_s0 + $0x50] sm:$0xff] }
 0x603   :  { %v3760_v7 = vpop.eup %3759 }
 0x604   :  { %v2297_v1 = vmul.f32 %v3760_v7, %v4877_v8  ;;  %v2557_v8 = vpop.permute.xlu2 %2556  ;;  %v3762_v24 = vpop.eup %3761 }
 0x605   :  { %v2292_v34 = vmul.f32 %v3762_v24, %v4862_v44  ;;  %v3335_v24 = vld [vmem:[%s6584_s0 + $0x38] sm:$0xff] }
 0x606   :  { %v2313_v27 = vpack.c.bf16 %v2297_v1, %v2297_v1  ;;  %v3332_v1 = vld [vmem:[%s6584_s0 + $0x20] sm:$0xff] }
 0x607   :  { %v2308_v41 = vpack.c.bf16 %v2292_v34, %v2292_v34  ;;  %198 = vperm.xlu2 %3569, %v3332_v1   ;;  %v3344_v34 = vld [vmem:[%s6584_s0 + $0x70] sm:$0xff] }
 0x608   :  { %v2444_v33 = vunpack.c.l.b16 %v2313_v27 }
 0x609   :  { %v2402_v26 = vunpack.c.l.b16 %v2308_v41 }
 0x60a   :  { %v2446_v18 = vpack.c.b16 %v2444_v33, %v2443_v15  ;;  %2877 = vrot.lane.b32.xlu0 %v3860_v12, %s3889_s10  ;;  %v3342_v33 = vld [vmem:[%s6584_s0 + $0x60] sm:$0xff]  ;;  %v3334_v12 = vld [vmem:[%s6584_s0 + $0x30] sm:$0xff] }
 0x60c   :  { %3515 = vmatmul.msk.bf16.gmra.mxu3 %vm1073_vm1, %v2446_v18 }
 0x60f   :  { %208 = vperm.xlu2 %3569, %v3334_v12  }
 0x612   :  { %2836 = vrot.lane.b32.xlu0 %v4912_v58, %s3889_s10  ;;  %s3320_s10 = sshll.u32 %s6590_s6, 4  ;;  %s3321_s10 = int_to_ptr.hbm [resolvable:$true] %s3320_s10 }
 0x614   :  { %v2327_v3 = vpop.permute.xlu1 %2326 }
 0x615   :  { %2342 = vmatpush.bf16.msrb.mxu0 %v2327_v3 }
 0x619   :  { %v2253_v37 = vpop.xlane.xlu0 %2252 }
 0x61a   :  { %3763 = vrcp.f32 %v2253_v37  ;;  %213 = vperm.xlu0 %3570, %v3335_v24  }
 0x61c   :  { %3522 = vmatmul.msk.bf16.vlgmr.msra.gmra.mxu3 %vm888_vm0, %v2596_v19  ;;  %v2220_v58 = vpop.xlane.xlu2 %2219 }
 0x61d   :  { %3765 = vrcp.f32 %v2220_v58 }
 0x61e   :  { %3767 = vrcp.f32 %v4933_v36 }
 0x620   :  { %v3764_v49 = vpop.eup %3763 }
 0x621   :  { %v2293_v4 = vmul.f32 %v3764_v49, %v4888_v51  ;;  %v3333_v51 = vld [vmem:[%s6584_s0 + $0x28] sm:$0xff] }
 0x622   :  { %203 = vperm.xlu1 %3568, %v3333_v51   ;;  %v3338_v49 = vld [vmem:[%s6584_s0 + $0x48] sm:$0xff]  ;;  %v5041_v51 = vpop.f32.mrf.mxu1 }
 0x623   :  { %v2309_v50 = vpack.c.bf16 %v2293_v4, %v2293_v4  ;;  %v3766_v6 = vpop.eup %3765  ;;  %302 = vperm.xlu2 %3569, %v3338_v49   ;;  %v3347_v4 = vld [vmem:[%s6584_s0 + $0x80] sm:$0xff]  ;;  %6689 = vst [vmem:[#allocation35_spill] sm:$0xff] %v5041_v51  ;;  %v28_v49 = vld [vmem:[%s6589_s5 + $0xc] sm:$0xf] }
 0x624   :  { %v2229_v44 = vpop.xlane.xlu2 %2228  ;;  %v3768_v46 = vpop.eup %3767  ;;  %v2282_v29 = vmul.f32 %v3766_v6, %v4897_v60  ;;  %v3345_v6 = vld [vmem:[%s6584_s0 + $0x78] sm:$0xff] }
 0x625   :  { %v2403_v19 = vunpack.c.l.b16 %v2309_v50  ;;  %v2283_v36 = vmul.f32 %v3768_v46, %v4846_v20  ;;  %3769 = vrcp.f32 %v2229_v44 }
 0x626   :  { %v2298_v0 = vpack.c.bf16 %v2282_v29, %v2282_v29 }
 0x627   :  { %v2405_v35 = vpack.c.b16 %v2403_v19, %v2402_v26  ;;  %v2299_v42 = vpack.c.bf16 %v2283_v36, %v2283_v36  ;;  %v3343_v19 = vld [vmem:[%s6584_s0 + $0x68] sm:$0xff] }
 0x628   :  { %v2318_v38 = vunpack.c.l.b16 %v2298_v0  ;;  %v29_v0 = vld [vmem:[%s6589_s5 + $0x10] sm:$0xff]  }
 0x629   :  { %3513 = vmatmul.msk.bf16.gmra.mxu2 %vm1073_vm1, %v2405_v35  ;;  %v2319_v20 = vunpack.c.l.b16 %v2299_v42  ;;  %v33_v42 = vld [vmem:[%s6589_s5 + $0x20] sm:$0xff]  }
 0x62a   :  { %297 = vperm.xlu1 %3568, %v3337_v2   ;;  %v5057_v2 = vunpack.c.l.bf16 %v29_v0  ;;  %v5082_v12 = vpop.f32.mrf.mxu1 }
 0x62b   :  { %v2322_v21 = vpack.c.b16 %v2319_v20, %v2318_v38  ;;  %v3770_v27 = vpop.eup %3769  ;;  %312 = vperm.xlu2 %3569, %v3340_v43   ;;  %v37_v38 = vld [vmem:[%s6589_s5 + $0x30] sm:$0xff]   ;;  %v5059_v20 = vunpack.c.h.bf16 %v29_v0  ;;  %6693 = vst [vmem:[#allocation39_spill] sm:$0xff] %v5082_v12  ;;  %v5136_v0 = vunpack.c.h.bf16 %v26_v47 }
 0x62c   :  { %v2518_v17 = vpop.permute.xlu0 %2517  ;;  %v2485_v40 = vpop.permute.xlu2 %2484  ;;  %v2285_v15 = vmul.f32 %v3770_v27, %v4901_v48  ;;  %6690 = vst [vmem:[#allocation36_spill] sm:$0xff] %v5057_v2 }
 0x62d   :  { %3518 = vmatmul.msk.bf16.vlgmr.msra.gmra.mxu1 %vm888_vm0, %v2518_v17  ;;  %v2496_v60 = vsel %vm888_vm0, %v2485_v40, 0  ;;  %v73_v40 = vlaneseq  ;;  %v161_v56 = vrot.slane %v5059_v20, 4 }
 0x62e   :  { %v2301_v37 = vpack.c.bf16 %v2285_v15, %v2285_v15  ;;  %v61_v15 = vrot.slane %v5057_v2, 3 }
 0x62f   :  { %v5074_v1 = vshrl.u32 %v73_v40, 7 }
 0x630   :  { %v2321_v28 = vunpack.c.l.b16 %v2301_v37 }
 0x631   :  { %vm75_vm2 = vcmp.lt.s32.totalorder %v5074_v1, 5  ;;  %vm172_vm3 = vcmp.lt.s32.totalorder %v5074_v1, 4  ;;  %vm271_vm4 = vcmp.lt.s32.totalorder %v5074_v1, 3  ;;  %vm370_vm5 = vcmp.lt.s32.totalorder %v5074_v1, 1 }
 0x632   :  { %307 = vperm.xlu1 %3568, %v3339_v52   ;;  %v5070_v52 = vunpack.c.l.bf16 %v37_v38  ;;  %vm535_vm6 = vcmp.lt.s32.totalorder %v5074_v1, 7 }
 0x633   :  { %401 = vperm.xlu2 %3569, %v3343_v19   ;;  %v40_v19 = vld [vmem:[%s6589_s5 + $0x38] sm:$0xff]  }
 0x634   :  { %v2325_v61 = vpop.permute.xlu0 %2324  ;;  %v2921_v44 = vpop.permute.xlu2 %2920  ;;  %6692 = vst [vmem:[#allocation38_spill] sm:$0xff] %v5070_v52  ;;  %v5149_v53 = vunpack.c.l.bf16 %v40_v19 }
 0x635   :  { %2343 = vmatpush.bf16.msrb.mxu0 %v2325_v61  ;;  %2936 = vmatpush.bf16.msrb.mxu2 %v2921_v44  ;;  %v5061_v61 = vunpack.c.l.bf16 %v33_v42 }
 0x637   :  { %6691 = vst [vmem:[#allocation37_spill] sm:$0xff] %v5061_v61 }
 0x638   :  { %3508 = vmatmul.msk.bf16.vlgmr.msrb.gmra.mxu0 %vm1073_vm1, %v2322_v21  ;;  %v5068_v21 = vunpack.c.h.bf16 %v33_v42 }
 0x639   :  { %2504 = vmatpush.bf16.xpose.msra.mxu0 %v2496_v60  ;;  %3520 = vmatmul.msk.bf16.vlgmr.msra.gmra.mxu2 %vm888_vm0, %v2557_v8  ;;  %v5055_v60 = vunpack.c.l.bf16 %v26_v47  ;;  %v59_v47 = vrot.slane %v5136_v0, 3 }
 0x63a   :  { %396 = vperm.xlu1 %3568, %v3342_v33   ;;  %v62_v33 = vrot.slane %v5059_v20, 3  ;;  %v264_v5 = vrot.slane %v5068_v21, 5 }
 0x63b   :  { %411 = vperm.xlu2 %3569, %v3345_v6  }
 0x63c   :  { %v2559_v7 = vpop.permute.xlu0 %2558  ;;  %v5039_v46 = vpop.permute.xlu2 %2959  ;;  %v5091_v24 = vsel %vm75_vm2, %v61_v15, %v62_v33 }
 0x63d   :  { %6694 = vst [vmem:[#allocation40_spill] sm:$0xff] %v5091_v24 }
 0x63f   :  { %v2226_v39 = vpop.xlane.xlu1 %2225 }
 0x640   :  { %3771 = vrcp.f32 %v2226_v39  ;;  %v25_v39 = vld [vmem:[%s6589_s5] sm:$0xf] }
 0x642   :  { %406 = vperm.xlu1 %3568, %v3344_v34  }
 0x644   :  { %v2598_v18 = vpop.permute.xlu0 %2597  ;;  %v2839_v29 = vpop.permute.xlu2 %2838 }
 0x645   :  { %3523 = vmatmul.msk.bf16.gmra.mxu3 %vm888_vm0, %v2598_v18  ;;  %v65_v18 = vrot.slane %v5061_v61, 3 }
 0x646   :  { %v3772_v3 = vpop.eup %3771 }
 0x647   :  { %v2284_v8 = vmul.f32 %v3772_v3, %v4916_v22  ;;  %v66_v3 = vrot.slane %v5068_v21, 3 }
 0x649   :  { %3521 = vmatmul.msk.bf16.gmra.mxu2 %vm888_vm0, %v2559_v7  ;;  %v2300_v48 = vpack.c.bf16 %v2284_v8, %v2284_v8  ;;  %v5072_v7 = vunpack.c.h.bf16 %v37_v38  ;;  %v69_v8 = vrot.slane %v5070_v52, 3 }
 0x64a   :  { %462 = vperm.xlu1 %3568, %v3347_v4   ;;  %v32_v4 = vld [vmem:[%s6589_s5 + $0x18] sm:$0xff]  }
 0x64b   :  { %v2320_v59 = vunpack.c.l.b16 %v2300_v48  ;;  %v70_v37 = vrot.slane %v5072_v7, 3  ;;  %v58_v48 = vrot.slane %v5055_v60, 3  ;;  %v5126_v44 = vunpack.c.h.bf16 %v32_v4 }
 0x64c   :  { %v2520_v58 = vpop.permute.xlu0 %2519  ;;  %v105_v17 = vpop.permute.xlu2 %104  ;;  %v5138_v42 = vunpack.c.l.bf16 %v32_v4  ;;  %v169_v62 = vrot.slane %v5072_v7, 4 }
 0x64d   :  { %3519 = vmatmul.msk.bf16.gmra.mxu1 %vm888_vm0, %v2520_v58  ;;  %v2323_v22 = vpack.c.b16 %v2321_v28, %v2320_v59  ;;  %v5093_v59 = vunpack.c.l.bf16 %v25_v39  ;;  %v121_v28 = vmul.f32 %v5066_v25, %v105_v17  ;;  %v5098_v58 = vsel %vm75_vm2, %v69_v8, %v70_v37  ;;  %6697 = vst [vmem:[#allocation43_spill] sm:$0xff] %v5126_v44 }
 0x64e   :  { %6695 = vst [vmem:[#allocation41_spill] sm:$0xff] %v5098_v58  ;;  %v63_v4 = vrot.slane %v5138_v42, 3 }
 0x64f   :  { %3509 = vmatmul.msk.bf16.gmra.mxu0 %vm1073_vm1, %v2323_v22  ;;  %v5102_v22 = vsel %vm75_vm2, %v65_v18, %v66_v3  ;;  %v5115_v43 = vmul.f32 %v121_v28, %v5091_v24  ;;  %v5143_v38 = vmul.f32 %v121_v28, %v5098_v58 }
 0x650   :  { %6696 = vst [vmem:[#allocation42_spill] sm:$0xff] %v5102_v22  ;;  %v5182_v30 = vsel %vm75_vm2, %v62_v33, %v63_v4 }
 0x651   :  { %6704 = vst [vmem:[#allocation50_spill] sm:$0xff] %v5182_v30 }
 0x654   :  { %v2483_v41 = vpop.permute.xlu0 %2482 }
 0x655   :  { %v2493_v50 = vsel %vm888_vm0, %v2483_v41, 0  ;;  %v36_v41 = vld [vmem:[%s6589_s5 + $0x28] sm:$0xff]  }
 0x656   :  { %2505 = vmatpush.bf16.xpose.msra.mxu0 %v2493_v50  ;;  %v57_v50 = vrot.slane %v5093_v59, 3  ;;  %v5140_v40 = vunpack.c.l.bf16 %v36_v41 }
 0x657   :  { %v2919_v36 = vpop.permute.xlu1 %2918  ;;  %v110_v34 = vpop.permute.xlu2 %109 }
 0x658   :  { %2937 = vmatpush.bf16.msrb.mxu2 %v2919_v36  ;;  %v5130_v36 = vunpack.c.h.bf16 %v40_v19  ;;  %v5134_v17 = vsel %vm75_vm2, %v57_v50, %v58_v48  ;;  %v67_v19 = vrot.slane %v5140_v40, 3 }
 0x659   :  { %6698 = vst [vmem:[#allocation44_spill] sm:$0xff] %v5134_v17  ;;  %v5169_v13 = vmul.f32 %v121_v28, %v5134_v17 }
 0x65a   :  { %v72_v57 = vrot.slane %v5130_v36, 3  ;;  %v6718_v12 = vrot.slane %v5130_v36, 4 }
 0x65c   :  { %v2479_v26 = vpop.permute.xlu0 %2478  ;;  %v5173_v16 = vsel %vm75_vm2, %v72_v57, %v57_v50  ;;  %v5190_v50 = vsel %vm75_vm2, %v58_v48, %v59_v47 }
 0x65d   :  { %6703 = vst [vmem:[#allocation49_spill] sm:$0xff] %v5173_v16 }
 0x65e   :  { %2854 = vmatpush.bf16.msrb.mxu0 %v2839_v29  ;;  %v5128_v29 = vunpack.c.h.bf16 %v36_v41  ;;  %6706 = vst [vmem:[#allocation52_spill] sm:$0xff] %v5190_v50 }
 0x65f   :  { %3516 = vmatmul.msk.bf16.vlgmr.msra.gmra.mxu0 %vm888_vm0, %v2479_v26  ;;  %v100_v27 = vpop.permute.xlu1 %99  ;;  %v5118_v26 = vmul.f32 %v121_v28, %v5102_v22  ;;  %v5186_v28 = vsel %vm75_vm2, %v66_v3, %v67_v19 }
 0x660   :  { %v120_v6 = vmul.f32 %v5066_v25, %v100_v27  ;;  %v64_v27 = vrot.slane %v5126_v44, 3  ;;  %6705 = vst [vmem:[#allocation51_spill] sm:$0xff] %v5186_v28 }
 0x661   :  { %v5153_v41 = vpop.f32.mrf.mxu1 }
 0x662   :  { %6699 = vst [vmem:[#allocation45_spill] sm:$0xff] %v5153_v41  ;;  %v5161_v22 = vsel %vm75_vm2, %v64_v27, %v65_v18  ;;  %v124_v18 = vmul.f32 %v120_v6, %v5173_v16 }
 0x663   :  { %6701 = vst [vmem:[#allocation47_spill] sm:$0xff] %v5161_v22  ;;  %v132_v11 = vmul.f32 %v120_v6, %v5161_v22  ;;  %v122_v22 = vmul.f32 %v5066_v25, %v110_v34 }
 0x664   :  { %v2481_v35 = vpop.permute.xlu0 %2480 }
 0x667   :  { %v115_v63 = vpop.permute.xlu1 %114 }
 0x668   :  { %v5210_v48 = vmul.f32 %v5066_v25, %v115_v63 }
 0x669   :  { %v5268_v17 = vpop.f32.mrf.mxu1 }
 0x66a   :  { %6715 = vst [vmem:[#allocation60_spill] sm:$0xff] %v5268_v17 }
 0x66c   :  { %v2962_v34 = vpop.permute.xlu0 %2961 }
 0x66d   :  { %2977 = vmatpush.bf16.msrb.mxu3 %v2962_v34  ;;  %v164_v34 = vrot.slane %v5061_v61, 4 }
 0x66f   :  { %3517 = vmatmul.msk.bf16.gmra.mxu0 %vm888_vm0, %v2481_v35  ;;  %v5124_v35 = vunpack.c.l.bf16 %v28_v49  ;;  %v68_v49 = vrot.slane %v5128_v29, 3 }
 0x671   :  { %v60_v39 = vrot.slane %v5124_v35, 3  ;;  %v5157_v58 = vsel %vm75_vm2, %v68_v49, %v69_v8  ;;  %v5195_v16 = vsel %vm75_vm2, %v67_v19, %v68_v49  ;;  %v5213_v49 = vmul.f32 %v122_v22, %v5190_v50  ;;  %2978 = vmatpush.bf16.msrb.mxu3 %v5039_v46 }
 0x672   :  { %6700 = vst [vmem:[#allocation46_spill] sm:$0xff] %v5157_v58  ;;  %v136_v32 = vmul.f32 %v120_v6, %v5157_v58  ;;  %v5216_v19 = vmul.f32 %v122_v22, %v5182_v30  ;;  %v5234_v25 = vmul.f32 %v5210_v48, %v5195_v16  ;;  %v168_v30 = vrot.slane %v5070_v52, 4 }
 0x673   :  { %v5165_v24 = vsel %vm75_vm2, %v60_v39, %v61_v15  ;;  %v71_v15 = vrot.slane %v5149_v53, 3  ;;  %6707 = vst [vmem:[#allocation53_spill] sm:$0xff] %v5195_v16  ;;  %v5207_v3 = vsel %vm75_vm2, %v59_v47, %v60_v39  ;;  %v5226_v39 = vmul.f32 %v122_v22, %v5186_v28 }
 0x674   :  { %6702 = vst [vmem:[#allocation48_spill] sm:$0xff] %v5165_v24  ;;  %v128_v8 = vmul.f32 %v120_v6, %v5165_v24  ;;  %v199_v6 = vpop.permute.xlu2 %198  ;;  %v5230_v63 = vmul.f32 %v5210_v48, %v5207_v3  ;;  %v5247_v24 = vld [vmem:[%s6585_s1 + $0x1] ss:$0 sm:$0xff]  ;;  %v156_v28 = vrot.slane %v5093_v59, 4  ;;  %v157_v50 = vrot.slane %v5055_v60, 4 }
 0x675   :  { %v5199_v58 = vsel %vm75_vm2, %v70_v37, %v71_v15  ;;  %v5203_v33 = vsel %vm75_vm2, %v71_v15, %v72_v57  ;;  %6710 = vst [vmem:[#allocation56_spill] sm:$0xff] %v5207_v3  ;;  %v5223_v57 = vsel %vm75_vm2, %v63_v4, %v64_v27  ;;  %v160_v4 = vrot.slane %v5057_v2, 4 }
 0x676   :  { %6708 = vst [vmem:[#allocation54_spill] sm:$0xff] %v5199_v58  ;;  %v5219_v37 = vmul.f32 %v122_v22, %v5199_v58  ;;  %v5238_v47 = vmul.f32 %v5210_v48, %v5203_v33  ;;  %v6605_v22 = vrot.slane %v5126_v44, 4  ;;  %v219_v3 = vmul.f32 %v5247_v24, %v199_v6 }
 0x677   :  { %6709 = vst [vmem:[#allocation55_spill] sm:$0xff] %v5203_v33  ;;  %v6713_v33 = vrot.slane %v5124_v35, 4  ;;  %v6716_v58 = vrot.slane %v5128_v29, 4  ;;  %v5283_v6 = vsel %vm172_vm3, %v6718_v12, %v156_v28  ;;  %v5296_v54 = vsel %vm172_vm3, %v160_v4, %v161_v56  ;;  %v2880_v12 = vpop.permute.xlu0 %2879 }
 0x678   :  { %6711 = vst [vmem:[#allocation57_spill] sm:$0xff] %v5223_v57  ;;  %v5257_v27 = vsel %vm172_vm3, %v6605_v22, %v164_v34  ;;  %2895 = vmatpush.bf16.msrb.mxu1 %v2880_v12 }
 0x679   :  { %6712 = vst [vmem:[#allocation58_spill] sm:$0xff] %v5257_v27  ;;  %v5263_v16 = vsel %vm172_vm3, %v6713_v33, %v160_v4  ;;  %v5274_v22 = vsel %vm172_vm3, %v6716_v58, %v168_v30  ;;  %v165_v33 = vrot.slane %v5068_v21, 4  ;;  %v231_v17 = vmul.f32 %v219_v3, %v5257_v27 }
 0x67a   :  { %6714 = vst [vmem:[#allocation59_spill] sm:$0xff] %v5263_v16  ;;  %v227_v46 = vmul.f32 %v219_v3, %v5263_v16  ;;  %v235_v14 = vmul.f32 %v219_v3, %v5274_v22  ;;  %v223_v58 = vmul.f32 %v219_v3, %v5283_v6  ;;  %v5306_v3 = vsel %vm172_vm3, %v156_v28, %v157_v50 }
 0x67b   :  { %6717 = vst [vmem:[#allocation61_spill] sm:$0xff] %v5274_v22  ;;  %v5292_v51 = vsel %vm172_vm3, %v164_v34, %v165_v33  ;;  %v5300_v16 = vadd.f32 %v231_v17, %v132_v11  ;;  %v5312_v34 = vsel %vm172_vm3, %v168_v30, %v169_v62  ;;  %v6611_v17 = vrot.slane %v5149_v53, 4 }
 0x67c   :  { %6719 = vst [vmem:[#allocation62_spill] sm:$0xff] %v5283_v6  ;;  %v5298_v10 = vadd.f32 %v227_v46, %v128_v8  ;;  %v5302_v27 = vadd.f32 %v235_v14, %v136_v32  ;;  %v209_v22 = vpop.permute.xlu2 %208  ;;  %v5308_v6 = vadd.f32 %v223_v58, %v124_v18  ;;  %v6614_v8 = vrot.slane %v5136_v0, 4 }
 0x67d   :  { %6720 = vst [vmem:[#allocation63_spill] sm:$0xff] %v5292_v51  ;;  %v6613_v14 = vrot.slane %v5138_v42, 4  ;;  %v6612_v32 = vrot.slane %v5140_v40, 4  ;;  %v221_v28 = vmul.f32 %v5247_v24, %v209_v22 }
 0x67e   :  { %6721 = vst [vmem:[#allocation64_spill] sm:$0xff] %v5296_v54 }
 0x67f   :  { %6722 = vst [vmem:[#allocation65_spill] sm:$0xff] %v5306_v3  ;;  %v5334_v12 = vsel %vm172_vm3, %v165_v33, %v6612_v32  ;;  %v5340_v22 = vsel %vm172_vm3, %v161_v56, %v6613_v14 }
 0x680   :  { %6723 = vst [vmem:[#allocation66_spill] sm:$0xff] %v5312_v34 }
 0x681   :  { %6725 = vst [vmem:[#allocation68_spill] sm:$0xff] %v5334_v12 }
 0x682   :  { %6726 = vst [vmem:[#allocation69_spill] sm:$0xff] %v5340_v22 }
 0x694   :  { %v204_v15 = vpop.permute.xlu1 %203 }
 0x695   :  { %v220_v4 = vmul.f32 %v5247_v24, %v204_v15  ;;  %v5328_v15 = vsel %vm172_vm3, %v169_v62, %v6611_v17 }
 0x696   :  { %6724 = vst [vmem:[#allocation67_spill] sm:$0xff] %v5328_v15 }
 0x697   :  { %v224_v18 = vmul.f32 %v220_v4, %v5306_v3  ;;  %v228_v46 = vmul.f32 %v220_v4, %v5296_v54  ;;  %v232_v30 = vmul.f32 %v220_v4, %v5292_v51  ;;  %v236_v58 = vmul.f32 %v220_v4, %v5312_v34 }
 0x698   :  { %v5346_v4 = vsel %vm172_vm3, %v157_v50, %v6614_v8  ;;  %v229_v8 = vmul.f32 %v221_v28, %v5340_v22  ;;  %v233_v34 = vmul.f32 %v221_v28, %v5334_v12  ;;  %v266_v51 = vrot.slane %v5128_v29, 5 }
 0x699   :  { %6727 = vst [vmem:[#allocation70_spill] sm:$0xff] %v5346_v4  ;;  %v5351_v17 = vadd.f32 %v224_v18, %v5169_v13  ;;  %v5354_v33 = vadd.f32 %v228_v46, %v5115_v43  ;;  %v5357_v32 = vadd.f32 %v232_v30, %v5118_v26  ;;  %v5360_v56 = vadd.f32 %v236_v58, %v5143_v38  ;;  %v2878_v38 = vpop.permute.xlu0 %2877 }
 0x69a   :  { %v225_v50 = vmul.f32 %v221_v28, %v5346_v4  ;;  %v237_v13 = vmul.f32 %v221_v28, %v5328_v15  ;;  %v259_v26 = vrot.slane %v5057_v2, 5  ;;  %v262_v18 = vrot.slane %v5126_v44, 5  ;;  %v3573_v28 = vld [vmem:[%s6585_s1 + $0x2] ss:$0 sm:$0xff]  ;;  %2896 = vmatpush.bf16.msrb.mxu1 %v2878_v38 }
 0x69b   :  { %v5375_v30 = vadd.f32 %v229_v8, %v5216_v19  ;;  %v5378_v58 = vadd.f32 %v233_v34, %v5226_v39  ;;  %v270_v19 = vrot.slane %v5130_v36, 5  ;;  %v255_v39 = vrot.slane %v5093_v59, 5 }
 0x69c   :  { %v298_v11 = vpop.permute.xlu1 %297  ;;  %v5372_v46 = vadd.f32 %v225_v50, %v5213_v49  ;;  %v5385_v43 = vadd.f32 %v237_v13, %v5219_v37  ;;  %v267_v49 = vrot.slane %v5070_v52, 5  ;;  %v256_v8 = vrot.slane %v5055_v60, 5  ;;  %v303_v50 = vpop.permute.xlu2 %302 }
 0x69d   :  { %v318_v34 = vmul.f32 %v3573_v28, %v298_v11  ;;  %v6730_v13 = vrot.slane %v5124_v35, 5  ;;  %v260_v3 = vrot.slane %v5059_v20, 5  ;;  %v5410_v12 = vsel %vm271_vm4, %v270_v19, %v255_v39 }
 0x69e   :  { %v5395_v38 = vsel %vm271_vm4, %v266_v51, %v267_v49  ;;  %6732 = vst [vmem:[#allocation74_spill] sm:$0xff] %v5410_v12 }
 0x69f   :  { %6728 = vst [vmem:[#allocation71_spill] sm:$0xff] %v5395_v38  ;;  %v5405_v54 = vsel %vm271_vm4, %v6730_v13, %v259_v26  ;;  %v334_v4 = vmul.f32 %v318_v34, %v5395_v38  ;;  %v322_v31 = vmul.f32 %v318_v34, %v5410_v12  ;;  %v268_v13 = vrot.slane %v5072_v7, 5 }
 0x6a0   :  { %6731 = vst [vmem:[#allocation73_spill] sm:$0xff] %v5405_v54  ;;  %v326_v22 = vmul.f32 %v318_v34, %v5405_v54  ;;  %v5420_v55 = vsel %vm271_vm4, %v259_v26, %v260_v3 }
 0x6a1   :  { %6733 = vst [vmem:[#allocation75_spill] sm:$0xff] %v5420_v55  ;;  %v5429_v54 = vadd.f32 %v334_v4, %v5302_v27  ;;  %v5436_v38 = vadd.f32 %v322_v31, %v5308_v6  ;;  %v5440_v26 = vsel %vm271_vm4, %v267_v49, %v268_v13  ;;  %v257_v27 = vrot.slane %v5136_v0, 5  ;;  %v5450_v31 = vpop.f32.mrf.mxu2 }
 0x6a2   :  { %v5423_v41 = vadd.f32 %v326_v22, %v5298_v10  ;;  %6735 = vst [vmem:[#allocation77_spill] sm:$0xff] %v5440_v26  ;;  %v261_v22 = vrot.slane %v5138_v42, 5  ;;  %v265_v4 = vrot.slane %v5140_v40, 5 }
 0x6a4   :  { %v308_v11 = vpop.permute.xlu1 %307  ;;  %v5462_v12 = vsel %vm271_vm4, %v264_v5, %v265_v4 }
 0x6a5   :  { %6738 = vst [vmem:[#allocation80_spill] sm:$0xff] %v5462_v12 }
 0x6aa   :  { %v5348_v62 = vpop.f32.mrf.mxu1 }
 0x6ab   :  { %v2646_v14 = vsel %vm1073_vm1, %v5348_v62, -inf }
 0x6ac   :  { %2647 = vmax.xlane.f32.xlu1 %v2646_v14  ;;  %v263_v14 = vrot.slane %v5061_v61, 5 }
 0x6ae   :  { %v5399_v37 = vsel %vm271_vm4, %v262_v18, %v263_v14  ;;  %v5444_v10 = vsel %vm271_vm4, %v263_v14, %v264_v5 }
 0x6af   :  { %6729 = vst [vmem:[#allocation72_spill] sm:$0xff] %v5399_v37  ;;  %v330_v15 = vmul.f32 %v318_v34, %v5399_v37  ;;  %v5433_v34 = vsel %vm271_vm4, %v255_v39, %v256_v8  ;;  %v269_v39 = vrot.slane %v5149_v53, 5 }
 0x6b0   :  { %6734 = vst [vmem:[#allocation76_spill] sm:$0xff] %v5433_v34 }
 0x6b1   :  { %v5426_v9 = vadd.f32 %v330_v15, %v5300_v16  ;;  %6736 = vst [vmem:[#allocation78_spill] sm:$0xff] %v5444_v10  ;;  %v319_v16 = vmul.f32 %v3573_v28, %v303_v50  ;;  %v2837_v15 = vpop.permute.xlu0 %2836  ;;  %v5458_v37 = vsel %vm271_vm4, %v268_v13, %v269_v39 }
 0x6b2   :  { %2855 = vmatpush.bf16.msrb.mxu0 %v2837_v15  ;;  %6737 = vst [vmem:[#allocation79_spill] sm:$0xff] %v5458_v37  ;;  %v5466_v15 = vsel %vm271_vm4, %v260_v3, %v261_v22  ;;  %v5486_v3 = vsel %vm271_vm4, %v269_v39, %v270_v19 }
 0x6b3   :  { %v323_v6 = vmul.f32 %v319_v16, %v5433_v34  ;;  %v327_v49 = vmul.f32 %v319_v16, %v5420_v55  ;;  %v331_v14 = vmul.f32 %v319_v16, %v5444_v10  ;;  %v335_v50 = vmul.f32 %v319_v16, %v5440_v26  ;;  %6739 = vst [vmem:[#allocation81_spill] sm:$0xff] %v5466_v15  ;;  %v5568_v55 = vpop.f32.mrf.mxu3 }
 0x6b4   :  { %v5470_v34 = vsel %vm271_vm4, %v256_v8, %v257_v27  ;;  %v320_v26 = vmul.f32 %v3573_v28, %v308_v11  ;;  %6741 = vst [vmem:[#allocation83_spill] sm:$0xff] %v5486_v3  ;;  %v5490_v8 = vsel %vm271_vm4, %v265_v4, %v266_v51  ;;  %v397_v51 = vpop.permute.xlu1 %396 }
 0x6b5   :  { %6740 = vst [vmem:[#allocation82_spill] sm:$0xff] %v5470_v34  ;;  %v5473_v10 = vadd.f32 %v323_v6, %v5351_v17  ;;  %v5476_v16 = vadd.f32 %v327_v49, %v5354_v33  ;;  %v5479_v13 = vadd.f32 %v331_v14, %v5357_v32  ;;  %v5482_v5 = vadd.f32 %v335_v50, %v5360_v56  ;;  %v313_v33 = vpop.permute.xlu2 %312  ;;  %v5496_v6 = vpop.f32.mrf.mxu0 }
 0x6b6   :  { %6742 = vst [vmem:[#allocation84_spill] sm:$0xff] %v5490_v8  ;;  %v5494_v17 = vsel %vm271_vm4, %v261_v22, %v262_v18  ;;  %v5500_v32 = vmul.f32 %v5210_v48, %v5223_v57  ;;  %v6745_v56 = vrot.slane %v5124_v35, 5  ;;  %v321_v11 = vmul.f32 %v3573_v28, %v313_v33 }
 0x6b7   :  { %6743 = vst [vmem:[#allocation85_spill] sm:$0xff] %v5494_v17  ;;  %v324_v4 = vmul.f32 %v320_v26, %v5470_v34  ;;  %v328_v18 = vmul.f32 %v320_v26, %v5466_v15  ;;  %v332_v22 = vmul.f32 %v320_v26, %v5462_v12  ;;  %v336_v39 = vmul.f32 %v320_v26, %v5458_v37 }
 0x6b8   :  { %6744 = vst [vmem:[#allocation86_spill] sm:$0xff] %v5496_v6  ;;  %v5506_v19 = vsel %vm271_vm4, %v257_v27, %v6745_v56  ;;  %v5516_v48 = vmul.f32 %v321_v11, %v5494_v17  ;;  %v5519_v14 = vmul.f32 %v321_v11, %v5490_v8  ;;  %v5522_v28 = vmul.f32 %v321_v11, %v5486_v3 }
 0x6b9   :  { %6746 = vst [vmem:[#allocation87_spill] sm:$0xff] %v5506_v19  ;;  %v5513_v49 = vmul.f32 %v321_v11, %v5506_v19  ;;  %v5525_v27 = vadd.f32 %v324_v4, %v5372_v46  ;;  %v5528_v50 = vadd.f32 %v328_v18, %v5375_v30  ;;  %v5531_v26 = vadd.f32 %v332_v22, %v5378_v58  ;;  %v5543_v46 = vld [vmem:[%s6585_s1 + $0x3] ss:$0 sm:$0xff]  ;;  %v5549_v4 = vpop.f32.mrf.mxu2 }
 0x6ba   :  { %v5534_v33 = vadd.f32 %v336_v39, %v5385_v43  ;;  %v6638_v56 = vrot.slane %v5124_v35, 7  ;;  %v358_v12 = vrot.slane %v5057_v2, 7  ;;  %v6635_v15 = vrot.slane %v5126_v44, 7  ;;  %6747 = vst [vmem:[#allocation88_spill] sm:$0xff] %v5549_v4  ;;  %v214_v2 = vpop.permute.xlu0 %213 }
 0x6bb   :  { %v362_v11 = vrot.slane %v5061_v61, 7  ;;  %v366_v58 = vrot.slane %v5070_v52, 7  ;;  %v354_v39 = vrot.slane %v5093_v59, 7  ;;  %v417_v30 = vmul.f32 %v5543_v46, %v397_v51  ;;  %6749 = vst [vmem:[#allocation89_spill] sm:$0xff] %v5568_v55 }
 0x6bc   :  { %v382_v22 = vsel %vm370_vm5, %v6638_v56, %v358_v12  ;;  %v6748_v43 = vrot.slane %v5128_v29, 7  ;;  %v355_v37 = vrot.slane %v5055_v60, 7  ;;  %v359_v34 = vrot.slane %v5059_v20, 7 }
 0x6bd   :  { %v378_v18 = vsel %vm370_vm5, %v6635_v15, %v362_v11  ;;  %v363_v15 = vrot.slane %v5068_v21, 7  ;;  %v6750_v57 = vrot.slane %v5130_v36, 7  ;;  %v425_v3 = vmul.f32 %v417_v30, %v382_v22  ;;  %v402_v52 = vpop.permute.xlu2 %401  ;;  %v5579_v55 = vpop.f32.mrf.mxu0 }
 0x6be   :  { %v374_v17 = vsel %vm370_vm5, %v6748_v43, %v366_v58  ;;  %v429_v51 = vmul.f32 %v417_v30, %v378_v18  ;;  %v367_v61 = vrot.slane %v5072_v7, 7  ;;  %v381_v4 = vsel %vm370_vm5, %v358_v12, %v359_v34  ;;  %6751 = vst [vmem:[#allocation90_spill] sm:$0xff] %v5579_v55 }
 0x6bf   :  { %v386_v56 = vsel %vm370_vm5, %v6750_v57, %v354_v39  ;;  %v433_v8 = vmul.f32 %v417_v30, %v374_v17  ;;  %v377_v43 = vsel %vm370_vm5, %v362_v11, %v363_v15  ;;  %v5582_v6 = vadd.f32 %v425_v3, %v5423_v41  ;;  %v407_v11 = vpop.permute.xlu1 %406 }
 0x6c0   :  { %v421_v19 = vmul.f32 %v417_v30, %v386_v56  ;;  %v5585_v57 = vadd.f32 %v429_v51, %v5426_v9  ;;  %v385_v56 = vsel %vm370_vm5, %v354_v39, %v355_v37  ;;  %v373_v12 = vsel %vm370_vm5, %v366_v58, %v367_v61 }
 0x6c1   :  { %6752 = vst [vmem:[#allocation91_spill] sm:$0xff] %v5582_v6  ;;  %v5588_v17 = vadd.f32 %v433_v8, %v5429_v54  ;;  %v418_v18 = vmul.f32 %v5543_v46, %v402_v52  ;;  %v6755_v41 = vrot.slane %v5130_v36, 4  ;;  %v6756_v9 = vrot.slane %v5149_v53, 4 }
 0x6c2   :  { %6753 = vst [vmem:[#allocation92_spill] sm:$0xff] %v5585_v57  ;;  %v5593_v30 = vadd.f32 %v421_v19, %v5436_v38  ;;  %v6758_v3 = vrot.slane %v5128_v29, 4  ;;  %v6759_v8 = vrot.slane %v5140_v40, 4  ;;  %v6761_v19 = vrot.slane %v5126_v44, 4 }
 0x6c3   :  { %6754 = vst [vmem:[#allocation93_spill] sm:$0xff] %v5588_v17  ;;  %v5604_v54 = vsel %vm172_vm3, %v6756_v9, %v6755_v41  ;;  %v6762_v52 = vrot.slane %v5138_v42, 4  ;;  %v6764_v22 = vrot.slane %v5124_v35, 4  ;;  %v6765_v39 = vrot.slane %v5136_v0, 4  ;;  %v5631_v17 = vpop.f32.mrf.mxu2 }
 0x6c4   :  { %6757 = vst [vmem:[#allocation94_spill] sm:$0xff] %v5604_v54  ;;  %v5612_v38 = vsel %vm172_vm3, %v6759_v8, %v6758_v3  ;;  %v222_v41 = vmul.f32 %v5247_v24, %v214_v2  ;;  %v422_v9 = vmul.f32 %v418_v18, %v385_v56  ;;  %v426_v3 = vmul.f32 %v418_v18, %v381_v4 }
 0x6c5   :  { %6760 = vst [vmem:[#allocation95_spill] sm:$0xff] %v5612_v38  ;;  %v5620_v58 = vsel %vm172_vm3, %v6762_v52, %v6761_v19  ;;  %v5628_v51 = vsel %vm172_vm3, %v6765_v39, %v6764_v22  ;;  %v430_v8 = vmul.f32 %v418_v18, %v377_v43  ;;  %v434_v55 = vmul.f32 %v418_v18, %v373_v12 }
 0x6c6   :  { %6763 = vst [vmem:[#allocation96_spill] sm:$0xff] %v5620_v58  ;;  %v226_v57 = vmul.f32 %v222_v41, %v5628_v51  ;;  %v230_v19 = vmul.f32 %v222_v41, %v5620_v58  ;;  %v234_v52 = vmul.f32 %v222_v41, %v5612_v38  ;;  %v238_v6 = vmul.f32 %v222_v41, %v5604_v54 }
 0x6c7   :  { %6766 = vst [vmem:[#allocation97_spill] sm:$0xff] %v5628_v51  ;;  %v5638_v44 = vadd.f32 %v422_v9, %v5473_v10  ;;  %v5641_v22 = vadd.f32 %v426_v3, %v5476_v16  ;;  %v5644_v2 = vadd.f32 %v430_v8, %v5479_v13  ;;  %v5647_v24 = vadd.f32 %v434_v55, %v5482_v5  ;;  %v412_v9 = vpop.permute.xlu2 %411  ;;  %v463_v3 = vpop.permute.xlu1 %462 }
 0x6c8   :  { %v242_v4 = vadd.f32 %v226_v57, %v5230_v63  ;;  %v246_v43 = vadd.f32 %v230_v19, %v5500_v32  ;;  %v250_v56 = vadd.f32 %v234_v52, %v5234_v25  ;;  %v254_v12 = vadd.f32 %v238_v6, %v5238_v47  ;;  %v5665_v47 = vpop.f32.mrf.mxu3 }
 0x6c9   :  { %v356_v10 = vrot.slane %v5136_v0, 7  ;;  %v6650_v18 = vrot.slane %v5138_v42, 7  ;;  %v364_v16 = vrot.slane %v5140_v40, 7  ;;  %v368_v13 = vrot.slane %v5149_v53, 7 }
 0x6ca   :  { %v419_v55 = vmul.f32 %v5543_v46, %v407_v11  ;;  %v341_v63 = vadd.f32 %v5513_v49, %v242_v4  ;;  %v5662_v5 = vadd.f32 %v5516_v48, %v246_v43  ;;  %v349_v25 = vadd.f32 %v5519_v14, %v250_v56  ;;  %v5680_v48 = vld [vmem:[%s6585_s1 + $0x4] ss:$0 sm:$0xff] }
 0x6cb   :  { %v372_v6 = vsel %vm370_vm5, %v367_v61, %v368_v13  ;;  %v376_v32 = vsel %vm370_vm5, %v363_v15, %v364_v16  ;;  %v380_v57 = vsel %vm370_vm5, %v359_v34, %v6650_v18  ;;  %v384_v49 = vsel %vm370_vm5, %v355_v37, %v356_v10 }
 0x6cc   :  { %v5657_v39 = vpop.f32.mrf.mxu0  ;;  %v423_v14 = vmul.f32 %v419_v55, %v384_v49  ;;  %v427_v11 = vmul.f32 %v419_v55, %v380_v57  ;;  %v431_v41 = vmul.f32 %v419_v55, %v376_v32  ;;  %v435_v61 = vmul.f32 %v419_v55, %v372_v6 }
 0x6cd   :  { %6767 = vst [vmem:[#allocation98_spill] sm:$0xff] %v5657_v39  ;;  %v353_v15 = vadd.f32 %v5522_v28, %v254_v12  ;;  %v6768_v8 = vrot.slane %v5130_v36, 7  ;;  %v6769_v37 = vrot.slane %v5128_v29, 7  ;;  %v6770_v56 = vrot.slane %v5124_v35, 7 }
 0x6ce   :  { %v5692_v52 = vadd.f32 %v423_v14, %v5525_v27  ;;  %v5695_v4 = vadd.f32 %v427_v11, %v5528_v50  ;;  %v5698_v43 = vadd.f32 %v431_v41, %v5531_v26  ;;  %v5701_v28 = vadd.f32 %v435_v61, %v5534_v33 }
 0x6cf   :  { %v371_v34 = vsel %vm370_vm5, %v368_v13, %v6768_v8  ;;  %v375_v19 = vsel %vm370_vm5, %v364_v16, %v6769_v37  ;;  %v383_v12 = vsel %vm370_vm5, %v356_v10, %v6770_v56  ;;  %v5708_v13 = vmul.f32 %v5543_v46, %v412_v9  ;;  %v5713_v16 = vpop.f32.mrf.mxu2  ;;  %v2548_v9 = vpop.f32.mrf.mxu1 }
 0x6d0   :  { %v5711_v27 = vmul.f32 %v5680_v48, %v463_v3  ;;  %v5728_v57 = vpop.f32.mrf.mxu3 }
 0x6d1   :  { %v424_v50 = vmul.f32 %v5708_v13, %v383_v12  ;;  %v432_v26 = vmul.f32 %v5708_v13, %v375_v19  ;;  %v436_v33 = vmul.f32 %v5708_v13, %v371_v34 }
 0x6d2   :  { %6771 = vst [vmem:[#allocation99_spill] sm:$0xff] %v5711_v27  ;;  %v487_v6 = vmul.f32 %v5711_v27, %v5093_v59 }
 0x6d3   :  { %v5722_v10 = vadd.f32 %v424_v50, %v341_v63  ;;  %v5724_v46 = vadd.f32 %v432_v26, %v349_v25  ;;  %v5726_v32 = vadd.f32 %v436_v33, %v353_v15  ;;  %v2649_v25 = vsel %vm1073_vm1, %v2548_v9, -inf }
 0x6d4   :  { %v5718_v55 = vpop.f32.mrf.mxu0  ;;  %v5731_v49 = vadd.f32 %v487_v6, %v5593_v30 }
 0x6d5   :  { %6772 = vst [vmem:[#allocation100_spill] sm:$0xff] %v5718_v55 }
 0x6d6   :  { %6773 = vst [vmem:[#allocation101_spill] sm:$0xff] %v5731_v49 }
 0x6d7   :  { %v5733_v14 = vpop.f32.mrf.mxu2  ;;  %v2551_v30 = vpop.f32.mrf.mxu1 }
 0x6d8   :  { %v5736_v61 = vpop.f32.mrf.mxu3  ;;  %v2652_v19 = vsel %vm1073_vm1, %v2551_v30, -inf  ;;  %v2658_v33 = vsel %vm1073_vm1, %v5733_v14, -inf }
 0x6d9   :  { %6774 = vst [vmem:[#allocation102_spill] sm:$0xff] %v5736_v61 }
 0x6dc   :  { %v2507_v11 = vpop.f32.mrf.mxu0 }
 0x6dd   :  { %v2634_v41 = vsel %vm1073_vm1, %v2507_v11, -inf }
 0x6de   :  { %2635 = vmax.xlane.f32.xlu1 %v2634_v41 }
 0x6df   :  { %v5740_v15 = vpop.f32.mrf.mxu2  ;;  %v5750_v50 = vpop.f32.mrf.mxu1 }
 0x6e0   :  { %v5742_v8 = vpop.f32.mrf.mxu3  ;;  %v2655_v41 = vsel %vm1073_vm1, %v5750_v50, -inf }
 0x6e1   :  { %v2670_v37 = vsel %vm1073_vm1, %v5742_v8, -inf }
 0x6e4   :  { %v2509_v63 = vpop.f32.mrf.mxu0 }
 0x6e5   :  { %v2637_v3 = vsel %vm1073_vm1, %v2509_v63, -inf }
 0x6e6   :  { %2650 = vmax.xlane.f32.xlu1 %v2649_v25  ;;  %2638 = vmax.xlane.f32.xlu2 %v2637_v3 }
 0x6e7   :  { %v5748_v12 = vpop.f32.mrf.mxu2 }
 0x6e8   :  { %v5760_v25 = vpop.f32.mrf.mxu3 }
 0x6ec   :  { %v2512_v34 = vpop.f32.mrf.mxu0 }
 0x6ed   :  { %v2640_v56 = vsel %vm1073_vm1, %v2512_v34, -inf }
 0x6ee   :  { %2671 = vmax.xlane.f32.xlu1 %v2670_v37  ;;  %2653 = vmax.xlane.f32.xlu2 %v2652_v19  ;;  %v2673_v19 = vsel %vm1073_vm1, %v5760_v25, -inf }
 0x6ef   :  { %2641 = vmax.xlane.f32.xlu0 %v2640_v56  ;;  %v5762_v3 = vpop.f32.mrf.mxu2  ;;  %v2661_v56 = vsel %vm1073_vm1, %v5740_v15, -inf }
 0x6f0   :  { %v2667_v37 = vsel %vm1073_vm1, %v5762_v3, -inf }
 0x6f4   :  { %v5752_v26 = vpop.f32.mrf.mxu0 }
 0x6f5   :  { %v2643_v6 = vsel %vm1073_vm1, %v5752_v26, -inf }
 0x6f6   :  { %2659 = vmax.xlane.f32.xlu2 %v2658_v33  ;;  %2644 = vmax.xlane.f32.xlu1 %v2643_v6  ;;  %v5770_v33 = vpop.f32.mrf.mxu3  ;;  %v2664_v6 = vsel %vm1073_vm1, %v5748_v12, -inf }
 0x6f7   :  { %2656 = vmax.xlane.f32.xlu0 %v2655_v41  ;;  %v2676_v41 = vsel %vm1073_vm1, %v5770_v33, -inf }
 0x6fe   :  { %2668 = vmax.xlane.f32.xlu2 %v2667_v37  ;;  %2674 = vmax.xlane.f32.xlu1 %v2673_v19  ;;  %v5776_v18 = vpop.f32.mrf.mxu3 }
 0x6ff   :  { %2662 = vmax.xlane.f32.xlu0 %v2661_v56  ;;  %v2679_v37 = vsel %vm1073_vm1, %v5776_v18, -inf }
 0x706   :  { %2665 = vmax.xlane.f32.xlu1 %v2664_v6 }
 0x707   :  { %2677 = vmax.xlane.f32.xlu0 %v2676_v41 }
 0x70e   :  { %2680 = vmax.xlane.f32.xlu1 %v2679_v37 }
 0x71f   :  { %v2648_v55 = vpop.xlane.xlu1 %2647 }
 0x720   :  { %v2686_v19 = vsub.f32 %v5348_v62, %v2648_v55 }
 0x722   :  { %v2706_v56 = vmul.f32 1.442695, %v2686_v19 }
 0x724   :  { %3773 = vpow2.f32 %v2706_v56 }
 0x72a   :  { %v5781_v39 = vpop.eup %3773 }
 0x72b   :  { %v2742_v58 = vsel %vm1073_vm1, %v5781_v39, 0.0 }
 0x72c   :  { %2743 = vadd.xlane.f32.xlu1 %v2742_v58 }
 0x751   :  { %v2636_v54 = vpop.xlane.xlu1 %2635 }
 0x752   :  { %v2682_v6 = vsub.f32 %v2507_v11, %v2636_v54 }
 0x754   :  { %v2698_v41 = vmul.f32 1.442695, %v2682_v6 }
 0x756   :  { %3775 = vpow2.f32 %v2698_v41 }
 0x759   :  { %v2651_v38 = vpop.xlane.xlu1 %2650  ;;  %v2639_v51 = vpop.xlane.xlu2 %2638 }
 0x75a   :  { %v2687_v61 = vsub.f32 %v2548_v9, %v2651_v38  ;;  %v2683_v49 = vsub.f32 %v2509_v63, %v2639_v51 }
 0x75c   :  { %v5785_v37 = vpop.eup %3775  ;;  %v2708_v27 = vmul.f32 1.442695, %v2687_v61  ;;  %v2700_v62 = vmul.f32 1.442695, %v2683_v49 }
 0x75d   :  { %v2730_v55 = vsel %vm1073_vm1, %v5785_v37, 0.0 }
 0x75e   :  { %3777 = vpow2.f32 %v2708_v27  ;;  %2731 = vadd.xlane.f32.xlu2 %v2730_v55 }
 0x75f   :  { %3779 = vpow2.f32 %v2700_v62 }
 0x761   :  { %v2672_v19 = vpop.xlane.xlu1 %2671  ;;  %v2654_v58 = vpop.xlane.xlu2 %2653 }
 0x762   :  { %v2642_v56 = vpop.xlane.xlu0 %2641  ;;  %v2688_v54 = vsub.f32 %v2551_v30, %v2654_v58  ;;  %v2694_v61 = vsub.f32 %v5742_v8, %v2672_v19 }
 0x763   :  { %v2684_v11 = vsub.f32 %v2512_v34, %v2642_v56 }
 0x764   :  { %v5789_v6 = vpop.eup %3777  ;;  %v2710_v41 = vmul.f32 1.442695, %v2688_v54  ;;  %v2722_v30 = vmul.f32 1.442695, %v2694_v61 }
 0x765   :  { %v5791_v38 = vpop.eup %3779  ;;  %v2702_v51 = vmul.f32 1.442695, %v2684_v11  ;;  %v2745_v49 = vsel %vm1073_vm1, %v5789_v6, 0.0 }
 0x766   :  { %2746 = vadd.xlane.f32.xlu2 %v2745_v49  ;;  %v2733_v27 = vsel %vm1073_vm1, %v5791_v38, 0.0 }
 0x767   :  { %3781 = vpow2.f32 %v2702_v51  ;;  %2734 = vadd.xlane.f32.xlu1 %v2733_v27 }
 0x768   :  { %3783 = vpow2.f32 %v2710_v41 }
 0x769   :  { %v2645_v9 = vpop.xlane.xlu1 %2644  ;;  %v2660_v63 = vpop.xlane.xlu2 %2659  ;;  %3785 = vpow2.f32 %v2722_v30 }
 0x76a   :  { %v2657_v34 = vpop.xlane.xlu0 %2656  ;;  %v2690_v62 = vsub.f32 %v5733_v14, %v2660_v63  ;;  %v2685_v19 = vsub.f32 %v5752_v26, %v2645_v9 }
 0x76b   :  { %v2689_v55 = vsub.f32 %v5750_v50, %v2657_v34 }
 0x76c   :  { %v2714_v58 = vmul.f32 1.442695, %v2690_v62  ;;  %v2704_v50 = vmul.f32 1.442695, %v2685_v19 }
 0x76d   :  { %v5800_v56 = vpop.eup %3781  ;;  %v2712_v54 = vmul.f32 1.442695, %v2689_v55 }
 0x76e   :  { %v5802_v8 = vpop.eup %3783  ;;  %v2736_v11 = vsel %vm1073_vm1, %v5800_v56, 0.0 }
 0x76f   :  { %3787 = vpow2.f32 %v2712_v54  ;;  %2737 = vadd.xlane.f32.xlu1 %v2736_v11  ;;  %v2748_v41 = vsel %vm1073_vm1, %v5802_v8, 0.0  ;;  %v5810_v61 = vpop.eup %3785 }
 0x770   :  { %3789 = vpow2.f32 %v2714_v58  ;;  %2749 = vadd.xlane.f32.xlu2 %v2748_v41  ;;  %v2766_v34 = vsel %vm1073_vm1, %v5810_v61, 0.0 }
 0x771   :  { %v2675_v14 = vpop.xlane.xlu1 %2674  ;;  %3791 = vpow2.f32 %v2704_v50 }
 0x772   :  { %v2663_v51 = vpop.xlane.xlu0 %2662  ;;  %v2695_v9 = vsub.f32 %v5760_v25, %v2675_v14 }
 0x773   :  { %v2691_v49 = vsub.f32 %v5740_v15, %v2663_v51 }
 0x774   :  { %v2724_v62 = vmul.f32 1.442695, %v2695_v9 }
 0x775   :  { %v5812_v27 = vpop.eup %3787  ;;  %v2716_v26 = vmul.f32 1.442695, %v2691_v49 }
 0x776   :  { %v5815_v63 = vpop.eup %3789  ;;  %v2751_v30 = vsel %vm1073_vm1, %v5812_v27, 0.0 }
 0x777   :  { %3793 = vpow2.f32 %v2716_v26  ;;  %2752 = vadd.xlane.f32.xlu1 %v2751_v30  ;;  %v2754_v15 = vsel %vm1073_vm1, %v5815_v63, 0.0  ;;  %v5824_v58 = vpop.eup %3791 }
 0x778   :  { %2767 = vadd.xlane.f32.xlu2 %v2766_v34  ;;  %2755 = vadd.xlane.f32.xlu0 %v2754_v15  ;;  %3795 = vpow2.f32 %v2724_v62  ;;  %v2739_v41 = vsel %vm1073_vm1, %v5824_v58, 0.0  ;;  %v3349_v15 = vld [vmem:[%s6584_s0 + $0x90] sm:$0xff] }
 0x779   :  { %v2666_v55 = vpop.xlane.xlu1 %2665 }
 0x77a   :  { %v2692_v25 = vsub.f32 %v5748_v12, %v2666_v55  ;;  %v2678_v62 = vpop.xlane.xlu0 %2677  ;;  %v3350_v55 = vld [vmem:[%s6584_s0 + $0x98] sm:$0xff] }
 0x77c   :  { %v2718_v54 = vmul.f32 1.442695, %v2692_v25  ;;  %v2696_v25 = vsub.f32 %v5770_v33, %v2678_v62  ;;  %v3352_v62 = vld [vmem:[%s6584_s0 + $0xa0] sm:$0xff] }
 0x77d   :  { %v5826_v19 = vpop.eup %3793 }
 0x77e   :  { %3797 = vpow2.f32 %v2718_v54  ;;  %v2757_v11 = vsel %vm1073_vm1, %v5826_v19, 0.0  ;;  %v5833_v51 = vpop.eup %3795  ;;  %v2726_v54 = vmul.f32 1.442695, %v2696_v25 }
 0x77f   :  { %2758 = vadd.xlane.f32.xlu1 %v2757_v11  ;;  %v2769_v9 = vsel %vm1073_vm1, %v5833_v51, 0.0  ;;  %v3354_v11 = vld [vmem:[%s6584_s0 + $0xb0] sm:$0xff] }
 0x780   :  { %2740 = vadd.xlane.f32.xlu0 %v2739_v41  ;;  %v2669_v41 = vpop.xlane.xlu2 %2668 }
 0x781   :  { %v2681_v14 = vpop.xlane.xlu1 %2680 }
 0x782   :  { %v2697_v50 = vsub.f32 %v5776_v18, %v2681_v14  ;;  %v3348_v18 = vld [vmem:[%s6584_s0 + $0x88] sm:$0xff]  ;;  %v2693_v14 = vsub.f32 %v5762_v3, %v2669_v41 }
 0x784   :  { %v5835_v12 = vpop.eup %3797  ;;  %v2728_v49 = vmul.f32 1.442695, %v2697_v50 }
 0x785   :  { %v2760_v26 = vsel %vm1073_vm1, %v5835_v12, 0.0 }
 0x786   :  { %3799 = vpow2.f32 %v2728_v49  ;;  %v3358_v49 = vld [vmem:[%s6584_s0 + $0xc8] sm:$0xff] }
 0x787   :  { %2761 = vadd.xlane.f32.xlu1 %v2760_v26  ;;  %3801 = vpow2.f32 %v2726_v54  ;;  %v2720_v26 = vmul.f32 1.442695, %v2693_v14  ;;  %v3355_v54 = vld [vmem:[%s6584_s0 + $0xb8] sm:$0xff] }
 0x788   :  { %2770 = vadd.xlane.f32.xlu0 %v2769_v9  ;;  %v3362_v9 = vld [vmem:[%s6584_s0 + $0xe0] sm:$0xff] }
 0x789   :  { %3803 = vpow2.f32 %v2720_v26 }
 0x78c   :  { %v5841_v30 = vpop.eup %3799 }
 0x78d   :  { %v2775_v34 = vsel %vm1073_vm1, %v5841_v30, 0.0  ;;  %v5859_v50 = vpop.eup %3801 }
 0x78e   :  { %v2772_v33 = vsel %vm1073_vm1, %v5859_v50, 0.0 }
 0x78f   :  { %2776 = vadd.xlane.f32.xlu1 %v2775_v34  ;;  %v5869_v34 = vpop.eup %3803 }
 0x790   :  { %467 = vperm.xlu2 %3569, %v3348_v18   ;;  %6775 = vst [vmem:[#allocation103_spill] sm:$0xff] %v5869_v34  ;;  %v2763_v3 = vsel %vm1073_vm1, %v5869_v34, 0.0  ;;  %v3365_v18 = vld [vmem:[%s6584_s0 + $0xf8] sm:$0xff] }
 0x79c   :  { %472 = vperm.xlu0 %3570, %v3349_v15   ;;  %v3369_v15 = vld [vmem:[%s6584_s0 + $0x110] sm:$0xff] }
 0x7a8   :  { %477 = vperm.xlu1 %3568, %v3350_v55   ;;  %v2744_v55 = vpop.xlane.xlu1 %2743 }
 0x7a9   :  { %3805 = vrcp.f32 %v2744_v55 }
 0x7af   :  { %v3806_v14 = vpop.eup %3805 }
 0x7b0   :  { %571 = vperm.xlu1 %3568, %v3354_v11   ;;  %v3353_v11 = vld [vmem:[%s6584_s0 + $0xa8] sm:$0xff] }
 0x7b8   :  { %632 = vperm.xlu1 %3568, %v3358_v49  }
 0x7b9   :  { %2773 = vadd.xlane.f32.xlu2 %v2772_v33  ;;  %v2798_v33 = vmul.f32 %v3806_v14, %v5781_v39 }
 0x7c0   :  { %693 = vperm.xlu1 %3568, %v3362_v9  }
 0x7c6   :  { %2764 = vadd.xlane.f32.xlu0 %v2763_v3  ;;  %v3359_v3 = vld [vmem:[%s6584_s0 + $0xd0] sm:$0xff] }
 0x7c8   :  { %708 = vperm.xlu1 %3568, %v3365_v18  }
 0x7d0   :  { %769 = vperm.xlu1 %3568, %v3369_v15  }
 0x7d1   :  { %561 = vperm.xlu2 %3569, %v3352_v62   ;;  %v2732_v25 = vpop.xlane.xlu2 %2731  ;;  %v2814_v62 = vpack.c.bf16 %v2798_v33, %v2798_v33 }
 0x7d2   :  { %3807 = vrcp.f32 %v2732_v25 }
 0x7d3   :  { %v2871_v14 = vunpack.c.l.b16 %v2814_v62 }
 0x7d8   :  { %3016 = vrot.lane.b32.xlu1 %v4708_v45, %s3891_s28  ;;  %v3808_v26 = vpop.eup %3807  ;;  %v3357_v45 = vld [vmem:[%s6584_s0 + $0xc0] sm:$0xff] }
 0x7d9   :  { %576 = vperm.xlu2 %3569, %v3355_v54   ;;  %v2747_v41 = vpop.xlane.xlu2 %2746  ;;  %v2794_v9 = vmul.f32 %v3808_v26, %v5785_v37 }
 0x7da   :  { %566 = vperm.xlu0 %3570, %v3353_v11   ;;  %v2735_v49 = vpop.xlane.xlu1 %2734  ;;  %3809 = vrcp.f32 %v2747_v41 }
 0x7db   :  { %3811 = vrcp.f32 %v2735_v49  ;;  %v2810_v39 = vpack.c.bf16 %v2794_v9, %v2794_v9  ;;  %v6776_v9 = vld [vmem:[#allocation33_spill] sm:$0xff] }
 0x7dd   :  { %v2830_v26 = vunpack.c.l.b16 %v2810_v39  ;;  %v6777_v39 = vld [vmem:[#allocation45_spill] sm:$0xff] }
 0x7e0   :  { %v3810_v18 = vpop.eup %3809  ;;  %3022 = vrot.lane.b32.xlu1 %v4722_v23, %s3891_s28  ;;  %v3363_v23 = vld [vmem:[%s6584_s0 + $0xe8] sm:$0xff] }
 0x7e1   :  { %v3812_v15 = vpop.eup %3811  ;;  %v2799_v55 = vmul.f32 %v3810_v18, %v5789_v6  ;;  %637 = vperm.xlu2 %3569, %v3359_v3   ;;  %v3360_v6 = vld [vmem:[%s6584_s0 + $0xd8] sm:$0xff] }
 0x7e2   :  { %v2795_v37 = vmul.f32 %v3812_v15, %v5791_v38  ;;  %627 = vperm.xlu0 %3570, %v3357_v45   ;;  %v2738_v25 = vpop.xlane.xlu1 %2737 }
 0x7e3   :  { %v2815_v54 = vpack.c.bf16 %v2799_v55, %v2799_v55  ;;  %v2750_v11 = vpop.xlane.xlu2 %2749  ;;  %v3364_v55 = vld [vmem:[%s6584_s0 + $0xf0] sm:$0xff] }
 0x7e4   :  { %v2811_v41 = vpack.c.bf16 %v2795_v37, %v2795_v37  ;;  %3813 = vrcp.f32 %v2750_v11 }
 0x7e5   :  { %v2872_v49 = vunpack.c.l.b16 %v2815_v54 }
 0x7e6   :  { %v2831_v34 = vunpack.c.l.b16 %v2811_v41 }
 0x7e7   :  { %v2875_v33 = vpack.c.b16 %v2872_v49, %v2871_v14 }
 0x7e8   :  { %v2834_v38 = vpack.c.b16 %v2831_v34, %v2830_v26  ;;  %3028 = vrot.lane.b32.xlu1 %v6776_v9, %s3891_s28  ;;  %v3367_v34 = vld [vmem:[%s6584_s0 + $0x100] sm:$0xff] }
 0x7e9   :  { %698 = vperm.xlu2 %3569, %v3363_v23   ;;  %3526 = vmatmul.msk.bf16.vlgmr.msrb.gmra.mxu1 %vm1073_vm1, %v2875_v33 }
 0x7ea   :  { %v3814_v3 = vpop.eup %3813  ;;  %642 = vperm.xlu0 %3570, %v3360_v6   ;;  %v2753_v45 = vpop.xlane.xlu1 %2752  ;;  %3524 = vmatmul.msk.bf16.vlgmr.msrb.gmra.mxu0 %vm1073_vm1, %v2834_v38 }
 0x7eb   :  { %3815 = vrcp.f32 %v2753_v45  ;;  %v2756_v18 = vpop.xlane.xlu0 %2755  ;;  %v2768_v15 = vpop.xlane.xlu2 %2767  ;;  %v2800_v62 = vmul.f32 %v3814_v3, %v5802_v8  ;;  %v3370_v3 = vld [vmem:[%s6584_s0 + $0x118] sm:$0xff] }
 0x7ec   :  { %3817 = vrcp.f32 %v2756_v18 }
 0x7ed   :  { %3819 = vrcp.f32 %v2738_v25  ;;  %v2816_v54 = vpack.c.bf16 %v2800_v62, %v2800_v62 }
 0x7ef   :  { %v2873_v33 = vunpack.c.l.b16 %v2816_v54 }
 0x7f0   :  { %3082 = vrot.lane.b32.xlu1 %v6777_v39, %s3892_s16 }
 0x7f1   :  { %v3816_v37 = vpop.eup %3815  ;;  %759 = vperm.xlu2 %3569, %v3367_v34  }
 0x7f2   :  { %v2801_v11 = vmul.f32 %v3816_v37, %v5812_v27  ;;  %703 = vperm.xlu0 %3570, %v3364_v55   ;;  %v2759_v8 = vpop.xlane.xlu1 %2758  ;;  %v3818_v25 = vpop.eup %3817  ;;  %v6778_v55 = vld [vmem:[#allocation28_spill] sm:$0xff] }
 0x7f3   :  { %3821 = vrcp.f32 %v2759_v8  ;;  %v2741_v41 = vpop.xlane.xlu0 %2740  ;;  %v468_v14 = vpop.permute.xlu2 %467  ;;  %v2802_v38 = vmul.f32 %v3818_v25, %v5815_v63 }
 0x7f4   :  { %v3820_v49 = vpop.eup %3819  ;;  %v2817_v26 = vpack.c.bf16 %v2801_v11, %v2801_v11  ;;  %3823 = vrcp.f32 %v2741_v41  ;;  %v484_v23 = vmul.f32 %v5680_v48, %v468_v14 }
 0x7f5   :  { %3825 = vrcp.f32 %v2768_v15  ;;  %v2796_v45 = vmul.f32 %v3820_v49, %v5800_v56  ;;  %v3368_v15 = vld [vmem:[%s6584_s0 + $0x108] sm:$0xff]  ;;  %v2818_v8 = vpack.c.bf16 %v2802_v38, %v2802_v38 }
 0x7f6   :  { %v2874_v6 = vunpack.c.l.b16 %v2817_v26  ;;  %v488_v9 = vmul.f32 %v484_v23, %v5055_v60  ;;  %v492_v27 = vmul.f32 %v484_v23, %v5059_v20  ;;  %v496_v18 = vmul.f32 %v484_v23, %v5068_v21 }
 0x7f7   :  { %v500_v62 = vmul.f32 %v484_v23, %v5072_v7  ;;  %v2812_v25 = vpack.c.bf16 %v2796_v45, %v2796_v45  ;;  %v2912_v26 = vunpack.c.l.b16 %v2818_v8  ;;  %v521_v45 = vrot.slane %v5136_v0, 1 }
 0x7f8   :  { %v5936_v63 = vadd.f32 %v488_v9, %v5638_v44  ;;  %v5939_v34 = vadd.f32 %v492_v27, %v5641_v22  ;;  %3032 = vrot.lane.b32.xlu1 %v6778_v55, %s3891_s28  ;;  %v2876_v39 = vpack.c.b16 %v2874_v6, %v2873_v33  ;;  %v5944_v56 = vadd.f32 %v496_v18, %v5644_v2 }
 0x7f9   :  { %v3822_v37 = vpop.eup %3821  ;;  %v5947_v54 = vadd.f32 %v500_v62, %v5647_v24  ;;  %774 = vperm.xlu2 %3569, %v3370_v3   ;;  %v2832_v33 = vunpack.c.l.b16 %v2812_v25  ;;  %v6780_v3 = vld [vmem:[#allocation21_spill] sm:$0xff]  ;;  %v522_v18 = vrot.slane %v5124_v35, 1  ;;  %v530_v62 = vrot.slane %v5128_v29, 1 }
 0x7fa   :  { %v3824_v11 = vpop.eup %3823  ;;  %v2803_v44 = vmul.f32 %v3822_v37, %v5826_v19  ;;  %764 = vperm.xlu0 %3570, %v3368_v15   ;;  %3527 = vmatmul.msk.bf16.gmra.mxu1 %vm1073_vm1, %v2876_v39  ;;  %v6779_v19 = vld [vmem:[#allocation22_spill] sm:$0xff] }
 0x7fb   :  { %v3826_v22 = vpop.eup %3825  ;;  %v2797_v41 = vmul.f32 %v3824_v11, %v5824_v58  ;;  %v2771_v14 = vpop.xlane.xlu0 %2770  ;;  %v548_v37 = vsel %vm535_vm6, %v521_v45, %v522_v18 }
 0x7fc   :  { %v2819_v49 = vpack.c.bf16 %v2803_v44, %v2803_v44  ;;  %3827 = vrcp.f32 %v2771_v14  ;;  %v2806_v24 = vmul.f32 %v3826_v22, %v5810_v61  ;;  %v5979_v11 = vpop.xlane.xlu1 %2761  ;;  %v6781_v44 = vld [vmem:[#allocation27_spill] sm:$0xff] }
 0x7fd   :  { %v2813_v2 = vpack.c.bf16 %v2797_v41, %v2797_v41  ;;  %v6782_v22 = vld [vmem:[#allocation23_spill] sm:$0xff] }
 0x7fe   :  { %v2913_v23 = vunpack.c.l.b16 %v2819_v49  ;;  %v2822_v58 = vpack.c.bf16 %v2806_v24, %v2806_v24 }
 0x7ff   :  { %v2833_v6 = vunpack.c.l.b16 %v2813_v2 }
 0x800   :  { %v2916_v38 = vpack.c.b16 %v2913_v23, %v2912_v26  ;;  %3086 = vrot.lane.b32.xlu1 %v5450_v31, %s3892_s16  ;;  %v529_v31 = vrot.slane %v5140_v40, 1  ;;  %v2953_v55 = vunpack.c.l.b16 %v2822_v58  ;;  %v6783_v26 = vld [vmem:[#allocation35_spill] sm:$0xff]  ;;  %v6784_v23 = vld [vmem:[#allocation30_spill] sm:$0xff] }
 0x801   :  { %3018 = vrot.lane.b32.xlu2 %v6779_v19, %s3891_s28  ;;  %v2835_v9 = vpack.c.b16 %v2833_v6, %v2832_v33  ;;  %v6785_v19 = vld [vmem:[#allocation43_spill] sm:$0xff] }
 0x802   :  { %v3828_v27 = vpop.eup %3827  ;;  %3014 = vrot.lane.b32.xlu0 %v6780_v3, %s3891_s28  ;;  %3528 = vmatmul.msk.bf16.vlgmr.msrb.gmra.mxu2 %vm1073_vm1, %v2916_v38 }
 0x803   :  { %v2807_v61 = vmul.f32 %v3828_v27, %v5833_v51  ;;  %3525 = vmatmul.msk.bf16.gmra.mxu0 %vm1073_vm1, %v2835_v9  ;;  %v540_v51 = vsel %vm535_vm6, %v529_v31, %v530_v62  ;;  %v6786_v9 = vrot.slane %v6785_v19, 7  ;;  %v6787_v27 = vrot.slane %v5138_v42, 7 }
 0x804   :  { %v2777_v24 = vpop.xlane.xlu1 %2776 }
 0x805   :  { %v2823_v15 = vpack.c.bf16 %v2807_v61, %v2807_v61  ;;  %v379_v58 = vsel %vm370_vm5, %v6787_v27, %v6786_v9  ;;  %v6788_v61 = vld [vmem:[#allocation26_spill] sm:$0xff]  ;;  %3829 = vrcp.f32 %v2777_v24 }
 0x806   :  { %v428_v3 = vmul.f32 %v5708_v13, %v379_v58  ;;  %v6794_v58 = vld [vmem:[#allocation36_spill] sm:$0xff] }
 0x807   :  { %v2954_v39 = vunpack.c.l.b16 %v2823_v15  ;;  %v519_v15 = vrot.slane %v5093_v59, 1 }
 0x808   :  { %3092 = vrot.lane.b32.xlu1 %v5713_v16, %s3892_s16 }
 0x809   :  { %v2957_v8 = vpack.c.b16 %v2954_v39, %v2953_v55  ;;  %3024 = vrot.lane.b32.xlu2 %v6781_v44, %s3891_s28  ;;  %v444_v39 = vadd.f32 %v428_v3, %v5662_v5  ;;  %v533_v5 = vrot.slane %v5149_v53, 1  ;;  %v523_v3 = vrot.slane %v6794_v58, 1 }
 0x80a   :  { %3020 = vrot.lane.b32.xlu0 %v6782_v22, %s3891_s28 }
 0x80b   :  { %3530 = vmatmul.msk.bf16.vlgmr.msrb.gmra.mxu3 %vm1073_vm1, %v2957_v8 }
 0x80e   :  { %v473_v25 = vpop.permute.xlu0 %472 }
 0x80f   :  { %v485_v41 = vmul.f32 %v5680_v48, %v473_v25  ;;  %v6658_v25 = vrot.slane %v5138_v42, 1 }
 0x810   :  { %3096 = vrot.lane.b32.xlu1 %v5665_v47, %s3892_s16 }
 0x811   :  { %v489_v14 = vmul.f32 %v485_v41, %v5136_v0  ;;  %v493_v49 = vmul.f32 %v485_v41, %v5138_v42  ;;  %v497_v16 = vmul.f32 %v485_v41, %v5140_v40  ;;  %v501_v2 = vmul.f32 %v485_v41, %v5149_v53  ;;  %3078 = vrot.lane.b32.xlu2 %v6783_v26, %s3892_s16  ;;  %v6048_v26 = vld [vmem:[%s6585_s1 + $0x5] ss:$0 sm:$0xff]  ;;  %v6791_v53 = vld [vmem:[#allocation86_spill] sm:$0xff] }
 0x812   :  { %3026 = vrot.lane.b32.xlu0 %v6784_v23, %s3891_s28  ;;  %v534_v41 = vrot.slane %v5130_v36, 1  ;;  %v6792_v23 = vld [vmem:[#allocation31_spill] sm:$0xff]  ;;  %v524_v0 = vrot.slane %v5059_v20, 1 }
 0x813   :  { %v505_v33 = vadd.f32 %v489_v14, %v5692_v52  ;;  %v509_v6 = vadd.f32 %v493_v49, %v5695_v4  ;;  %v513_v47 = vadd.f32 %v497_v16, %v5698_v43  ;;  %v517_v38 = vadd.f32 %v501_v2, %v5701_v28  ;;  %v6789_v52 = vld [vmem:[#allocation60_spill] sm:$0xff]  ;;  %v6790_v43 = vld [vmem:[#allocation39_spill] sm:$0xff] }
 0x814   :  { %v520_v4 = vrot.slane %v5055_v60, 1 }
 0x816   :  { %v6024_v13 = vsel %vm535_vm6, %v519_v15, %v520_v4 }
 0x818   :  { %3008 = vrot.lane.b32.xlu1 %v6788_v61, %s3891_s28  ;;  %v6795_v61 = vld [vmem:[#allocation38_spill] sm:$0xff] }
 0x819   :  { %3084 = vrot.lane.b32.xlu2 %v6789_v52, %s3892_s16  ;;  %v531_v52 = vrot.slane %v6795_v61, 1 }
 0x81a   :  { %3080 = vrot.lane.b32.xlu0 %v6790_v43, %s3892_s16  ;;  %v478_v28 = vpop.permute.xlu1 %477 }
 0x81b   :  { %v486_v55 = vmul.f32 %v5680_v48, %v478_v28  ;;  %v526_v48 = vrot.slane %v6785_v19, 1 }
 0x81d   :  { %v490_v8 = vmul.f32 %v486_v55, %v5124_v35  ;;  %v494_v60 = vmul.f32 %v486_v55, %v6785_v19  ;;  %v498_v44 = vmul.f32 %v486_v55, %v5128_v29  ;;  %v502_v22 = vmul.f32 %v486_v55, %v5130_v36  ;;  %v6092_v29 = vld [vmem:[%s6585_s1 + $0x6] ss:$0 sm:$0xff]  ;;  %v6809_v36 = vld [vmem:[#allocation90_spill] sm:$0xff] }
 0x81e   :  { %v532_v35 = vrot.slane %v5072_v7, 1  ;;  %v6798_v7 = vld [vmem:[#allocation52_spill] sm:$0xff] }
 0x81f   :  { %v6035_v14 = vadd.f32 %v490_v8, %v5722_v10  ;;  %v6037_v49 = vadd.f32 %v494_v60, %v444_v39  ;;  %v6040_v16 = vadd.f32 %v498_v44, %v5724_v46  ;;  %v6043_v2 = vadd.f32 %v502_v22, %v5726_v32  ;;  %v6793_v10 = vld [vmem:[#allocation25_spill] sm:$0xff] }
 0x820   :  { %3070 = vrot.lane.b32.xlu1 %v6791_v53, %s3892_s16  ;;  %v536_v46 = vsel %vm535_vm6, %v533_v5, %v534_v41  ;;  %v544_v32 = vsel %vm535_vm6, %v6658_v25, %v526_v48  ;;  %v6073_v8 = vsel %vm535_vm6, %v530_v62, %v531_v52  ;;  %v6079_v60 = vsel %vm535_vm6, %v522_v18, %v523_v3  ;;  %v6796_v62 = vld [vmem:[#allocation88_spill] sm:$0xff]  ;;  %v6797_v18 = vld [vmem:[#allocation34_spill] sm:$0xff] }
 0x821   :  { %3034 = vrot.lane.b32.xlu2 %v6792_v23, %s3891_s28  ;;  %v6110_v53 = vsel %vm535_vm6, %v520_v4, %v521_v45  ;;  %v528_v45 = vrot.slane %v5068_v21, 1 }
 0x822   :  { %3030 = vrot.lane.b32.xlu0 %v6793_v10, %s3891_s28  ;;  %v572_v9 = vpop.permute.xlu1 %571  ;;  %v6799_v10 = vld [vmem:[#allocation54_spill] sm:$0xff] }
 0x823   :  { %v584_v27 = vmul.f32 %v6048_v26, %v572_v9 }
 0x825   :  { %v588_v43 = vmul.f32 %v584_v27, %v548_v37  ;;  %v592_v28 = vmul.f32 %v584_v27, %v544_v32  ;;  %v596_v55 = vmul.f32 %v584_v27, %v540_v51  ;;  %v600_v39 = vmul.f32 %v584_v27, %v536_v46  ;;  %v6800_v32 = vld [vmem:[#allocation37_spill] sm:$0xff]  ;;  %v6801_v27 = vld [vmem:[#allocation99_spill] sm:$0xff] }
 0x826   :  { %v527_v9 = vrot.slane %v6800_v32, 1 }
 0x827   :  { %v6081_v44 = vadd.f32 %v588_v43, %v505_v33  ;;  %v6083_v22 = vadd.f32 %v592_v28, %v509_v6  ;;  %v6085_v37 = vadd.f32 %v596_v55, %v513_v47  ;;  %v6087_v51 = vadd.f32 %v600_v39, %v517_v38  ;;  %v3830_v47 = vpop.eup %3829 }
 0x828   :  { %v6104_v6 = vsel %vm535_vm6, %v532_v35, %v533_v5  ;;  %v2809_v5 = vmul.f32 %v3830_v47, %v5841_v30  ;;  %v491_v43 = vmul.f32 %v6801_v27, %v6794_v58  ;;  %v495_v30 = vmul.f32 %v6801_v27, %v6800_v32 }
 0x829   :  { %3088 = vrot.lane.b32.xlu2 %v6796_v62, %s3892_s16  ;;  %v546_v58 = vsel %vm535_vm6, %v523_v3, %v524_v0  ;;  %v6805_v3 = vld [vmem:[#allocation29_spill] sm:$0xff] }
 0x82a   :  { %3036 = vrot.lane.b32.xlu0 %v6797_v18, %s3891_s28  ;;  %v633_v24 = vpop.permute.xlu1 %632  ;;  %v2825_v55 = vpack.c.bf16 %v2809_v5, %v2809_v5  ;;  %v538_v18 = vsel %vm535_vm6, %v531_v52, %v532_v35 }
 0x82b   :  { %v6100_v33 = vmul.f32 %v6092_v29, %v633_v24  ;;  %v6802_v24 = vld [vmem:[#allocation91_spill] sm:$0xff] }
 0x82c   :  { %v2774_v38 = vpop.xlane.xlu2 %2773  ;;  %v507_v47 = vadd.f32 %v491_v43, %v6802_v24 }
 0x82d   :  { %v6114_v23 = vmul.f32 %v6100_v33, %v6798_v7  ;;  %v6118_v46 = vmul.f32 %v6100_v33, %v6799_v10  ;;  %3831 = vrcp.f32 %v2774_v38  ;;  %v6804_v7 = vld [vmem:[#allocation93_spill] sm:$0xff] }
 0x82e   :  { %3833 = vrcp.f32 %v5979_v11  ;;  %v6156_v11 = vld [vmem:[%s6585_s1 + $0x7] ss:$0 sm:$0xff] }
 0x831   :  { %3098 = vrot.lane.b32.xlu2 %v5728_v57, %s3892_s16  ;;  %v499_v57 = vmul.f32 %v6801_v27, %v6795_v61 }
 0x832   :  { %3090 = vrot.lane.b32.xlu0 %v5631_v17, %s3892_s16  ;;  %v6128_v4 = vpop.permute.xlu1 %693  ;;  %v542_v17 = vsel %vm535_vm6, %v527_v9, %v528_v45 }
 0x833   :  { %v3832_v28 = vpop.eup %3831  ;;  %v515_v52 = vadd.f32 %v499_v57, %v6804_v7 }
 0x834   :  { %v562_v39 = vpop.permute.xlu2 %561  ;;  %v2808_v62 = vmul.f32 %v3832_v28, %v5859_v50  ;;  %v6803_v50 = vld [vmem:[#allocation92_spill] sm:$0xff]  ;;  %v2956_v28 = vunpack.c.l.b16 %v2825_v55  ;;  %v6807_v55 = vld [vmem:[#allocation89_spill] sm:$0xff] }
 0x835   :  { %v582_v61 = vmul.f32 %v6048_v26, %v562_v39  ;;  %v511_v38 = vadd.f32 %v495_v30, %v6803_v50  ;;  %v6806_v30 = vld [vmem:[#allocation101_spill] sm:$0xff]  ;;  %v6808_v50 = vld [vmem:[#allocation62_spill] sm:$0xff] }
 0x836   :  { %v2824_v35 = vpack.c.bf16 %v2808_v62, %v2808_v62 }
 0x837   :  { %v586_v10 = vmul.f32 %v582_v61, %v6024_v13  ;;  %v590_v5 = vmul.f32 %v582_v61, %v546_v58  ;;  %v594_v32 = vmul.f32 %v582_v61, %v542_v17  ;;  %v598_v27 = vmul.f32 %v582_v61, %v538_v18  ;;  %v3834_v61 = vpop.eup %3833 }
 0x838   :  { %v2955_v25 = vunpack.c.l.b16 %v2824_v35  ;;  %v6194_v35 = vld [vmem:[%s6585_s1 + $0x8] ss:$0 sm:$0xff] }
 0x839   :  { %3010 = vrot.lane.b32.xlu2 %v6805_v3, %s3891_s28  ;;  %v2765_v43 = vpop.xlane.xlu0 %2764  ;;  %v6161_v39 = vadd.f32 %v586_v10, %v6806_v30  ;;  %v6163_v57 = vadd.f32 %v590_v5, %v507_v47  ;;  %v6165_v13 = vadd.f32 %v594_v32, %v511_v38  ;;  %v6167_v62 = vadd.f32 %v598_v27, %v515_v52  ;;  %v6812_v30 = vld [vmem:[#allocation87_spill] sm:$0xff] }
 0x83a   :  { %3094 = vrot.lane.b32.xlu0 %v6807_v55, %s3892_s16  ;;  %v709_v18 = vpop.permute.xlu1 %708  ;;  %3835 = vrcp.f32 %v2765_v43  ;;  %v2958_v58 = vpack.c.b16 %v2956_v28, %v2955_v25  ;;  %v543_v47 = vsel %vm535_vm6, %v526_v48, %v527_v9  ;;  %v551_v25 = vsel %vm535_vm6, %v534_v41, %v519_v15  ;;  %v6810_v15 = vld [vmem:[#allocation103_spill] sm:$0xff]  ;;  %v6813_v55 = vld [vmem:[#allocation84_spill] sm:$0xff] }
 0x83b   :  { %v6172_v17 = vmul.f32 %v6156_v11, %v709_v18  ;;  %v2804_v52 = vmul.f32 %v3834_v61, %v5835_v12  ;;  %v6814_v18 = vld [vmem:[#allocation83_spill] sm:$0xff] }
 0x83c   :  { %v577_v24 = vpop.permute.xlu2 %576  ;;  %3531 = vmatmul.msk.bf16.gmra.mxu3 %vm1073_vm1, %v2958_v58 }
 0x83d   :  { %v6176_v7 = vmul.f32 %v6172_v17, %v6808_v50  ;;  %v585_v38 = vmul.f32 %v6048_v26, %v577_v24  ;;  %v2820_v27 = vpack.c.bf16 %v2804_v52, %v2804_v52  ;;  %v6815_v50 = vld [vmem:[#allocation56_spill] sm:$0xff]  ;;  %v6817_v52 = vld [vmem:[#allocation53_spill] sm:$0xff] }
 0x83f   :  { %v589_v19 = vmul.f32 %v585_v38, %v6079_v60  ;;  %v593_v10 = vmul.f32 %v585_v38, %v543_v47  ;;  %v597_v48 = vmul.f32 %v585_v38, %v6073_v8  ;;  %v601_v59 = vmul.f32 %v585_v38, %v551_v25  ;;  %v6811_v60 = vld [vmem:[#allocation102_spill] sm:$0xff]  ;;  %v6816_v25 = vld [vmem:[#allocation57_spill] sm:$0xff] }
 0x840   :  { %v3836_v9 = vpop.eup %3835  ;;  %v2914_v24 = vunpack.c.l.b16 %v2820_v27 }
 0x841   :  { %3072 = vrot.lane.b32.xlu2 %v6809_v36, %s3892_s16  ;;  %v2805_v41 = vmul.f32 %v3836_v9, %v6810_v15  ;;  %v6202_v5 = vadd.f32 %v589_v19, %v6035_v14  ;;  %v6205_v12 = vadd.f32 %v593_v10, %v6037_v49  ;;  %v6208_v32 = vadd.f32 %v597_v48, %v6040_v16  ;;  %v6818_v10 = vld [vmem:[#allocation55_spill] sm:$0xff] }
 0x842   :  { %3100 = vrot.lane.b32.xlu0 %v6811_v60, %s3892_s16  ;;  %v770_v8 = vpop.permute.xlu1 %769  ;;  %v6213_v28 = vadd.f32 %v601_v59, %v6043_v2  ;;  %v6819_v60 = vld [vmem:[#allocation24_spill] sm:$0xff] }
 0x843   :  { %v6216_v3 = vmul.f32 %v6194_v35, %v770_v8  ;;  %v2821_v43 = vpack.c.bf16 %v2805_v41, %v2805_v41 }
 0x844   :  { %v638_v14 = vpop.permute.xlu2 %637 }
 0x845   :  { %v6220_v49 = vmul.f32 %v6216_v3, %v6812_v30  ;;  %v6224_v16 = vmul.f32 %v6216_v3, %v6813_v55  ;;  %v6228_v58 = vmul.f32 %v6216_v3, %v6814_v18  ;;  %v2915_v61 = vunpack.c.l.b16 %v2821_v43 }
 0x846   :  { %v650_v2 = vmul.f32 %v6092_v29, %v638_v14 }
 0x847   :  { %v2917_v59 = vpack.c.b16 %v2915_v61, %v2914_v24  ;;  %v6823_v61 = vld [vmem:[#allocation32_spill] sm:$0xff] }
 0x848   :  { %v654_v47 = vmul.f32 %v650_v2, %v6815_v50  ;;  %v658_v38 = vmul.f32 %v650_v2, %v6816_v25  ;;  %v662_v19 = vmul.f32 %v650_v2, %v6817_v52  ;;  %v666_v48 = vmul.f32 %v650_v2, %v6818_v10  ;;  %v6824_v50 = vld [vmem:[#allocation44_spill] sm:$0xff]  ;;  %v6829_v10 = vld [vmem:[#allocation51_spill] sm:$0xff] }
 0x849   :  { %3529 = vmatmul.msk.bf16.gmra.mxu2 %vm1073_vm1, %v2917_v59  ;;  %v6825_v25 = vld [vmem:[#allocation40_spill] sm:$0xff] }
 0x84a   :  { %v6236_v9 = vadd.f32 %v654_v47, %v6081_v44  ;;  %v6239_v36 = vadd.f32 %v658_v38, %v6083_v22  ;;  %v6242_v15 = vadd.f32 %v662_v19, %v6085_v37  ;;  %v6245_v41 = vadd.f32 %v666_v48, %v6087_v51  ;;  %3006 = vrot.lane.b32.xlu0 %v6819_v60, %s3891_s28  ;;  %v6249_v8 = vpop.permute.xlu1 %3016 }
 0x84b   :  { %v541_v44 = vsel %vm535_vm6, %v528_v45, %v529_v31  ;;  %v6820_v22 = vrot.slane %v5138_v42, 1  ;;  %v6821_v31 = vld [vmem:[#allocation70_spill] sm:$0xff]  ;;  %v6822_v42 = vld [vmem:[#allocation67_spill] sm:$0xff]  ;;  %v661_v48 = vmul.f32 %v6100_v33, %v6829_v10 }
 0x84c   :  { %v567_v51 = vpop.permute.xlu0 %566  ;;  %v699_v27 = vpop.permute.xlu2 %698 }
 0x84d   :  { %v545_v37 = vsel %vm535_vm6, %v524_v0, %v6820_v22  ;;  %v583_v43 = vmul.f32 %v6048_v26, %v567_v51  ;;  %v715_v14 = vmul.f32 %v6156_v11, %v699_v27  ;;  %v6830_v51 = vld [vmem:[#allocation69_spill] sm:$0xff] }
 0x84f   :  { %v587_v40 = vmul.f32 %v583_v43, %v6110_v53  ;;  %v591_v30 = vmul.f32 %v583_v43, %v545_v37  ;;  %v595_v21 = vmul.f32 %v583_v43, %v541_v44  ;;  %v599_v55 = vmul.f32 %v583_v43, %v6104_v6 }
 0x850   :  { %v719_v45 = vmul.f32 %v715_v14, %v6821_v31  ;;  %v731_v18 = vmul.f32 %v715_v14, %v6822_v42  ;;  %v714_v37 = vmul.f32 %v6156_v11, %v6128_v4  ;;  %v723_v27 = vmul.f32 %v715_v14, %v6830_v51 }
 0x851   :  { %v603_v20 = vadd.f32 %v587_v40, %v5936_v63  ;;  %v607_v1 = vadd.f32 %v591_v30, %v5939_v34  ;;  %v611_v0 = vadd.f32 %v595_v21, %v5944_v56  ;;  %v615_v26 = vadd.f32 %v599_v55, %v5947_v54  ;;  %v6826_v63 = vld [vmem:[#allocation42_spill] sm:$0xff]  ;;  %v6827_v34 = vld [vmem:[#allocation41_spill] sm:$0xff]  ;;  %v6831_v40 = vld [vmem:[#allocation68_spill] sm:$0xff] }
 0x852   :  { %3012 = vrot.lane.b32.xlu0 %v6823_v61, %s3891_s28  ;;  %v6276_v53 = vpop.permute.xlu1 %3022  ;;  %v6828_v56 = vld [vmem:[#allocation50_spill] sm:$0xff]  ;;  %v727_v30 = vmul.f32 %v715_v14, %v6831_v40  ;;  %v6832_v61 = vld [vmem:[#allocation65_spill] sm:$0xff] }
 0x853   :  { %v657_v54 = vmul.f32 %v6100_v33, %v6828_v56  ;;  %v677_v55 = vadd.f32 %v661_v48, %v611_v0  ;;  %v681_v33 = vadd.f32 %v6118_v46, %v615_v26  ;;  %v6833_v46 = vld [vmem:[#allocation48_spill] sm:$0xff]  ;;  %v6840_v56 = vld [vmem:[#allocation74_spill] sm:$0xff]  ;;  %v6841_v48 = vld [vmem:[#allocation75_spill] sm:$0xff] }
 0x854   :  { %v628_v2 = vpop.permute.xlu0 %627  ;;  %v760_v24 = vpop.permute.xlu2 %759 }
 0x855   :  { %v648_v6 = vmul.f32 %v6092_v29, %v628_v2  ;;  %v673_v21 = vadd.f32 %v657_v54, %v607_v1  ;;  %v6303_v4 = vadd.f32 %v727_v30, %v677_v55  ;;  %v718_v2 = vmul.f32 %v714_v37, %v6832_v61  ;;  %v6337_v61 = vld [vmem:[%s6586_s2] ss:$0 sm:$0xff]  ;;  %s3894_s2 = smov 32  }
 0x856   :  { %v780_v14 = vmul.f32 %v6194_v35, %v760_v24  ;;  %v6307_v1 = vadd.f32 %v731_v18, %v681_v33 }
 0x857   :  { %v652_v47 = vmul.f32 %v648_v6, %v6824_v50  ;;  %v656_v38 = vmul.f32 %v648_v6, %v6825_v25  ;;  %v660_v52 = vmul.f32 %v648_v6, %v6826_v63  ;;  %v664_v19 = vmul.f32 %v648_v6, %v6827_v34  ;;  %v6834_v6 = vld [vmem:[#allocation47_spill] sm:$0xff]  ;;  %v6836_v50 = vld [vmem:[#allocation49_spill] sm:$0xff]  ;;  %v6837_v25 = vld [vmem:[#allocation64_spill] sm:$0xff] }
 0x858   :  { %v6301_v42 = vadd.f32 %v723_v27, %v673_v21  ;;  %v6838_v63 = vld [vmem:[#allocation63_spill] sm:$0xff]  ;;  %v6839_v34 = vld [vmem:[#allocation66_spill] sm:$0xff]  ;;  %v788_v51 = vmul.f32 %v780_v14, %v6841_v48  ;;  %v6842_v27 = vld [vmem:[#allocation77_spill] sm:$0xff] }
 0x859   :  { %v668_v59 = vadd.f32 %v652_v47, %v6161_v39  ;;  %v672_v60 = vadd.f32 %v656_v38, %v6163_v57  ;;  %v676_v44 = vadd.f32 %v660_v52, %v6165_v13  ;;  %v680_v22 = vadd.f32 %v664_v19, %v6167_v62 }
 0x85a   :  { %v6294_v43 = vpop.permute.xlu1 %3028  ;;  %v669_v57 = vadd.f32 %v6114_v23, %v603_v20  ;;  %v6835_v20 = vld [vmem:[#allocation46_spill] sm:$0xff]  ;;  %v722_v38 = vmul.f32 %v714_v37, %v6837_v25  ;;  %v726_v52 = vmul.f32 %v714_v37, %v6838_v63  ;;  %v730_v19 = vmul.f32 %v714_v37, %v6839_v34  ;;  %v6850_v25 = vld [vmem:[#allocation59_spill] sm:$0xff] }
 0x85b   :  { %v796_v40 = vmul.f32 %v780_v14, %v6842_v27  ;;  %v734_v37 = vadd.f32 %v718_v2, %v668_v59  ;;  %v6845_v2 = vld [vmem:[#allocation97_spill] sm:$0xff] }
 0x85c   :  { %v643_v39 = vpop.permute.xlu0 %642  ;;  %v775_v31 = vpop.permute.xlu2 %774  ;;  %v6309_v0 = vadd.f32 %v719_v45, %v669_v57  ;;  %v738_v21 = vadd.f32 %v722_v38, %v672_v60  ;;  %v746_v55 = vadd.f32 %v730_v19, %v680_v22  ;;  %v742_v33 = vadd.f32 %v726_v52, %v676_v44  ;;  %v6844_v57 = vld [vmem:[#allocation78_spill] sm:$0xff]  ;;  %v6851_v52 = vld [vmem:[#allocation72_spill] sm:$0xff] }
 0x85d   :  { %v651_v13 = vmul.f32 %v6092_v29, %v643_v39  ;;  %v783_v62 = vmul.f32 %v6194_v35, %v775_v31  ;;  %v6843_v39 = vld [vmem:[#allocation76_spill] sm:$0xff]  ;;  %v721_v38 = vmul.f32 %v6172_v17, %v6850_v25 }
 0x85e   :  { %v784_v31 = vmul.f32 %v780_v14, %v6843_v39  ;;  %v6339_v60 = vadd.f32 %v796_v40, %v746_v55  ;;  %v6853_v40 = vld [vmem:[#allocation71_spill] sm:$0xff]  ;;  %v6854_v39 = vld [vmem:[#allocation96_spill] sm:$0xff] }
 0x85f   :  { %v655_v26 = vmul.f32 %v651_v13, %v6833_v46  ;;  %v659_v23 = vmul.f32 %v651_v13, %v6834_v6  ;;  %v663_v29 = vmul.f32 %v651_v13, %v6835_v20  ;;  %v667_v47 = vmul.f32 %v651_v13, %v6836_v50  ;;  %v6846_v46 = vld [vmem:[#allocation95_spill] sm:$0xff]  ;;  %v6847_v6 = vld [vmem:[#allocation94_spill] sm:$0xff]  ;;  %v6849_v50 = vld [vmem:[#allocation61_spill] sm:$0xff] }
 0x860   :  { %v799_v24 = vmul.f32 %v783_v62, %v6840_v56  ;;  %v800_v22 = vadd.f32 %v784_v31, %v734_v37  ;;  %v6848_v20 = vld [vmem:[#allocation58_spill] sm:$0xff]  ;;  %v791_v34 = vmul.f32 %v783_v62, %v6851_v52 }
 0x861   :  { %v671_v18 = vadd.f32 %v655_v26, %v6202_v5  ;;  %v675_v45 = vadd.f32 %v659_v23, %v6205_v12  ;;  %v679_v54 = vadd.f32 %v663_v29, %v6208_v32  ;;  %v683_v10 = vadd.f32 %v667_v47, %v6213_v28 }
 0x862   :  { %v6325_v30 = vpop.permute.xlu1 %3082  ;;  %v792_v5 = vmul.f32 %v780_v14, %v6844_v57  ;;  %v6332_v28 = vadd.f32 %v788_v51, %v738_v21  ;;  %v725_v29 = vmul.f32 %v6172_v17, %v6848_v20  ;;  %v729_v47 = vmul.f32 %v6172_v17, %v6849_v50  ;;  %v6852_v51 = vld [vmem:[#allocation73_spill] sm:$0xff] }
 0x863   :  { %v749_v56 = vadd.f32 %v6176_v7, %v683_v10  ;;  %v787_v27 = vmul.f32 %v783_v62, %v6852_v51  ;;  %v795_v21 = vmul.f32 %v783_v62, %v6853_v40  ;;  %v737_v37 = vadd.f32 %v721_v38, %v671_v18  ;;  %v6855_v7 = vld [vmem:[#allocation82_spill] sm:$0xff]  ;;  %v6856_v10 = vld [vmem:[#allocation79_spill] sm:$0xff]  ;;  %v6857_v62 = vld [vmem:[#allocation85_spill] sm:$0xff] }
 0x864   :  { %v704_v13 = vpop.permute.xlu0 %703  ;;  %v6329_v12 = vpop.permute.xlu2 %3018  ;;  %v6341_v59 = vadd.f32 %v792_v5, %v742_v33  ;;  %v741_v19 = vadd.f32 %v725_v29, %v675_v45  ;;  %v745_v48 = vadd.f32 %v729_v47, %v679_v54 }
 0x865   :  { %v716_v32 = vmul.f32 %v6156_v11, %v704_v13  ;;  %v6348_v11 = vadd.f32 %v6337_v61, %v800_v22  ;;  %v815_v5 = vadd.f32 %v799_v24, %v749_v56  ;;  %v6860_v56 = vld [vmem:[#allocation20_spill] sm:$0xff] }
 0x866   :  { %v2898_v44 = vpop.f32.mrf.mxu1  ;;  %v6364_v17 = vadd.f32 %v791_v34, %v741_v19  ;;  %v811_v45 = vadd.f32 %v795_v21, %v745_v48  ;;  %v6858_v34 = vld [vmem:[#allocation81_spill] sm:$0xff]  ;;  %v6859_v19 = vld [vmem:[#allocation80_spill] sm:$0xff]  ;;  %v3193_v48 = vsel %vm888_vm0, %v6860_v56, %v6294_v43 }
 0x867   :  { %v720_v14 = vmul.f32 %v716_v32, %v6845_v2  ;;  %v728_v26 = vmul.f32 %v716_v32, %v6846_v46  ;;  %v732_v23 = vmul.f32 %v716_v32, %v6847_v6  ;;  %3142 = vrot.lane.b32.xlu2 %v2898_v44, %s3893_s27  ;;  %v724_v31 = vmul.f32 %v716_v32, %v6854_v39 }
 0x868   :  { %v803_v44 = vadd.f32 %v787_v27, %v737_v37  ;;  %v790_v2 = vmul.f32 %v6216_v3, %v6857_v62  ;;  %v6372_v18 = vadd.f32 %v6337_v61, %v815_v5 }
 0x869   :  { %v740_v32 = vadd.f32 %v724_v31, %v6239_v36  ;;  %v748_v46 = vadd.f32 %v732_v23, %v6245_v41  ;;  %v744_v6 = vadd.f32 %v728_v26, %v6242_v15  ;;  %v736_v20 = vadd.f32 %v720_v14, %v6236_v9 }
 0x86a   :  { %v3033_v63 = vpop.permute.xlu1 %3032  ;;  %v6378_v24 = vadd.f32 %v6337_v61, %v803_v44  ;;  %v6862_v44 = vld [vmem:[#allocation16_spill] sm:$0xff] }
 0x86b   :  { %v6386_v3 = vadd.f32 %v790_v2, %v740_v32  ;;  %v814_v50 = vadd.f32 %v6228_v58, %v748_v46  ;;  %v810_v47 = vadd.f32 %v6224_v16, %v744_v6  ;;  %v802_v52 = vadd.f32 %v6220_v49, %v736_v20  ;;  %v6863_v6 = vld [vmem:[#allocation18_spill] sm:$0xff] }
 0x86c   :  { %v765_v55 = vpop.permute.xlu0 %764  ;;  %v6360_v33 = vpop.permute.xlu2 %3024 }
 0x86d   :  { %v781_v57 = vmul.f32 %v6194_v35, %v765_v55  ;;  %v6375_v35 = vadd.f32 %v6337_v61, %v811_v45  ;;  %v6394_v15 = vadd.f32 %v6337_v61, %v814_v50  ;;  %v6397_v9 = vadd.f32 %v6337_v61, %v810_v47  ;;  %v6864_v50 = vld [vmem:[#allocation12_spill] sm:$0xff] }
 0x86e   :  { %v2900_v13 = vpop.f32.mrf.mxu1  ;;  %v6400_v14 = vadd.f32 %v6337_v61, %v802_v52 }
 0x86f   :  { %v785_v54 = vmul.f32 %v781_v57, %v6855_v7  ;;  %v797_v22 = vmul.f32 %v781_v57, %v6856_v10  ;;  %3144 = vrot.lane.b32.xlu0 %v2900_v13, %s3893_s27  ;;  %v789_v36 = vmul.f32 %v781_v57, %v6858_v34  ;;  %v793_v41 = vmul.f32 %v781_v57, %v6859_v19 }
 0x871   :  { %v6404_v16 = vadd.f32 %v789_v36, %v6301_v42  ;;  %v6407_v49 = vadd.f32 %v793_v41, %v6303_v4  ;;  %v813_v26 = vadd.f32 %v797_v22, %v6307_v1  ;;  %v801_v23 = vadd.f32 %v785_v54, %v6309_v0  ;;  %v6861_v0 = vld [vmem:[#allocation13_spill] sm:$0xff] }
 0x872   :  { %v6384_v29 = vpop.permute.xlu1 %3086  ;;  %v3195_v43 = vsel %vm888_vm0, %v6861_v0, %v3033_v63 }
 0x873   :  { %v6418_v40 = vadd.f32 %v6337_v61, %v813_v26  ;;  %v6423_v4 = vadd.f32 %v6337_v61, %v801_v23 }
 0x874   :  { %v3015_v25 = vpop.permute.xlu0 %3014  ;;  %v3079_v38 = vpop.permute.xlu2 %3078 }
 0x877   :  { %v2903_v58 = vpop.f32.mrf.mxu1 }
 0x878   :  { %3146 = vrot.lane.b32.xlu1 %v2903_v58, %s3893_s27  ;;  %v6865_v58 = vld [vmem:[#allocation19_spill] sm:$0xff] }
 0x87a   :  { %v3093_v51 = vpop.permute.xlu1 %3092 }
 0x87b   :  { %v6415_v27 = vsel %vm3198_vm7, %v3193_v48, %v3093_v51  ;;  %v2857_v48 = vpop.f32.mrf.mxu0  ;;  %v6866_v51 = vld [vmem:[#allocation5_spill] sm:$0xff] }
 0x87c   :  { %v3021_v42 = vpop.permute.xlu0 %3020  ;;  %v6420_v21 = vpop.permute.xlu2 %3084 }
 0x87f   :  { %v2905_v1 = vpop.f32.mrf.mxu1 }
 0x880   :  { %3148 = vrot.lane.b32.xlu2 %v2905_v1, %s3893_s27  ;;  %v3186_v1 = vsel %vm888_vm0, %v6866_v51, %v3015_v25 }
 0x882   :  { %v3097_v55 = vpop.permute.xlu1 %3096 }
 0x883   :  { %v6429_v37 = vsel %vm3198_vm7, %v3195_v43, %v3097_v55  ;;  %v3203_v55 = vsel %vm3198_vm7, %v3186_v1, %v3079_v38 }
 0x884   :  { %v3027_v39 = vpop.permute.xlu0 %3026  ;;  %v3035_v31 = vpop.permute.xlu2 %3034 }
 0x885   :  { %v2939_v57 = vpop.f32.mrf.mxu2  ;;  %v3196_v7 = vsel %vm888_vm0, %v6862_v44, %v3035_v31  ;;  %v3192_v20 = vsel %vm888_vm0, %v6863_v6, %v3027_v39  ;;  %v824_v39 = vadd.f32 %v6337_v61, %v6332_v28 }
 0x886   :  { %3150 = vrot.lane.b32.xlu1 %v2939_v57, %s3893_s27 }
 0x88a   :  { %v3009_v46 = vpop.permute.xlu1 %3008 }
 0x88b   :  { %v3183_v47 = vsel %vm888_vm0, %v6864_v50, %v3009_v46  ;;  %v6868_v46 = vld [vmem:[#allocation8_spill] sm:$0xff] }
 0x88c   :  { %v3081_v5 = vpop.permute.xlu0 %3080  ;;  %v6432_v13 = vpop.permute.xlu2 %3088  ;;  %v3189_v6 = vsel %vm888_vm0, %v6868_v46, %v3021_v42 }
 0x88d   :  { %v2941_v22 = vpop.f32.mrf.mxu2 }
 0x88e   :  { %v2980_v45 = vpop.f32.mrf.mxu3 }
 0x88f   :  { %3158 = vrot.lane.b32.xlu2 %v2980_v45, %s3893_s27  ;;  %v6867_v45 = vld [vmem:[#allocation9_spill] sm:$0xff] }
 0x894   :  { %v6437_v54 = vpop.permute.xlu0 %3030  ;;  %v3099_v63 = vpop.permute.xlu2 %3098 }
 0x895   :  { %v6440_v10 = vsel %vm3198_vm7, %v3196_v7, %v3099_v63  ;;  %v3071_v63 = vpop.permute.xlu1 %3070 }
 0x896   :  { %v2982_v62 = vpop.f32.mrf.mxu3 }
 0x897   :  { %3152 = vrot.lane.b32.xlu2 %v2941_v22, %s3893_s27  ;;  %3160 = vrot.lane.b32.xlu0 %v2982_v62, %s3893_s27  ;;  %v2859_v22 = vpop.f32.mrf.mxu0 }
 0x89c   :  { %v3037_v2 = vpop.permute.xlu0 %3036  ;;  %v6444_v32 = vpop.permute.xlu2 %3010 }
 0x89d   :  { %v3197_v26 = vsel %vm888_vm0, %v6865_v58, %v3037_v2 }
 0x89f   :  { %v2862_v38 = vpop.f32.mrf.mxu0 }
 0x8a4   :  { %v3091_v52 = vpop.permute.xlu0 %3090  ;;  %v3073_v34 = vpop.permute.xlu2 %3072 }
 0x8a5   :  { %v6451_v36 = vsel %vm3198_vm7, %v3192_v20, %v3091_v52  ;;  %v6454_v19 = vsel %vm3198_vm7, %v3183_v47, %v3073_v34  ;;  %v6869_v20 = vld [vmem:[#allocation98_spill] sm:$0xff]  ;;  %v3206_v52 = vsel %vm3198_vm7, %v3189_v6, %v6420_v21  ;;  %v827_v34 = vadd.f32 %v6337_v61, %v6364_v17 }
 0x8a6   :  { %v825_v21 = vadd.f32 %v6337_v61, %v6404_v16 }
 0x8a7   :  { %v2864_v50 = vpop.f32.mrf.mxu0 }
 0x8ac   :  { %v3095_v41 = vpop.permute.xlu0 %3094 }
 0x8b4   :  { %v3101_v23 = vpop.permute.xlu0 %3100 }
 0x8b5   :  { %v6459_v56 = vsel %vm3198_vm7, %v3197_v26, %v3101_v23  ;;  %v6870_v23 = vld [vmem:[#allocation100_spill] sm:$0xff] }
 0x8bc   :  { %v3007_v0 = vpop.permute.xlu0 %3006 }
 0x8bd   :  { %v3182_v44 = vsel %vm888_vm0, %v6867_v45, %v3007_v0 }
 0x8be   :  { %v6471_v25 = vsel %vm3198_vm7, %v3182_v44, %v3071_v63  ;;  %v6873_v44 = vld [vmem:[#allocation10_spill] sm:$0xff] }
 0x8bf   :  { %v2985_v43 = vpop.f32.mrf.mxu3 }
 0x8c0   :  { %3162 = vrot.lane.b32.xlu1 %v2985_v43, %s3893_s27 }
 0x8c1   :  { %v3143_v31 = vpop.permute.xlu2 %3142 }
 0x8c2   :  { %v3220_v57 = vsel %vm3215_vm8, %v3203_v55, %v3143_v31  ;;  %v6872_v55 = vld [vmem:[#allocation7_spill] sm:$0xff] }
 0x8c3   :  { %v3236_v7 = vadd.f32 %v3220_v57, %v824_v39  ;;  %v3188_v39 = vsel %vm888_vm0, %v6872_v55, %v6329_v12  ;;  %v3194_v12 = vsel %vm888_vm0, %v6873_v44, %v6437_v54  ;;  %v832_v54 = vadd.f32 %v6337_v61, %v6339_v60 }
 0x8c4   :  { %v6481_v47 = vpop.permute.xlu0 %3012 }
 0x8c7   :  { %v2987_v62 = vpop.f32.mrf.mxu3 }
 0x8c8   :  { %3164 = vrot.lane.b32.xlu2 %v2987_v62, %s3893_s27  ;;  %v829_v62 = vadd.f32 %v6337_v61, %v6407_v49  ;;  %v828_v49 = vadd.f32 %v6337_v61, %v6341_v59 }
 0x8cc   :  { %v2944_v2 = vpop.f32.mrf.mxu2 }
 0x8cd   :  { %3154 = vrot.lane.b32.xlu0 %v2944_v2, %s3893_s27 }
 0x8d0   :  { %3134 = vrot.lane.b32.xlu2 %v2857_v48, %s3893_s27  ;;  %v6871_v48 = vld [vmem:[#allocation6_spill] sm:$0xff] }
 0x8d1   :  { %v3187_v51 = vsel %vm888_vm0, %v6871_v48, %v6249_v8  ;;  %v826_v8 = vadd.f32 %v6337_v61, %v6386_v3  ;;  %v6876_v48 = vld [vmem:[#allocation14_spill] sm:$0xff] }
 0x8d2   :  { %v3204_v1 = vsel %vm3198_vm7, %v3187_v51, %v3081_v5  ;;  %v3205_v5 = vsel %vm3198_vm7, %v3188_v39, %v6325_v30  ;;  %v3184_v51 = vsel %vm888_vm0, %v6876_v48, %v6444_v32 }
 0x8d4   :  { %v2946_v28 = vpop.f32.mrf.mxu2 }
 0x8d5   :  { %3074 = vrot.lane.b32.xlu0 %v6869_v20, %s3892_s16  ;;  %3156 = vrot.lane.b32.xlu1 %v2946_v28, %s3893_s27 }
 0x8d8   :  { %3140 = vrot.lane.b32.xlu2 %v2864_v50, %s3893_s27 }
 0x8da   :  { %v3149_v58 = vpop.permute.xlu2 %3148 }
 0x8db   :  { %v3223_v26 = vsel %vm3215_vm8, %v3206_v52, %v3149_v58 }
 0x8dc   :  { %v3239_v42 = vadd.f32 %v3223_v26, %v827_v34 }
 0x8dd   :  { %3136 = vrot.lane.b32.xlu0 %v2859_v22, %s3893_s27  ;;  %3076 = vrot.lane.b32.xlu1 %v6870_v23, %s3892_s16  ;;  %v3211_v22 = vsel %vm3198_vm7, %v3194_v12, %v3095_v41 }
 0x8e1   :  { %v3145_v0 = vpop.permute.xlu0 %3144 }
 0x8e2   :  { %v3221_v17 = vsel %vm3215_vm8, %v3204_v1, %v3145_v0 }
 0x8e3   :  { %v3237_v43 = vadd.f32 %v3221_v17, %v825_v21 }
 0x8e5   :  { %3138 = vrot.lane.b32.xlu1 %v2862_v38, %s3893_s27  ;;  %3252 = vrot.lane.b32.xlu0 %v3236_v7, %s3894_s2  ;;  %v6874_v7 = vld [vmem:[#allocation15_spill] sm:$0xff] }
 0x8e6   :  { %v3191_v63 = vsel %vm888_vm0, %v6874_v7, %v6360_v33  ;;  %v6875_v33 = vld [vmem:[#allocation11_spill] sm:$0xff] }
 0x8e7   :  { %v3208_v3 = vsel %vm3198_vm7, %v3191_v63, %v6432_v13  ;;  %v3190_v13 = vsel %vm888_vm0, %v6875_v33, %v6276_v53 }
 0x8e8   :  { %v3207_v41 = vsel %vm3198_vm7, %v3190_v13, %v6384_v29 }
 0x8e9   :  { %v3159_v31 = vpop.permute.xlu2 %3158 }
 0x8ea   :  { %v3147_v57 = vpop.permute.xlu1 %3146  ;;  %v3228_v30 = vsel %vm3215_vm8, %v3211_v22, %v3159_v31 }
 0x8eb   :  { %v3222_v16 = vsel %vm3215_vm8, %v3205_v5, %v3147_v57  ;;  %v3244_v46 = vadd.f32 %v3228_v30, %v832_v54 }
 0x8ec   :  { %v3238_v45 = vadd.f32 %v3222_v16, %v826_v8 }
 0x8ed   :  { %3254 = vrot.lane.b32.xlu1 %v3237_v43, %s3894_s2  ;;  %3258 = vrot.lane.b32.xlu0 %v3239_v42, %s3894_s2 }
 0x8ee   :  { %3256 = vrot.lane.b32.xlu2 %v3238_v45, %s3894_s2 }
 0x8f1   :  { %v3153_v38 = vpop.permute.xlu2 %3152 }
 0x8f2   :  { %v3225_v2 = vsel %vm3215_vm8, %v3208_v3, %v3153_v38 }
 0x8f3   :  { %v3241_v28 = vadd.f32 %v3225_v2, %v829_v62 }
 0x8f6   :  { %3284 = vrot.lane.b32.xlu2 %v3244_v46, %s3895_s29 }
 0x8f8   :  { %v3151_v6 = vpop.permute.xlu1 %3150 }
 0x8f9   :  { %v3224_v60 = vsel %vm3215_vm8, %v3207_v41, %v3151_v6 }
 0x8fa   :  { %v3240_v20 = vadd.f32 %v3224_v60, %v828_v49 }
 0x8fc   :  { %3268 = vrot.lane.b32.xlu1 %v3240_v20, %s3896_s30 }
 0x8fe   :  { %3270 = vrot.lane.b32.xlu2 %v3241_v28, %s3896_s30 }
 0x909   :  { %v3161_v50 = vpop.permute.xlu0 %3160 }
 0x90a   :  { %v3229_v52 = vsel %vm3215_vm8, %v6429_v37, %v3161_v50 }
 0x90b   :  { %v3245_v34 = vadd.f32 %v3229_v52, %v6418_v40 }
 0x922   :  { %v3165_v53 = vpop.permute.xlu2 %3164 }
 0x923   :  { %v3231_v29 = vsel %vm3215_vm8, %v6459_v56, %v3165_v53 }
 0x924   :  { %v3247_v58 = vadd.f32 %v3231_v29, %v6372_v18 }
 0x926   :  { %3290 = vrot.lane.b32.xlu2 %v3247_v58, %s3895_s29 }
 0x92a   :  { %v3135_v61 = vpop.permute.xlu2 %3134 }
 0x92b   :  { %v3216_v59 = vsel %vm3215_vm8, %v6471_v25, %v3135_v61 }
 0x92c   :  { %v3232_v26 = vadd.f32 %v3216_v59, %v6348_v11 }
 0x932   :  { %v3163_v42 = vpop.permute.xlu1 %3162  ;;  %v3141_v17 = vpop.permute.xlu2 %3140 }
 0x933   :  { %v3230_v37 = vsel %vm3215_vm8, %v6440_v10, %v3163_v42 }
 0x934   :  { %v3246_v40 = vadd.f32 %v3230_v37, %v6394_v15 }
 0x93f   :  { %v3155_v23 = vpop.permute.xlu0 %3154 }
 0x940   :  { %v3226_v56 = vsel %vm3215_vm8, %v6451_v36, %v3155_v23  ;;  %v6877_v36 = vld [vmem:[#allocation17_spill] sm:$0xff] }
 0x941   :  { %v3242_v18 = vadd.f32 %v3226_v56, %v6397_v9  ;;  %v3185_v9 = vsel %vm888_vm0, %v6877_v36, %v6481_v47 }
 0x943   :  { %3272 = vrot.lane.b32.xlu0 %v3242_v18, %s3896_s30 }
 0x947   :  { %v3075_v25 = vpop.permute.xlu0 %3074  ;;  %v3157_v1 = vpop.permute.xlu1 %3156 }
 0x948   :  { %v3201_v11 = vsel %vm3198_vm7, %v3184_v51, %v3075_v25  ;;  %v3227_v10 = vsel %vm3215_vm8, %v6415_v27, %v3157_v1  ;;  %v3257_v8 = vpop.permute.xlu2 %3256 }
 0x949   :  { %v3243_v15 = vadd.f32 %v3227_v10, %v6375_v35 }
 0x94b   :  { %3274 = vrot.lane.b32.xlu1 %v3243_v15, %s3896_s30  ;;  %3286 = vrot.lane.b32.xlu0 %v3245_v34, %s3895_s29 }
 0x94f   :  { %v3137_v0 = vpop.permute.xlu0 %3136  ;;  %v3077_v21 = vpop.permute.xlu1 %3076 }
 0x950   :  { %v3217_v32 = vsel %vm3215_vm8, %v6454_v19, %v3137_v0  ;;  %v3202_v43 = vsel %vm3198_vm7, %v3185_v9, %v3077_v21 }
 0x951   :  { %v3233_v55 = vadd.f32 %v3217_v32, %v6423_v4  ;;  %v3219_v27 = vsel %vm3215_vm8, %v3202_v43, %v3141_v17 }
 0x952   :  { %v3235_v35 = vadd.f32 %v3219_v27, %v6378_v24  ;;  %v3285_v24 = vpop.permute.xlu2 %3284 }
 0x953   :  { %3288 = vrot.lane.b32.xlu1 %v3246_v40, %s3895_s29 }
 0x957   :  { %v3139_v39 = vpop.permute.xlu1 %3138  ;;  %v3253_v16 = vpop.permute.xlu0 %3252 }
 0x958   :  { %v3218_v31 = vsel %vm3215_vm8, %v3201_v11, %v3139_v39  ;;  %v3296_v4 = vsel %vm1073_vm1, %v3232_v26, %v3253_v16 }
 0x959   :  { %v3234_v47 = vadd.f32 %v3218_v31, %v6400_v14 }
 0x95a   :  { %v3271_v63 = vpop.permute.xlu2 %3270 }
 0x95b   :  { %v3298_v19 = vsel %vm1073_vm1, %v3234_v47, %v3257_v8 }
 0x95f   :  { %v3255_v57 = vpop.permute.xlu1 %3254  ;;  %v3259_v7 = vpop.permute.xlu0 %3258 }
 0x960   :  { %v3297_v5 = vsel %vm1073_vm1, %v3233_v55, %v3255_v57  ;;  %v3299_v22 = vsel %vm1073_vm1, %v3235_v35, %v3259_v7 }
 0x961   :  { %v3302_v62 = vsel %vm3300_vm10, %v3297_v5, %v3271_v63 }
 0x96e   :  { %v3269_v45 = vpop.permute.xlu1 %3268 }
 0x96f   :  { %v3301_v44 = vsel %vm3300_vm10, %v3296_v4, %v3269_v45 }
 0x970   :  { %v3306_v12 = vsel %vm3305_vm9, %v3301_v44, %v3285_v24 }
 0x971   :  { %3310 = vst [vmem:[#allocation2] sm:$0xff] %v3306_v12 }
 0x980   :  { %v3291_v38 = vpop.permute.xlu2 %3290 }
 0x9b5   :  { %v3273_v14 = vpop.permute.xlu0 %3272 }
 0x9b6   :  { %v3303_v46 = vsel %vm3300_vm10, %v3298_v19, %v3273_v14 }
 0x9bd   :  { %v3275_v3 = vpop.permute.xlu1 %3274  ;;  %v3287_v30 = vpop.permute.xlu0 %3286 }
 0x9be   :  { %v3304_v54 = vsel %vm3300_vm10, %v3299_v22, %v3275_v3  ;;  %v3307_v2 = vsel %vm3305_vm9, %v3302_v62, %v3287_v30 }
 0x9bf   :  { %v3309_v28 = vsel %vm3305_vm9, %v3304_v54, %v3291_v38  ;;  %3311 = vst [vmem:[#allocation2 + $0x8] sm:$0xff] %v3307_v2 }
 0x9c0   :  { %3313 = vst [vmem:[#allocation2 + $0x18] sm:$0xff] %v3309_v28 }
 0x9c5   :  { %v3289_v33 = vpop.permute.xlu1 %3288 }
 0x9c6   :  { %v3308_v13 = vsel %vm3305_vm9, %v3303_v46, %v3289_v33 }
 0x9c7   :  { %3312 = vst [vmem:[#allocation2 + $0x10] sm:$0xff] %v3308_v13 }
 0x9c8   :  { %3326 = dma.vmem_to_hbm [thread:$0]  %s3319_s12, 512, %s3321_s10, [#allocation3], %s3898_s13, %s3898_s13, %s3891_s28  }
 0x9c9   :  { %3885 = dma.done.wait [#allocation3], 512  }
 0x9ca   :  { %3886 = vsyncadd [#allocation3], 4294966784 }
 0x9cb   :  { %3331 = vsyncpa [#allocation3], 1 }

</bundles_post_ra>
